<compile_context>
chip_gen: v7x
topology: tpu7x:2x2x1
jax: 0.10.0
libtpu: 0.0.40
codegen_flags: <defaults>
</compile_context>

<pallas_src>
import math

import jax
import jax.numpy as jnp
from jax import lax
from jax.experimental import pallas as pl
from jax.experimental.pallas import tpu as pltpu

# ---------------- config (small, consistent with the module) ----------------
N_VOCAB = 11
VOCAB_PAD = 128           # lane-dense padding for one-hot embedding / logits
D_MODEL = 32
N_HEADS = 4
D_HEAD = D_MODEL // N_HEADS
D_FF = 64
N_LAYERS = 2
SEQ = 8
BATCH = 2
BS = BATCH * SEQ
LN_EPS = 1e-5
CL_INDEX = 0              # IndexPool index (CLS token position)


def _layer_norm(x, gamma, beta, eps):
    mean = jnp.mean(x, axis=-1, keepdims=True)
    var = jnp.mean((x - mean) ** 2, axis=-1, keepdims=True)
    return (x - mean) * lax.rsqrt(var + eps) * gamma + beta


# ------------------- Pallas kernel: fully fused forward ---------------------
def fused_forward_kernel(tok_ref, pe_ref, emb_ref,
                         wq_ref, bq_ref, wk_ref, bk_ref, wv_ref, bv_ref,
                         wo_ref, bo_ref, ln1g_ref, ln1b_ref,
                         w1_ref, b1_ref, w2_ref, b2_ref, ln2g_ref, ln2b_ref,
                         wc_ref, bc_ref, out_ref):
    f32 = jnp.float32

    # 1) Embedding lookup as one-hot matmul (avoids in-kernel gather) + PE add.
    tok = tok_ref[...]                                            # (BS, 1) int32
    vocab_iota = lax.broadcasted_iota(jnp.int32, (BS, VOCAB_PAD), 1)
    onehot = (vocab_iota == tok).astype(f32)                      # (BS, 128)
    x = jnp.dot(onehot, emb_ref[...], preferred_element_type=f32) + pe_ref[...]

    # 2) N_LAYERS post-norm encoder layers, fully unrolled; batch folded into
    #    the row dimension (x is (B*S, D), batch-major rows).
    for l in range(N_LAYERS):
        attn = jnp.zeros((BS, D_MODEL), f32)
        for h in range(N_HEADS):
            # Per-head projections from pre-split, pre-transposed weights
            # (no lane slicing of activations; softmax scale folded into wq/bq).
            q = (jnp.dot(x, wq_ref[l, h], preferred_element_type=f32)
                 + bq_ref[l, h]).reshape(BATCH, SEQ, D_HEAD)
            k = (jnp.dot(x, wk_ref[l, h], preferred_element_type=f32)
                 + bk_ref[l, h]).reshape(BATCH, SEQ, D_HEAD)
            v = (jnp.dot(x, wv_ref[l, h], preferred_element_type=f32)
                 + bv_ref[l, h]).reshape(BATCH, SEQ, D_HEAD)
            # Scores / softmax / PV, batched over the batch dim on the MXU.
            s = jnp.einsum('bqd,bkd->bqk', q, k, preferred_element_type=f32)
            s = s - jnp.max(s, axis=-1, keepdims=True)
            p = jnp.exp(s)
            p = p / jnp.sum(p, axis=-1, keepdims=True)
            o = jnp.einsum('bqk,bkd->bqd', p, v, preferred_element_type=f32)
            # Head merge folded into the out-projection (no lane concatenate).
            attn = attn + jnp.dot(o.reshape(BS, D_HEAD), wo_ref[l, h],
                                  preferred_element_type=f32)
        attn = attn + bo_ref[l]

        # Post-norm residual blocks (norm_first=False), dropout = identity.
        y = _layer_norm(x + attn, ln1g_ref[l], ln1b_ref[l], LN_EPS)
        hdn = jnp.maximum(
            jnp.dot(y, w1_ref[l], preferred_element_type=f32) + b1_ref[l], 0.0)
        ff = jnp.dot(hdn, w2_ref[l], preferred_element_type=f32) + b2_ref[l]
        x = _layer_norm(y + ff, ln2g_ref[l], ln2b_ref[l], LN_EPS)

    # 3) IndexPool(dim=seq, index=CL_INDEX) as a selection matmul, then the
    #    linear classifier (vocab padded to 128 lanes for a dense store).
    row_idx = lax.broadcasted_iota(jnp.int32, (BATCH, BS), 1)
    cls_row = lax.broadcasted_iota(jnp.int32, (BATCH, BS), 0) * SEQ + CL_INDEX
    row_sel = (row_idx == cls_row).astype(f32)                    # (B, B*S)
    pooled = jnp.dot(row_sel, x, preferred_element_type=f32)      # (B, D)
    out_ref[...] = (jnp.dot(pooled, wc_ref[...], preferred_element_type=f32)
                    + bc_ref[...])


@jax.jit
def encoder_sequence_classifier(tokens, packed):
    # tokens: (S, B) int32, seq-first like the PyTorch module.
    S, B = tokens.shape
    tok_rows = tokens.T.reshape(B * S, 1)      # batch-major rows (tiny int glue)
    vmem = pl.BlockSpec(memory_space=pltpu.MemorySpace.VMEM)
    inputs = (tok_rows, packed["pe"], packed["emb"],
              packed["wq"], packed["bq"], packed["wk"], packed["bk"],
              packed["wv"], packed["bv"],
              packed["wo"], packed["bo"], packed["ln1_g"], packed["ln1_b"],
              packed["w1"], packed["b1"], packed["w2"], packed["b2"],
              packed["ln2_g"], packed["ln2_b"],
              packed["cls_w"], packed["cls_b"])
    logits_pad = pl.pallas_call(
        fused_forward_kernel,
        out_shape=jax.ShapeDtypeStruct((B, VOCAB_PAD), jnp.float32),
        in_specs=[vmem] * len(inputs),
        out_specs=vmem,
    )(*inputs)
    return logits_pad[:, :N_VOCAB]             # (B, n_vocab)


# --------------------------- parameter construction -------------------------
def make_params(key):
    """Random parameters in PyTorch layouts (nn.Module conventions)."""
    def nrm(k, shape, s=0.02):
        return (s * jax.random.normal(k, shape)).astype(jnp.float32)

    keys = jax.random.split(key, 3 + N_LAYERS)
    params = {
        "embedding": nrm(keys[0], (N_VOCAB, D_MODEL), 1.0),
        "cls_w": nrm(keys[1], (N_VOCAB, D_MODEL)),
        "cls_b": nrm(keys[2], (N_VOCAB,)),
        "layers": [],
    }
    for l in range(N_LAYERS):
        k = jax.random.split(keys[3 + l], 8)
        params["layers"].append(dict(
            in_proj_w=nrm(k[0], (3 * D_MODEL, D_MODEL)),
            in_proj_b=nrm(k[1], (3 * D_MODEL,)),
            out_proj_w=nrm(k[2], (D_MODEL, D_MODEL)),
            out_proj_b=nrm(k[3], (D_MODEL,)),
            ln1_g=jnp.ones((D_MODEL,), jnp.float32),
            ln1_b=jnp.zeros((D_MODEL,), jnp.float32),
            w1=nrm(k[4], (D_FF, D_MODEL)),
            b1=nrm(k[5], (D_FF,)),
            w2=nrm(k[6], (D_MODEL, D_FF)),
            b2=nrm(k[7], (D_MODEL,)),
            ln2_g=jnp.ones((D_MODEL,), jnp.float32),
            ln2_b=jnp.zeros((D_MODEL,), jnp.float32),
        ))
    return params


def sinusoidal_pe(max_len, d_model):
    position = jnp.arange(max_len, dtype=jnp.float32)[:, None]
    div_term = jnp.exp(jnp.arange(0, d_model, 2, dtype=jnp.float32)
                       * (-math.log(10000.0) / d_model))
    pe = jnp.zeros((max_len, 1, d_model), jnp.float32)
    pe = pe.at[:, 0, 0::2].set(jnp.sin(position * div_term))
    pe = pe.at[:, 0, 1::2].set(jnp.cos(position * div_term))
    return pe


def pack_params(params, pe_buffer):
    """One-time host-side packing: pre-transpose, split heads, fold the
    softmax scale, stack layers, pad vocab to 128 lanes."""
    scale = 1.0 / math.sqrt(D_HEAD)

    def qkv_heads(w_rows, b_rows, s=1.0):
        # PyTorch: proj = x @ w_rows.T + b_rows. Pre-transpose + split heads.
        wt = (w_rows.T * s).reshape(D_MODEL, N_HEADS, D_HEAD).transpose(1, 0, 2)
        bt = (b_rows * s).reshape(N_HEADS, 1, D_HEAD)
        return wt, bt                                   # (H, D, Dh), (H, 1, Dh)

    names = ("wq", "bq", "wk", "bk", "wv", "bv", "wo", "bo",
             "ln1_g", "ln1_b", "w1", "b1", "w2", "b2", "ln2_g", "ln2_b")
    acc = {n: [] for n in names}
    for lp in params["layers"]:
        w_in, b_in = lp["in_proj_w"], lp["in_proj_b"]
        wq, bq = qkv_heads(w_in[:D_MODEL], b_in[:D_MODEL], scale)  # scale folded
        wk, bk = qkv_heads(w_in[D_MODEL:2 * D_MODEL], b_in[D_MODEL:2 * D_MODEL])
        wv, bv = qkv_heads(w_in[2 * D_MODEL:], b_in[2 * D_MODEL:])
        acc["wq"].append(wq); acc["bq"].append(bq)
        acc["wk"].append(wk); acc["bk"].append(bk)
        acc["wv"].append(wv); acc["bv"].append(bv)
        acc["wo"].append(lp["out_proj_w"].T.reshape(N_HEADS, D_HEAD, D_MODEL))
        acc["bo"].append(lp["out_proj_b"].reshape(1, D_MODEL))
        acc["ln1_g"].append(lp["ln1_g"].reshape(1, D_MODEL))
        acc["ln1_b"].append(lp["ln1_b"].reshape(1, D_MODEL))
        acc["w1"].append(lp["w1"].T)                    # (D, Dff)
        acc["b1"].append(lp["b1"].reshape(1, D_FF))
        acc["w2"].append(lp["w2"].T)                    # (Dff, D)
        acc["b2"].append(lp["b2"].reshape(1, D_MODEL))
        acc["ln2_g"].append(lp["ln2_g"].reshape(1, D_MODEL))
        acc["ln2_b"].append(lp["ln2_b"].reshape(1, D_MODEL))
    packed = {n: jnp.stack(v) for n, v in acc.items()}  # leading layer axis

    packed["emb"] = (jnp.zeros((VOCAB_PAD, D_MODEL), jnp.float32)
                     .at[:N_VOCAB].set(params["embedding"]))
    packed["cls_w"] = (jnp.zeros((D_MODEL, VOCAB_PAD), jnp.float32)
                       .at[:, :N_VOCAB].set(params["cls_w"].T))
    packed["cls_b"] = (jnp.zeros((1, VOCAB_PAD), jnp.float32)
                       .at[0, :N_VOCAB].set(params["cls_b"]))
    # PE replicated per batch in (B*S, D) batch-major row order.
    pe_sd = pe_buffer[:SEQ, 0, :]
    packed["pe"] = jnp.broadcast_to(pe_sd[None], (BATCH, SEQ, D_MODEL)
                                    ).reshape(BS, D_MODEL)
    return packed


# --------------------- pure-JAX reference (PyTorch semantics) ---------------
def reference_forward(tokens, params, pe_buffer):
    """Mirror of the PyTorch module (eval mode), seq-first layout."""
    S, B = tokens.shape
    x = params["embedding"][tokens] + pe_buffer[:S]                # (S, B, D)
    scale = 1.0 / math.sqrt(D_HEAD)
    for lp in params["layers"]:
        qkv = jnp.einsum('sbd,ed->sbe', x, lp["in_proj_w"]) + lp["in_proj_b"]
        q, k, v = jnp.split(qkv, 3, axis=-1)

        def heads(t):                                              # (B,H,S,Dh)
            return t.reshape(S, B, N_HEADS, D_HEAD).transpose(1, 2, 0, 3)

        qh, kh, vh = heads(q), heads(k), heads(v)
        s = jnp.einsum('bhqd,bhkd->bhqk', qh, kh) * scale
        p = jax.nn.softmax(s, axis=-1)
        o = jnp.einsum('bhqk,bhkd->bhqd', p, vh)                   # (B,H,S,Dh)
        o = o.transpose(2, 0, 1, 3).reshape(S, B, D_MODEL)
        attn = jnp.einsum('sbd,ed->sbe', o, lp["out_proj_w"]) + lp["out_proj_b"]
        y = _layer_norm(x + attn, lp["ln1_g"], lp["ln1_b"], LN_EPS)
        hdn = jax.nn.relu(jnp.einsum('sbd,fd->sbf', y, lp["w1"]) + lp["b1"])
        ff = jnp.einsum('sbf,df->sbd', hdn, lp["w2"]) + lp["b2"]
        x = _layer_norm(y + ff, lp["ln2_g"], lp["ln2_b"], LN_EPS)
    pooled = x[CL_INDEX]                                           # (B, D)
    return pooled @ params["cls_w"].T + params["cls_b"]            # (B, n_vocab)


if __name__ == "__main__":
    key = jax.random.PRNGKey(0)
    kp, kt = jax.random.split(key)
    params = make_params(kp)
    pe = sinusoidal_pe(64, D_MODEL)
    packed = pack_params(params, pe)
    tokens = jax.random.randint(kt, (SEQ, BATCH), 0, N_VOCAB, dtype=jnp.int32)

    logits = encoder_sequence_classifier(tokens, packed)
    jax.block_until_ready(logits)
    assert logits.shape == (BATCH, N_VOCAB)
    assert bool(jnp.all(jnp.isfinite(logits)))

    # Validate against the pure-JAX reference of the PyTorch module.
    ref = reference_forward(tokens, params, pe)
    assert bool(jnp.allclose(logits, ref, rtol=1e-4, atol=1e-5)), (
        f"max abs err {float(jnp.max(jnp.abs(logits - ref)))}")
    print("KERNEL_OK")
</pallas_src>

<mosaic_0001>
module attributes {stable_mosaic.version = 11 : i64} {
  func.func @fused_forward_kernel(%arg0: memref<16x1xi32, #tpu.memory_space<vmem>>, %arg1: memref<16x32xf32, #tpu.memory_space<vmem>>, %arg2: memref<128x32xf32, #tpu.memory_space<vmem>>, %arg3: memref<2x4x32x8xf32, #tpu.memory_space<vmem>>, %arg4: memref<2x4x1x8xf32, #tpu.memory_space<vmem>>, %arg5: memref<2x4x32x8xf32, #tpu.memory_space<vmem>>, %arg6: memref<2x4x1x8xf32, #tpu.memory_space<vmem>>, %arg7: memref<2x4x32x8xf32, #tpu.memory_space<vmem>>, %arg8: memref<2x4x1x8xf32, #tpu.memory_space<vmem>>, %arg9: memref<2x4x8x32xf32, #tpu.memory_space<vmem>>, %arg10: memref<2x1x32xf32, #tpu.memory_space<vmem>>, %arg11: memref<2x1x32xf32, #tpu.memory_space<vmem>>, %arg12: memref<2x1x32xf32, #tpu.memory_space<vmem>>, %arg13: memref<2x32x64xf32, #tpu.memory_space<vmem>>, %arg14: memref<2x1x64xf32, #tpu.memory_space<vmem>>, %arg15: memref<2x64x32xf32, #tpu.memory_space<vmem>>, %arg16: memref<2x1x32xf32, #tpu.memory_space<vmem>>, %arg17: memref<2x1x32xf32, #tpu.memory_space<vmem>>, %arg18: memref<2x1x32xf32, #tpu.memory_space<vmem>>, %arg19: memref<32x128xf32, #tpu.memory_space<vmem>>, %arg20: memref<1x128xf32, #tpu.memory_space<vmem>>, %arg21: memref<2x128xf32, #tpu.memory_space<vmem>>) attributes {dimension_semantics = [], scalar_prefetch = 0 : i64, scratch_operands = 0 : i64, tpu.core_type = #tpu.core_type<tc>} {
    %c0 = arith.constant 0 : index
    %c0_0 = arith.constant 0 : index
    %0 = vector.load %arg0[%c0, %c0_0] : memref<16x1xi32, #tpu.memory_space<vmem>>, vector<16x1xi32>
    %1 = tpu.iota {dimensions = array<i32: 1>} : vector<16x128xi32>
    %2 = vector.broadcast %0 : vector<16x1xi32> to vector<16x128xi32>
    %3 = arith.cmpi eq, %1, %2 : vector<16x128xi32>
    %4 = arith.extui %3 : vector<16x128xi1> to vector<16x128xi32>
    %5 = arith.sitofp %4 : vector<16x128xi32> to vector<16x128xf32>
    %c0_1 = arith.constant 0 : index
    %c0_2 = arith.constant 0 : index
    %6 = vector.load %arg2[%c0_1, %c0_2] : memref<128x32xf32, #tpu.memory_space<vmem>>, vector<128x32xf32>
    %cst = arith.constant dense<0.000000e+00> : vector<16x32xf32>
    %7 = tpu.matmul %5, %6, %cst {dimension_numbers = #tpu.dot_dimension_numbers<[1], [0], [0], [1], [0, 0, 1, 1], [], []>} : vector<16x128xf32>, vector<128x32xf32>, vector<16x32xf32> -> vector<16x32xf32>
    %c0_3 = arith.constant 0 : index
    %c0_4 = arith.constant 0 : index
    %8 = vector.load %arg1[%c0_3, %c0_4] : memref<16x32xf32, #tpu.memory_space<vmem>>, vector<16x32xf32>
    %9 = arith.addf %7, %8 : vector<16x32xf32>
    %cst_5 = arith.constant 0.000000e+00 : f32
    %10 = vector.broadcast %cst_5 : f32 to vector<16x32xf32>
    %c0_6 = arith.constant 0 : index
    %c0_7 = arith.constant 0 : index
    %c0_8 = arith.constant 0 : index
    %c0_9 = arith.constant 0 : index
    %11 = vector.load %arg3[%c0_6, %c0_7, %c0_8, %c0_9] : memref<2x4x32x8xf32, #tpu.memory_space<vmem>>, vector<1x1x32x8xf32>
    %12 = vector.shape_cast %11 : vector<1x1x32x8xf32> to vector<32x8xf32>
    %cst_10 = arith.constant dense<0.000000e+00> : vector<16x8xf32>
    %13 = tpu.matmul %9, %12, %cst_10 {dimension_numbers = #tpu.dot_dimension_numbers<[1], [0], [0], [1], [0, 0, 1, 1], [], []>} : vector<16x32xf32>, vector<32x8xf32>, vector<16x8xf32> -> vector<16x8xf32>
    %c0_11 = arith.constant 0 : index
    %c0_12 = arith.constant 0 : index
    %c0_13 = arith.constant 0 : index
    %c0_14 = arith.constant 0 : index
    %14 = vector.load %arg4[%c0_11, %c0_12, %c0_13, %c0_14] : memref<2x4x1x8xf32, #tpu.memory_space<vmem>>, vector<1x1x1x8xf32>
    %15 = vector.shape_cast %14 : vector<1x1x1x8xf32> to vector<1x8xf32>
    %16 = vector.broadcast %15 : vector<1x8xf32> to vector<16x8xf32>
    %17 = arith.addf %13, %16 : vector<16x8xf32>
    %18 = vector.shape_cast %17 : vector<16x8xf32> to vector<2x8x8xf32>
    %c0_15 = arith.constant 0 : index
    %c0_16 = arith.constant 0 : index
    %c0_17 = arith.constant 0 : index
    %c0_18 = arith.constant 0 : index
    %19 = vector.load %arg5[%c0_15, %c0_16, %c0_17, %c0_18] : memref<2x4x32x8xf32, #tpu.memory_space<vmem>>, vector<1x1x32x8xf32>
    %20 = vector.shape_cast %19 : vector<1x1x32x8xf32> to vector<32x8xf32>
    %cst_19 = arith.constant dense<0.000000e+00> : vector<16x8xf32>
    %21 = tpu.matmul %9, %20, %cst_19 {dimension_numbers = #tpu.dot_dimension_numbers<[1], [0], [0], [1], [0, 0, 1, 1], [], []>} : vector<16x32xf32>, vector<32x8xf32>, vector<16x8xf32> -> vector<16x8xf32>
    %c0_20 = arith.constant 0 : index
    %c0_21 = arith.constant 0 : index
    %c0_22 = arith.constant 0 : index
    %c0_23 = arith.constant 0 : index
    %22 = vector.load %arg6[%c0_20, %c0_21, %c0_22, %c0_23] : memref<2x4x1x8xf32, #tpu.memory_space<vmem>>, vector<1x1x1x8xf32>
    %23 = vector.shape_cast %22 : vector<1x1x1x8xf32> to vector<1x8xf32>
    %24 = vector.broadcast %23 : vector<1x8xf32> to vector<16x8xf32>
    %25 = arith.addf %21, %24 : vector<16x8xf32>
    %26 = vector.shape_cast %25 : vector<16x8xf32> to vector<2x8x8xf32>
    %c0_24 = arith.constant 0 : index
    %c0_25 = arith.constant 0 : index
    %c0_26 = arith.constant 0 : index
    %c0_27 = arith.constant 0 : index
    %27 = vector.load %arg7[%c0_24, %c0_25, %c0_26, %c0_27] : memref<2x4x32x8xf32, #tpu.memory_space<vmem>>, vector<1x1x32x8xf32>
    %28 = vector.shape_cast %27 : vector<1x1x32x8xf32> to vector<32x8xf32>
    %cst_28 = arith.constant dense<0.000000e+00> : vector<16x8xf32>
    %29 = tpu.matmul %9, %28, %cst_28 {dimension_numbers = #tpu.dot_dimension_numbers<[1], [0], [0], [1], [0, 0, 1, 1], [], []>} : vector<16x32xf32>, vector<32x8xf32>, vector<16x8xf32> -> vector<16x8xf32>
    %c0_29 = arith.constant 0 : index
    %c0_30 = arith.constant 0 : index
    %c0_31 = arith.constant 0 : index
    %c0_32 = arith.constant 0 : index
    %30 = vector.load %arg8[%c0_29, %c0_30, %c0_31, %c0_32] : memref<2x4x1x8xf32, #tpu.memory_space<vmem>>, vector<1x1x1x8xf32>
    %31 = vector.shape_cast %30 : vector<1x1x1x8xf32> to vector<1x8xf32>
    %32 = vector.broadcast %31 : vector<1x8xf32> to vector<16x8xf32>
    %33 = arith.addf %29, %32 : vector<16x8xf32>
    %34 = vector.shape_cast %33 : vector<16x8xf32> to vector<2x8x8xf32>
    "tpu.trace_start"() <{level = 10 : i32, message = "bqd,bkd->bqk"}> : () -> ()
    %cst_33 = arith.constant dense<0.000000e+00> : vector<2x8x8xf32>
    %35 = tpu.matmul %18, %26, %cst_33 {dimension_numbers = #tpu.dot_dimension_numbers<[2], [2], [1], [1], [0, 0, 0, 1, 1, 1], [0], [0]>} : vector<2x8x8xf32>, vector<2x8x8xf32>, vector<2x8x8xf32> -> vector<2x8x8xf32>
    "tpu.trace_stop"() : () -> ()
    %cst_34 = arith.constant dense<0xFF800000> : vector<2x8xf32>
    %36 = vector.multi_reduction <maximumf>, %35, %cst_34 [2] : vector<2x8x8xf32> to vector<2x8xf32>
    %37 = vector.shape_cast %36 : vector<2x8xf32> to vector<2x8x1xf32>
    %38 = vector.broadcast %37 : vector<2x8x1xf32> to vector<2x8x8xf32>
    %39 = arith.subf %35, %38 : vector<2x8x8xf32>
    %40 = math.exp %39 : vector<2x8x8xf32>
    %cst_35 = arith.constant dense<0.000000e+00> : vector<2x8xf32>
    %41 = vector.multi_reduction <add>, %40, %cst_35 [2] : vector<2x8x8xf32> to vector<2x8xf32>
    %42 = vector.shape_cast %41 : vector<2x8xf32> to vector<2x8x1xf32>
    %43 = vector.broadcast %42 : vector<2x8x1xf32> to vector<2x8x8xf32>
    %44 = arith.divf %40, %43 : vector<2x8x8xf32>
    "tpu.trace_start"() <{level = 10 : i32, message = "bqk,bkd->bqd"}> : () -> ()
    %cst_36 = arith.constant dense<0.000000e+00> : vector<2x8x8xf32>
    %45 = tpu.matmul %44, %34, %cst_36 {dimension_numbers = #tpu.dot_dimension_numbers<[2], [1], [1], [2], [0, 0, 0, 1, 1, 2], [0], [0]>} : vector<2x8x8xf32>, vector<2x8x8xf32>, vector<2x8x8xf32> -> vector<2x8x8xf32>
    "tpu.trace_stop"() : () -> ()
    %46 = vector.shape_cast %45 : vector<2x8x8xf32> to vector<16x8xf32>
    %c0_37 = arith.constant 0 : index
    %c0_38 = arith.constant 0 : index
    %c0_39 = arith.constant 0 : index
    %c0_40 = arith.constant 0 : index
    %47 = vector.load %arg9[%c0_37, %c0_38, %c0_39, %c0_40] : memref<2x4x8x32xf32, #tpu.memory_space<vmem>>, vector<1x1x8x32xf32>
    %48 = vector.shape_cast %47 : vector<1x1x8x32xf32> to vector<8x32xf32>
    %cst_41 = arith.constant dense<0.000000e+00> : vector<16x32xf32>
    %49 = tpu.matmul %46, %48, %cst_41 {dimension_numbers = #tpu.dot_dimension_numbers<[1], [0], [0], [1], [0, 0, 1, 1], [], []>} : vector<16x8xf32>, vector<8x32xf32>, vector<16x32xf32> -> vector<16x32xf32>
    %50 = arith.addf %10, %49 : vector<16x32xf32>
    %c0_42 = arith.constant 0 : index
    %c1 = arith.constant 1 : index
    %c0_43 = arith.constant 0 : index
    %c0_44 = arith.constant 0 : index
    %51 = vector.load %arg3[%c0_42, %c1, %c0_43, %c0_44] : memref<2x4x32x8xf32, #tpu.memory_space<vmem>>, vector<1x1x32x8xf32>
    %52 = vector.shape_cast %51 : vector<1x1x32x8xf32> to vector<32x8xf32>
    %cst_45 = arith.constant dense<0.000000e+00> : vector<16x8xf32>
    %53 = tpu.matmul %9, %52, %cst_45 {dimension_numbers = #tpu.dot_dimension_numbers<[1], [0], [0], [1], [0, 0, 1, 1], [], []>} : vector<16x32xf32>, vector<32x8xf32>, vector<16x8xf32> -> vector<16x8xf32>
    %c0_46 = arith.constant 0 : index
    %c1_47 = arith.constant 1 : index
    %c0_48 = arith.constant 0 : index
    %c0_49 = arith.constant 0 : index
    %54 = vector.load %arg4[%c0_46, %c1_47, %c0_48, %c0_49] : memref<2x4x1x8xf32, #tpu.memory_space<vmem>>, vector<1x1x1x8xf32>
    %55 = vector.shape_cast %54 : vector<1x1x1x8xf32> to vector<1x8xf32>
    %56 = vector.broadcast %55 : vector<1x8xf32> to vector<16x8xf32>
    %57 = arith.addf %53, %56 : vector<16x8xf32>
    %58 = vector.shape_cast %57 : vector<16x8xf32> to vector<2x8x8xf32>
    %c0_50 = arith.constant 0 : index
    %c1_51 = arith.constant 1 : index
    %c0_52 = arith.constant 0 : index
    %c0_53 = arith.constant 0 : index
    %59 = vector.load %arg5[%c0_50, %c1_51, %c0_52, %c0_53] : memref<2x4x32x8xf32, #tpu.memory_space<vmem>>, vector<1x1x32x8xf32>
    %60 = vector.shape_cast %59 : vector<1x1x32x8xf32> to vector<32x8xf32>
    %cst_54 = arith.constant dense<0.000000e+00> : vector<16x8xf32>
    %61 = tpu.matmul %9, %60, %cst_54 {dimension_numbers = #tpu.dot_dimension_numbers<[1], [0], [0], [1], [0, 0, 1, 1], [], []>} : vector<16x32xf32>, vector<32x8xf32>, vector<16x8xf32> -> vector<16x8xf32>
    %c0_55 = arith.constant 0 : index
    %c1_56 = arith.constant 1 : index
    %c0_57 = arith.constant 0 : index
    %c0_58 = arith.constant 0 : index
    %62 = vector.load %arg6[%c0_55, %c1_56, %c0_57, %c0_58] : memref<2x4x1x8xf32, #tpu.memory_space<vmem>>, vector<1x1x1x8xf32>
    %63 = vector.shape_cast %62 : vector<1x1x1x8xf32> to vector<1x8xf32>
    %64 = vector.broadcast %63 : vector<1x8xf32> to vector<16x8xf32>
    %65 = arith.addf %61, %64 : vector<16x8xf32>
    %66 = vector.shape_cast %65 : vector<16x8xf32> to vector<2x8x8xf32>
    %c0_59 = arith.constant 0 : index
    %c1_60 = arith.constant 1 : index
    %c0_61 = arith.constant 0 : index
    %c0_62 = arith.constant 0 : index
    %67 = vector.load %arg7[%c0_59, %c1_60, %c0_61, %c0_62] : memref<2x4x32x8xf32, #tpu.memory_space<vmem>>, vector<1x1x32x8xf32>
    %68 = vector.shape_cast %67 : vector<1x1x32x8xf32> to vector<32x8xf32>
    %cst_63 = arith.constant dense<0.000000e+00> : vector<16x8xf32>
    %69 = tpu.matmul %9, %68, %cst_63 {dimension_numbers = #tpu.dot_dimension_numbers<[1], [0], [0], [1], [0, 0, 1, 1], [], []>} : vector<16x32xf32>, vector<32x8xf32>, vector<16x8xf32> -> vector<16x8xf32>
    %c0_64 = arith.constant 0 : index
    %c1_65 = arith.constant 1 : index
    %c0_66 = arith.constant 0 : index
    %c0_67 = arith.constant 0 : index
    %70 = vector.load %arg8[%c0_64, %c1_65, %c0_66, %c0_67] : memref<2x4x1x8xf32, #tpu.memory_space<vmem>>, vector<1x1x1x8xf32>
    %71 = vector.shape_cast %70 : vector<1x1x1x8xf32> to vector<1x8xf32>
    %72 = vector.broadcast %71 : vector<1x8xf32> to vector<16x8xf32>
    %73 = arith.addf %69, %72 : vector<16x8xf32>
    %74 = vector.shape_cast %73 : vector<16x8xf32> to vector<2x8x8xf32>
    "tpu.trace_start"() <{level = 10 : i32, message = "bqd,bkd->bqk"}> : () -> ()
    %cst_68 = arith.constant dense<0.000000e+00> : vector<2x8x8xf32>
    %75 = tpu.matmul %58, %66, %cst_68 {dimension_numbers = #tpu.dot_dimension_numbers<[2], [2], [1], [1], [0, 0, 0, 1, 1, 1], [0], [0]>} : vector<2x8x8xf32>, vector<2x8x8xf32>, vector<2x8x8xf32> -> vector<2x8x8xf32>
    "tpu.trace_stop"() : () -> ()
    %cst_69 = arith.constant dense<0xFF800000> : vector<2x8xf32>
    %76 = vector.multi_reduction <maximumf>, %75, %cst_69 [2] : vector<2x8x8xf32> to vector<2x8xf32>
    %77 = vector.shape_cast %76 : vector<2x8xf32> to vector<2x8x1xf32>
    %78 = vector.broadcast %77 : vector<2x8x1xf32> to vector<2x8x8xf32>
    %79 = arith.subf %75, %78 : vector<2x8x8xf32>
    %80 = math.exp %79 : vector<2x8x8xf32>
    %cst_70 = arith.constant dense<0.000000e+00> : vector<2x8xf32>
    %81 = vector.multi_reduction <add>, %80, %cst_70 [2] : vector<2x8x8xf32> to vector<2x8xf32>
    %82 = vector.shape_cast %81 : vector<2x8xf32> to vector<2x8x1xf32>
    %83 = vector.broadcast %82 : vector<2x8x1xf32> to vector<2x8x8xf32>
    %84 = arith.divf %80, %83 : vector<2x8x8xf32>
    "tpu.trace_start"() <{level = 10 : i32, message = "bqk,bkd->bqd"}> : () -> ()
    %cst_71 = arith.constant dense<0.000000e+00> : vector<2x8x8xf32>
    %85 = tpu.matmul %84, %74, %cst_71 {dimension_numbers = #tpu.dot_dimension_numbers<[2], [1], [1], [2], [0, 0, 0, 1, 1, 2], [0], [0]>} : vector<2x8x8xf32>, vector<2x8x8xf32>, vector<2x8x8xf32> -> vector<2x8x8xf32>
    "tpu.trace_stop"() : () -> ()
    %86 = vector.shape_cast %85 : vector<2x8x8xf32> to vector<16x8xf32>
    %c0_72 = arith.constant 0 : index
    %c1_73 = arith.constant 1 : index
    %c0_74 = arith.constant 0 : index
    %c0_75 = arith.constant 0 : index
    %87 = vector.load %arg9[%c0_72, %c1_73, %c0_74, %c0_75] : memref<2x4x8x32xf32, #tpu.memory_space<vmem>>, vector<1x1x8x32xf32>
    %88 = vector.shape_cast %87 : vector<1x1x8x32xf32> to vector<8x32xf32>
    %cst_76 = arith.constant dense<0.000000e+00> : vector<16x32xf32>
    %89 = tpu.matmul %86, %88, %cst_76 {dimension_numbers = #tpu.dot_dimension_numbers<[1], [0], [0], [1], [0, 0, 1, 1], [], []>} : vector<16x8xf32>, vector<8x32xf32>, vector<16x32xf32> -> vector<16x32xf32>
    %90 = arith.addf %50, %89 : vector<16x32xf32>
    %c0_77 = arith.constant 0 : index
    %c2 = arith.constant 2 : index
    %c0_78 = arith.constant 0 : index
    %c0_79 = arith.constant 0 : index
    %91 = vector.load %arg3[%c0_77, %c2, %c0_78, %c0_79] : memref<2x4x32x8xf32, #tpu.memory_space<vmem>>, vector<1x1x32x8xf32>
    %92 = vector.shape_cast %91 : vector<1x1x32x8xf32> to vector<32x8xf32>
    %cst_80 = arith.constant dense<0.000000e+00> : vector<16x8xf32>
    %93 = tpu.matmul %9, %92, %cst_80 {dimension_numbers = #tpu.dot_dimension_numbers<[1], [0], [0], [1], [0, 0, 1, 1], [], []>} : vector<16x32xf32>, vector<32x8xf32>, vector<16x8xf32> -> vector<16x8xf32>
    %c0_81 = arith.constant 0 : index
    %c2_82 = arith.constant 2 : index
    %c0_83 = arith.constant 0 : index
    %c0_84 = arith.constant 0 : index
    %94 = vector.load %arg4[%c0_81, %c2_82, %c0_83, %c0_84] : memref<2x4x1x8xf32, #tpu.memory_space<vmem>>, vector<1x1x1x8xf32>
    %95 = vector.shape_cast %94 : vector<1x1x1x8xf32> to vector<1x8xf32>
    %96 = vector.broadcast %95 : vector<1x8xf32> to vector<16x8xf32>
    %97 = arith.addf %93, %96 : vector<16x8xf32>
    %98 = vector.shape_cast %97 : vector<16x8xf32> to vector<2x8x8xf32>
    %c0_85 = arith.constant 0 : index
    %c2_86 = arith.constant 2 : index
    %c0_87 = arith.constant 0 : index
    %c0_88 = arith.constant 0 : index
    %99 = vector.load %arg5[%c0_85, %c2_86, %c0_87, %c0_88] : memref<2x4x32x8xf32, #tpu.memory_space<vmem>>, vector<1x1x32x8xf32>
    %100 = vector.shape_cast %99 : vector<1x1x32x8xf32> to vector<32x8xf32>
    %cst_89 = arith.constant dense<0.000000e+00> : vector<16x8xf32>
    %101 = tpu.matmul %9, %100, %cst_89 {dimension_numbers = #tpu.dot_dimension_numbers<[1], [0], [0], [1], [0, 0, 1, 1], [], []>} : vector<16x32xf32>, vector<32x8xf32>, vector<16x8xf32> -> vector<16x8xf32>
    %c0_90 = arith.constant 0 : index
    %c2_91 = arith.constant 2 : index
    %c0_92 = arith.constant 0 : index
    %c0_93 = arith.constant 0 : index
    %102 = vector.load %arg6[%c0_90, %c2_91, %c0_92, %c0_93] : memref<2x4x1x8xf32, #tpu.memory_space<vmem>>, vector<1x1x1x8xf32>
    %103 = vector.shape_cast %102 : vector<1x1x1x8xf32> to vector<1x8xf32>
    %104 = vector.broadcast %103 : vector<1x8xf32> to vector<16x8xf32>
    %105 = arith.addf %101, %104 : vector<16x8xf32>
    %106 = vector.shape_cast %105 : vector<16x8xf32> to vector<2x8x8xf32>
    %c0_94 = arith.constant 0 : index
    %c2_95 = arith.constant 2 : index
    %c0_96 = arith.constant 0 : index
    %c0_97 = arith.constant 0 : index
    %107 = vector.load %arg7[%c0_94, %c2_95, %c0_96, %c0_97] : memref<2x4x32x8xf32, #tpu.memory_space<vmem>>, vector<1x1x32x8xf32>
    %108 = vector.shape_cast %107 : vector<1x1x32x8xf32> to vector<32x8xf32>
    %cst_98 = arith.constant dense<0.000000e+00> : vector<16x8xf32>
    %109 = tpu.matmul %9, %108, %cst_98 {dimension_numbers = #tpu.dot_dimension_numbers<[1], [0], [0], [1], [0, 0, 1, 1], [], []>} : vector<16x32xf32>, vector<32x8xf32>, vector<16x8xf32> -> vector<16x8xf32>
    %c0_99 = arith.constant 0 : index
    %c2_100 = arith.constant 2 : index
    %c0_101 = arith.constant 0 : index
    %c0_102 = arith.constant 0 : index
    %110 = vector.load %arg8[%c0_99, %c2_100, %c0_101, %c0_102] : memref<2x4x1x8xf32, #tpu.memory_space<vmem>>, vector<1x1x1x8xf32>
    %111 = vector.shape_cast %110 : vector<1x1x1x8xf32> to vector<1x8xf32>
    %112 = vector.broadcast %111 : vector<1x8xf32> to vector<16x8xf32>
    %113 = arith.addf %109, %112 : vector<16x8xf32>
    %114 = vector.shape_cast %113 : vector<16x8xf32> to vector<2x8x8xf32>
    "tpu.trace_start"() <{level = 10 : i32, message = "bqd,bkd->bqk"}> : () -> ()
    %cst_103 = arith.constant dense<0.000000e+00> : vector<2x8x8xf32>
    %115 = tpu.matmul %98, %106, %cst_103 {dimension_numbers = #tpu.dot_dimension_numbers<[2], [2], [1], [1], [0, 0, 0, 1, 1, 1], [0], [0]>} : vector<2x8x8xf32>, vector<2x8x8xf32>, vector<2x8x8xf32> -> vector<2x8x8xf32>
    "tpu.trace_stop"() : () -> ()
    %cst_104 = arith.constant dense<0xFF800000> : vector<2x8xf32>
    %116 = vector.multi_reduction <maximumf>, %115, %cst_104 [2] : vector<2x8x8xf32> to vector<2x8xf32>
    %117 = vector.shape_cast %116 : vector<2x8xf32> to vector<2x8x1xf32>
    %118 = vector.broadcast %117 : vector<2x8x1xf32> to vector<2x8x8xf32>
    %119 = arith.subf %115, %118 : vector<2x8x8xf32>
    %120 = math.exp %119 : vector<2x8x8xf32>
    %cst_105 = arith.constant dense<0.000000e+00> : vector<2x8xf32>
    %121 = vector.multi_reduction <add>, %120, %cst_105 [2] : vector<2x8x8xf32> to vector<2x8xf32>
    %122 = vector.shape_cast %121 : vector<2x8xf32> to vector<2x8x1xf32>
    %123 = vector.broadcast %122 : vector<2x8x1xf32> to vector<2x8x8xf32>
    %124 = arith.divf %120, %123 : vector<2x8x8xf32>
    "tpu.trace_start"() <{level = 10 : i32, message = "bqk,bkd->bqd"}> : () -> ()
    %cst_106 = arith.constant dense<0.000000e+00> : vector<2x8x8xf32>
    %125 = tpu.matmul %124, %114, %cst_106 {dimension_numbers = #tpu.dot_dimension_numbers<[2], [1], [1], [2], [0, 0, 0, 1, 1, 2], [0], [0]>} : vector<2x8x8xf32>, vector<2x8x8xf32>, vector<2x8x8xf32> -> vector<2x8x8xf32>
    "tpu.trace_stop"() : () -> ()
    %126 = vector.shape_cast %125 : vector<2x8x8xf32> to vector<16x8xf32>
    %c0_107 = arith.constant 0 : index
    %c2_108 = arith.constant 2 : index
    %c0_109 = arith.constant 0 : index
    %c0_110 = arith.constant 0 : index
    %127 = vector.load %arg9[%c0_107, %c2_108, %c0_109, %c0_110] : memref<2x4x8x32xf32, #tpu.memory_space<vmem>>, vector<1x1x8x32xf32>
    %128 = vector.shape_cast %127 : vector<1x1x8x32xf32> to vector<8x32xf32>
    %cst_111 = arith.constant dense<0.000000e+00> : vector<16x32xf32>
    %129 = tpu.matmul %126, %128, %cst_111 {dimension_numbers = #tpu.dot_dimension_numbers<[1], [0], [0], [1], [0, 0, 1, 1], [], []>} : vector<16x8xf32>, vector<8x32xf32>, vector<16x32xf32> -> vector<16x32xf32>
    %130 = arith.addf %90, %129 : vector<16x32xf32>
    %c0_112 = arith.constant 0 : index
    %c3 = arith.constant 3 : index
    %c0_113 = arith.constant 0 : index
    %c0_114 = arith.constant 0 : index
    %131 = vector.load %arg3[%c0_112, %c3, %c0_113, %c0_114] : memref<2x4x32x8xf32, #tpu.memory_space<vmem>>, vector<1x1x32x8xf32>
    %132 = vector.shape_cast %131 : vector<1x1x32x8xf32> to vector<32x8xf32>
    %cst_115 = arith.constant dense<0.000000e+00> : vector<16x8xf32>
    %133 = tpu.matmul %9, %132, %cst_115 {dimension_numbers = #tpu.dot_dimension_numbers<[1], [0], [0], [1], [0, 0, 1, 1], [], []>} : vector<16x32xf32>, vector<32x8xf32>, vector<16x8xf32> -> vector<16x8xf32>
    %c0_116 = arith.constant 0 : index
    %c3_117 = arith.constant 3 : index
    %c0_118 = arith.constant 0 : index
    %c0_119 = arith.constant 0 : index
    %134 = vector.load %arg4[%c0_116, %c3_117, %c0_118, %c0_119] : memref<2x4x1x8xf32, #tpu.memory_space<vmem>>, vector<1x1x1x8xf32>
    %135 = vector.shape_cast %134 : vector<1x1x1x8xf32> to vector<1x8xf32>
    %136 = vector.broadcast %135 : vector<1x8xf32> to vector<16x8xf32>
    %137 = arith.addf %133, %136 : vector<16x8xf32>
    %138 = vector.shape_cast %137 : vector<16x8xf32> to vector<2x8x8xf32>
    %c0_120 = arith.constant 0 : index
    %c3_121 = arith.constant 3 : index
    %c0_122 = arith.constant 0 : index
    %c0_123 = arith.constant 0 : index
    %139 = vector.load %arg5[%c0_120, %c3_121, %c0_122, %c0_123] : memref<2x4x32x8xf32, #tpu.memory_space<vmem>>, vector<1x1x32x8xf32>
    %140 = vector.shape_cast %139 : vector<1x1x32x8xf32> to vector<32x8xf32>
    %cst_124 = arith.constant dense<0.000000e+00> : vector<16x8xf32>
    %141 = tpu.matmul %9, %140, %cst_124 {dimension_numbers = #tpu.dot_dimension_numbers<[1], [0], [0], [1], [0, 0, 1, 1], [], []>} : vector<16x32xf32>, vector<32x8xf32>, vector<16x8xf32> -> vector<16x8xf32>
    %c0_125 = arith.constant 0 : index
    %c3_126 = arith.constant 3 : index
    %c0_127 = arith.constant 0 : index
    %c0_128 = arith.constant 0 : index
    %142 = vector.load %arg6[%c0_125, %c3_126, %c0_127, %c0_128] : memref<2x4x1x8xf32, #tpu.memory_space<vmem>>, vector<1x1x1x8xf32>
    %143 = vector.shape_cast %142 : vector<1x1x1x8xf32> to vector<1x8xf32>
    %144 = vector.broadcast %143 : vector<1x8xf32> to vector<16x8xf32>
    %145 = arith.addf %141, %144 : vector<16x8xf32>
    %146 = vector.shape_cast %145 : vector<16x8xf32> to vector<2x8x8xf32>
    %c0_129 = arith.constant 0 : index
    %c3_130 = arith.constant 3 : index
    %c0_131 = arith.constant 0 : index
    %c0_132 = arith.constant 0 : index
    %147 = vector.load %arg7[%c0_129, %c3_130, %c0_131, %c0_132] : memref<2x4x32x8xf32, #tpu.memory_space<vmem>>, vector<1x1x32x8xf32>
    %148 = vector.shape_cast %147 : vector<1x1x32x8xf32> to vector<32x8xf32>
    %cst_133 = arith.constant dense<0.000000e+00> : vector<16x8xf32>
    %149 = tpu.matmul %9, %148, %cst_133 {dimension_numbers = #tpu.dot_dimension_numbers<[1], [0], [0], [1], [0, 0, 1, 1], [], []>} : vector<16x32xf32>, vector<32x8xf32>, vector<16x8xf32> -> vector<16x8xf32>
    %c0_134 = arith.constant 0 : index
    %c3_135 = arith.constant 3 : index
    %c0_136 = arith.constant 0 : index
    %c0_137 = arith.constant 0 : index
    %150 = vector.load %arg8[%c0_134, %c3_135, %c0_136, %c0_137] : memref<2x4x1x8xf32, #tpu.memory_space<vmem>>, vector<1x1x1x8xf32>
    %151 = vector.shape_cast %150 : vector<1x1x1x8xf32> to vector<1x8xf32>
    %152 = vector.broadcast %151 : vector<1x8xf32> to vector<16x8xf32>
    %153 = arith.addf %149, %152 : vector<16x8xf32>
    %154 = vector.shape_cast %153 : vector<16x8xf32> to vector<2x8x8xf32>
    "tpu.trace_start"() <{level = 10 : i32, message = "bqd,bkd->bqk"}> : () -> ()
    %cst_138 = arith.constant dense<0.000000e+00> : vector<2x8x8xf32>
    %155 = tpu.matmul %138, %146, %cst_138 {dimension_numbers = #tpu.dot_dimension_numbers<[2], [2], [1], [1], [0, 0, 0, 1, 1, 1], [0], [0]>} : vector<2x8x8xf32>, vector<2x8x8xf32>, vector<2x8x8xf32> -> vector<2x8x8xf32>
    "tpu.trace_stop"() : () -> ()
    %cst_139 = arith.constant dense<0xFF800000> : vector<2x8xf32>
    %156 = vector.multi_reduction <maximumf>, %155, %cst_139 [2] : vector<2x8x8xf32> to vector<2x8xf32>
    %157 = vector.shape_cast %156 : vector<2x8xf32> to vector<2x8x1xf32>
    %158 = vector.broadcast %157 : vector<2x8x1xf32> to vector<2x8x8xf32>
    %159 = arith.subf %155, %158 : vector<2x8x8xf32>
    %160 = math.exp %159 : vector<2x8x8xf32>
    %cst_140 = arith.constant dense<0.000000e+00> : vector<2x8xf32>
    %161 = vector.multi_reduction <add>, %160, %cst_140 [2] : vector<2x8x8xf32> to vector<2x8xf32>
    %162 = vector.shape_cast %161 : vector<2x8xf32> to vector<2x8x1xf32>
    %163 = vector.broadcast %162 : vector<2x8x1xf32> to vector<2x8x8xf32>
    %164 = arith.divf %160, %163 : vector<2x8x8xf32>
    "tpu.trace_start"() <{level = 10 : i32, message = "bqk,bkd->bqd"}> : () -> ()
    %cst_141 = arith.constant dense<0.000000e+00> : vector<2x8x8xf32>
    %165 = tpu.matmul %164, %154, %cst_141 {dimension_numbers = #tpu.dot_dimension_numbers<[2], [1], [1], [2], [0, 0, 0, 1, 1, 2], [0], [0]>} : vector<2x8x8xf32>, vector<2x8x8xf32>, vector<2x8x8xf32> -> vector<2x8x8xf32>
    "tpu.trace_stop"() : () -> ()
    %166 = vector.shape_cast %165 : vector<2x8x8xf32> to vector<16x8xf32>
    %c0_142 = arith.constant 0 : index
    %c3_143 = arith.constant 3 : index
    %c0_144 = arith.constant 0 : index
    %c0_145 = arith.constant 0 : index
    %167 = vector.load %arg9[%c0_142, %c3_143, %c0_144, %c0_145] : memref<2x4x8x32xf32, #tpu.memory_space<vmem>>, vector<1x1x8x32xf32>
    %168 = vector.shape_cast %167 : vector<1x1x8x32xf32> to vector<8x32xf32>
    %cst_146 = arith.constant dense<0.000000e+00> : vector<16x32xf32>
    %169 = tpu.matmul %166, %168, %cst_146 {dimension_numbers = #tpu.dot_dimension_numbers<[1], [0], [0], [1], [0, 0, 1, 1], [], []>} : vector<16x8xf32>, vector<8x32xf32>, vector<16x32xf32> -> vector<16x32xf32>
    %170 = arith.addf %130, %169 : vector<16x32xf32>
    %c0_147 = arith.constant 0 : index
    %c0_148 = arith.constant 0 : index
    %c0_149 = arith.constant 0 : index
    %171 = vector.load %arg10[%c0_147, %c0_148, %c0_149] : memref<2x1x32xf32, #tpu.memory_space<vmem>>, vector<1x1x32xf32>
    %172 = vector.shape_cast %171 : vector<1x1x32xf32> to vector<1x32xf32>
    %173 = vector.broadcast %172 : vector<1x32xf32> to vector<16x32xf32>
    %174 = arith.addf %170, %173 : vector<16x32xf32>
    %175 = arith.addf %9, %174 : vector<16x32xf32>
    %c0_150 = arith.constant 0 : index
    %c0_151 = arith.constant 0 : index
    %c0_152 = arith.constant 0 : index
    %176 = vector.load %arg11[%c0_150, %c0_151, %c0_152] : memref<2x1x32xf32, #tpu.memory_space<vmem>>, vector<1x1x32xf32>
    %177 = vector.shape_cast %176 : vector<1x1x32xf32> to vector<1x32xf32>
    %c0_153 = arith.constant 0 : index
    %c0_154 = arith.constant 0 : index
    %c0_155 = arith.constant 0 : index
    %178 = vector.load %arg12[%c0_153, %c0_154, %c0_155] : memref<2x1x32xf32, #tpu.memory_space<vmem>>, vector<1x1x32xf32>
    %179 = vector.shape_cast %178 : vector<1x1x32xf32> to vector<1x32xf32>
    %cst_156 = arith.constant dense<0.000000e+00> : vector<16xf32>
    %180 = vector.multi_reduction <add>, %175, %cst_156 [1] : vector<16x32xf32> to vector<16xf32>
    %181 = vector.shape_cast %180 : vector<16xf32> to vector<16x1xf32>
    %cst_157 = arith.constant 3.200000e+01 : f32
    %182 = vector.broadcast %cst_157 : f32 to vector<16x1xf32>
    %183 = arith.divf %181, %182 : vector<16x1xf32>
    %184 = vector.broadcast %183 : vector<16x1xf32> to vector<16x32xf32>
    %185 = arith.subf %175, %184 : vector<16x32xf32>
    %186 = arith.mulf %185, %185 : vector<16x32xf32>
    %cst_158 = arith.constant dense<0.000000e+00> : vector<16xf32>
    %187 = vector.multi_reduction <add>, %186, %cst_158 [1] : vector<16x32xf32> to vector<16xf32>
    %188 = vector.shape_cast %187 : vector<16xf32> to vector<16x1xf32>
    %cst_159 = arith.constant 3.200000e+01 : f32
    %189 = vector.broadcast %cst_159 : f32 to vector<16x1xf32>
    %190 = arith.divf %188, %189 : vector<16x1xf32>
    %191 = vector.broadcast %183 : vector<16x1xf32> to vector<16x32xf32>
    %192 = arith.subf %175, %191 : vector<16x32xf32>
    %cst_160 = arith.constant 9.99999974E-6 : f32
    %193 = vector.broadcast %cst_160 : f32 to vector<16x1xf32>
    %194 = arith.addf %190, %193 : vector<16x1xf32>
    %195 = math.rsqrt %194 : vector<16x1xf32>
    %196 = vector.broadcast %195 : vector<16x1xf32> to vector<16x32xf32>
    %197 = arith.mulf %192, %196 : vector<16x32xf32>
    %198 = vector.broadcast %177 : vector<1x32xf32> to vector<16x32xf32>
    %199 = arith.mulf %197, %198 : vector<16x32xf32>
    %200 = vector.broadcast %179 : vector<1x32xf32> to vector<16x32xf32>
    %201 = arith.addf %199, %200 : vector<16x32xf32>
    %c0_161 = arith.constant 0 : index
    %c0_162 = arith.constant 0 : index
    %c0_163 = arith.constant 0 : index
    %202 = vector.load %arg13[%c0_161, %c0_162, %c0_163] : memref<2x32x64xf32, #tpu.memory_space<vmem>>, vector<1x32x64xf32>
    %203 = vector.shape_cast %202 : vector<1x32x64xf32> to vector<32x64xf32>
    %cst_164 = arith.constant dense<0.000000e+00> : vector<16x64xf32>
    %204 = tpu.matmul %201, %203, %cst_164 {dimension_numbers = #tpu.dot_dimension_numbers<[1], [0], [0], [1], [0, 0, 1, 1], [], []>} : vector<16x32xf32>, vector<32x64xf32>, vector<16x64xf32> -> vector<16x64xf32>
    %c0_165 = arith.constant 0 : index
    %c0_166 = arith.constant 0 : index
    %c0_167 = arith.constant 0 : index
    %205 = vector.load %arg14[%c0_165, %c0_166, %c0_167] : memref<2x1x64xf32, #tpu.memory_space<vmem>>, vector<1x1x64xf32>
    %206 = vector.shape_cast %205 : vector<1x1x64xf32> to vector<1x64xf32>
    %207 = vector.broadcast %206 : vector<1x64xf32> to vector<16x64xf32>
    %208 = arith.addf %204, %207 : vector<16x64xf32>
    %cst_168 = arith.constant 0.000000e+00 : f32
    %209 = vector.broadcast %cst_168 : f32 to vector<16x64xf32>
    %210 = arith.maximumf %208, %209 : vector<16x64xf32>
    %c0_169 = arith.constant 0 : index
    %c0_170 = arith.constant 0 : index
    %c0_171 = arith.constant 0 : index
    %211 = vector.load %arg15[%c0_169, %c0_170, %c0_171] : memref<2x64x32xf32, #tpu.memory_space<vmem>>, vector<1x64x32xf32>
    %212 = vector.shape_cast %211 : vector<1x64x32xf32> to vector<64x32xf32>
    %cst_172 = arith.constant dense<0.000000e+00> : vector<16x32xf32>
    %213 = tpu.matmul %210, %212, %cst_172 {dimension_numbers = #tpu.dot_dimension_numbers<[1], [0], [0], [1], [0, 0, 1, 1], [], []>} : vector<16x64xf32>, vector<64x32xf32>, vector<16x32xf32> -> vector<16x32xf32>
    %c0_173 = arith.constant 0 : index
    %c0_174 = arith.constant 0 : index
    %c0_175 = arith.constant 0 : index
    %214 = vector.load %arg16[%c0_173, %c0_174, %c0_175] : memref<2x1x32xf32, #tpu.memory_space<vmem>>, vector<1x1x32xf32>
    %215 = vector.shape_cast %214 : vector<1x1x32xf32> to vector<1x32xf32>
    %216 = vector.broadcast %215 : vector<1x32xf32> to vector<16x32xf32>
    %217 = arith.addf %213, %216 : vector<16x32xf32>
    %218 = arith.addf %201, %217 : vector<16x32xf32>
    %c0_176 = arith.constant 0 : index
    %c0_177 = arith.constant 0 : index
    %c0_178 = arith.constant 0 : index
    %219 = vector.load %arg17[%c0_176, %c0_177, %c0_178] : memref<2x1x32xf32, #tpu.memory_space<vmem>>, vector<1x1x32xf32>
    %220 = vector.shape_cast %219 : vector<1x1x32xf32> to vector<1x32xf32>
    %c0_179 = arith.constant 0 : index
    %c0_180 = arith.constant 0 : index
    %c0_181 = arith.constant 0 : index
    %221 = vector.load %arg18[%c0_179, %c0_180, %c0_181] : memref<2x1x32xf32, #tpu.memory_space<vmem>>, vector<1x1x32xf32>
    %222 = vector.shape_cast %221 : vector<1x1x32xf32> to vector<1x32xf32>
    %cst_182 = arith.constant dense<0.000000e+00> : vector<16xf32>
    %223 = vector.multi_reduction <add>, %218, %cst_182 [1] : vector<16x32xf32> to vector<16xf32>
    %224 = vector.shape_cast %223 : vector<16xf32> to vector<16x1xf32>
    %cst_183 = arith.constant 3.200000e+01 : f32
    %225 = vector.broadcast %cst_183 : f32 to vector<16x1xf32>
    %226 = arith.divf %224, %225 : vector<16x1xf32>
    %227 = vector.broadcast %226 : vector<16x1xf32> to vector<16x32xf32>
    %228 = arith.subf %218, %227 : vector<16x32xf32>
    %229 = arith.mulf %228, %228 : vector<16x32xf32>
    %cst_184 = arith.constant dense<0.000000e+00> : vector<16xf32>
    %230 = vector.multi_reduction <add>, %229, %cst_184 [1] : vector<16x32xf32> to vector<16xf32>
    %231 = vector.shape_cast %230 : vector<16xf32> to vector<16x1xf32>
    %cst_185 = arith.constant 3.200000e+01 : f32
    %232 = vector.broadcast %cst_185 : f32 to vector<16x1xf32>
    %233 = arith.divf %231, %232 : vector<16x1xf32>
    %234 = vector.broadcast %226 : vector<16x1xf32> to vector<16x32xf32>
    %235 = arith.subf %218, %234 : vector<16x32xf32>
    %cst_186 = arith.constant 9.99999974E-6 : f32
    %236 = vector.broadcast %cst_186 : f32 to vector<16x1xf32>
    %237 = arith.addf %233, %236 : vector<16x1xf32>
    %238 = math.rsqrt %237 : vector<16x1xf32>
    %239 = vector.broadcast %238 : vector<16x1xf32> to vector<16x32xf32>
    %240 = arith.mulf %235, %239 : vector<16x32xf32>
    %241 = vector.broadcast %220 : vector<1x32xf32> to vector<16x32xf32>
    %242 = arith.mulf %240, %241 : vector<16x32xf32>
    %243 = vector.broadcast %222 : vector<1x32xf32> to vector<16x32xf32>
    %244 = arith.addf %242, %243 : vector<16x32xf32>
    %cst_187 = arith.constant 0.000000e+00 : f32
    %245 = vector.broadcast %cst_187 : f32 to vector<16x32xf32>
    %c1_188 = arith.constant 1 : index
    %c0_189 = arith.constant 0 : index
    %c0_190 = arith.constant 0 : index
    %c0_191 = arith.constant 0 : index
    %246 = vector.load %arg3[%c1_188, %c0_189, %c0_190, %c0_191] : memref<2x4x32x8xf32, #tpu.memory_space<vmem>>, vector<1x1x32x8xf32>
    %247 = vector.shape_cast %246 : vector<1x1x32x8xf32> to vector<32x8xf32>
    %cst_192 = arith.constant dense<0.000000e+00> : vector<16x8xf32>
    %248 = tpu.matmul %244, %247, %cst_192 {dimension_numbers = #tpu.dot_dimension_numbers<[1], [0], [0], [1], [0, 0, 1, 1], [], []>} : vector<16x32xf32>, vector<32x8xf32>, vector<16x8xf32> -> vector<16x8xf32>
    %c1_193 = arith.constant 1 : index
    %c0_194 = arith.constant 0 : index
    %c0_195 = arith.constant 0 : index
    %c0_196 = arith.constant 0 : index
    %249 = vector.load %arg4[%c1_193, %c0_194, %c0_195, %c0_196] : memref<2x4x1x8xf32, #tpu.memory_space<vmem>>, vector<1x1x1x8xf32>
    %250 = vector.shape_cast %249 : vector<1x1x1x8xf32> to vector<1x8xf32>
    %251 = vector.broadcast %250 : vector<1x8xf32> to vector<16x8xf32>
    %252 = arith.addf %248, %251 : vector<16x8xf32>
    %253 = vector.shape_cast %252 : vector<16x8xf32> to vector<2x8x8xf32>
    %c1_197 = arith.constant 1 : index
    %c0_198 = arith.constant 0 : index
    %c0_199 = arith.constant 0 : index
    %c0_200 = arith.constant 0 : index
    %254 = vector.load %arg5[%c1_197, %c0_198, %c0_199, %c0_200] : memref<2x4x32x8xf32, #tpu.memory_space<vmem>>, vector<1x1x32x8xf32>
    %255 = vector.shape_cast %254 : vector<1x1x32x8xf32> to vector<32x8xf32>
    %cst_201 = arith.constant dense<0.000000e+00> : vector<16x8xf32>
    %256 = tpu.matmul %244, %255, %cst_201 {dimension_numbers = #tpu.dot_dimension_numbers<[1], [0], [0], [1], [0, 0, 1, 1], [], []>} : vector<16x32xf32>, vector<32x8xf32>, vector<16x8xf32> -> vector<16x8xf32>
    %c1_202 = arith.constant 1 : index
    %c0_203 = arith.constant 0 : index
    %c0_204 = arith.constant 0 : index
    %c0_205 = arith.constant 0 : index
    %257 = vector.load %arg6[%c1_202, %c0_203, %c0_204, %c0_205] : memref<2x4x1x8xf32, #tpu.memory_space<vmem>>, vector<1x1x1x8xf32>
    %258 = vector.shape_cast %257 : vector<1x1x1x8xf32> to vector<1x8xf32>
    %259 = vector.broadcast %258 : vector<1x8xf32> to vector<16x8xf32>
    %260 = arith.addf %256, %259 : vector<16x8xf32>
    %261 = vector.shape_cast %260 : vector<16x8xf32> to vector<2x8x8xf32>
    %c1_206 = arith.constant 1 : index
    %c0_207 = arith.constant 0 : index
    %c0_208 = arith.constant 0 : index
    %c0_209 = arith.constant 0 : index
    %262 = vector.load %arg7[%c1_206, %c0_207, %c0_208, %c0_209] : memref<2x4x32x8xf32, #tpu.memory_space<vmem>>, vector<1x1x32x8xf32>
    %263 = vector.shape_cast %262 : vector<1x1x32x8xf32> to vector<32x8xf32>
    %cst_210 = arith.constant dense<0.000000e+00> : vector<16x8xf32>
    %264 = tpu.matmul %244, %263, %cst_210 {dimension_numbers = #tpu.dot_dimension_numbers<[1], [0], [0], [1], [0, 0, 1, 1], [], []>} : vector<16x32xf32>, vector<32x8xf32>, vector<16x8xf32> -> vector<16x8xf32>
    %c1_211 = arith.constant 1 : index
    %c0_212 = arith.constant 0 : index
    %c0_213 = arith.constant 0 : index
    %c0_214 = arith.constant 0 : index
    %265 = vector.load %arg8[%c1_211, %c0_212, %c0_213, %c0_214] : memref<2x4x1x8xf32, #tpu.memory_space<vmem>>, vector<1x1x1x8xf32>
    %266 = vector.shape_cast %265 : vector<1x1x1x8xf32> to vector<1x8xf32>
    %267 = vector.broadcast %266 : vector<1x8xf32> to vector<16x8xf32>
    %268 = arith.addf %264, %267 : vector<16x8xf32>
    %269 = vector.shape_cast %268 : vector<16x8xf32> to vector<2x8x8xf32>
    "tpu.trace_start"() <{level = 10 : i32, message = "bqd,bkd->bqk"}> : () -> ()
    %cst_215 = arith.constant dense<0.000000e+00> : vector<2x8x8xf32>
    %270 = tpu.matmul %253, %261, %cst_215 {dimension_numbers = #tpu.dot_dimension_numbers<[2], [2], [1], [1], [0, 0, 0, 1, 1, 1], [0], [0]>} : vector<2x8x8xf32>, vector<2x8x8xf32>, vector<2x8x8xf32> -> vector<2x8x8xf32>
    "tpu.trace_stop"() : () -> ()
    %cst_216 = arith.constant dense<0xFF800000> : vector<2x8xf32>
    %271 = vector.multi_reduction <maximumf>, %270, %cst_216 [2] : vector<2x8x8xf32> to vector<2x8xf32>
    %272 = vector.shape_cast %271 : vector<2x8xf32> to vector<2x8x1xf32>
    %273 = vector.broadcast %272 : vector<2x8x1xf32> to vector<2x8x8xf32>
    %274 = arith.subf %270, %273 : vector<2x8x8xf32>
    %275 = math.exp %274 : vector<2x8x8xf32>
    %cst_217 = arith.constant dense<0.000000e+00> : vector<2x8xf32>
    %276 = vector.multi_reduction <add>, %275, %cst_217 [2] : vector<2x8x8xf32> to vector<2x8xf32>
    %277 = vector.shape_cast %276 : vector<2x8xf32> to vector<2x8x1xf32>
    %278 = vector.broadcast %277 : vector<2x8x1xf32> to vector<2x8x8xf32>
    %279 = arith.divf %275, %278 : vector<2x8x8xf32>
    "tpu.trace_start"() <{level = 10 : i32, message = "bqk,bkd->bqd"}> : () -> ()
    %cst_218 = arith.constant dense<0.000000e+00> : vector<2x8x8xf32>
    %280 = tpu.matmul %279, %269, %cst_218 {dimension_numbers = #tpu.dot_dimension_numbers<[2], [1], [1], [2], [0, 0, 0, 1, 1, 2], [0], [0]>} : vector<2x8x8xf32>, vector<2x8x8xf32>, vector<2x8x8xf32> -> vector<2x8x8xf32>
    "tpu.trace_stop"() : () -> ()
    %281 = vector.shape_cast %280 : vector<2x8x8xf32> to vector<16x8xf32>
    %c1_219 = arith.constant 1 : index
    %c0_220 = arith.constant 0 : index
    %c0_221 = arith.constant 0 : index
    %c0_222 = arith.constant 0 : index
    %282 = vector.load %arg9[%c1_219, %c0_220, %c0_221, %c0_222] : memref<2x4x8x32xf32, #tpu.memory_space<vmem>>, vector<1x1x8x32xf32>
    %283 = vector.shape_cast %282 : vector<1x1x8x32xf32> to vector<8x32xf32>
    %cst_223 = arith.constant dense<0.000000e+00> : vector<16x32xf32>
    %284 = tpu.matmul %281, %283, %cst_223 {dimension_numbers = #tpu.dot_dimension_numbers<[1], [0], [0], [1], [0, 0, 1, 1], [], []>} : vector<16x8xf32>, vector<8x32xf32>, vector<16x32xf32> -> vector<16x32xf32>
    %285 = arith.addf %245, %284 : vector<16x32xf32>
    %c1_224 = arith.constant 1 : index
    %c1_225 = arith.constant 1 : index
    %c0_226 = arith.constant 0 : index
    %c0_227 = arith.constant 0 : index
    %286 = vector.load %arg3[%c1_224, %c1_225, %c0_226, %c0_227] : memref<2x4x32x8xf32, #tpu.memory_space<vmem>>, vector<1x1x32x8xf32>
    %287 = vector.shape_cast %286 : vector<1x1x32x8xf32> to vector<32x8xf32>
    %cst_228 = arith.constant dense<0.000000e+00> : vector<16x8xf32>
    %288 = tpu.matmul %244, %287, %cst_228 {dimension_numbers = #tpu.dot_dimension_numbers<[1], [0], [0], [1], [0, 0, 1, 1], [], []>} : vector<16x32xf32>, vector<32x8xf32>, vector<16x8xf32> -> vector<16x8xf32>
    %c1_229 = arith.constant 1 : index
    %c1_230 = arith.constant 1 : index
    %c0_231 = arith.constant 0 : index
    %c0_232 = arith.constant 0 : index
    %289 = vector.load %arg4[%c1_229, %c1_230, %c0_231, %c0_232] : memref<2x4x1x8xf32, #tpu.memory_space<vmem>>, vector<1x1x1x8xf32>
    %290 = vector.shape_cast %289 : vector<1x1x1x8xf32> to vector<1x8xf32>
    %291 = vector.broadcast %290 : vector<1x8xf32> to vector<16x8xf32>
    %292 = arith.addf %288, %291 : vector<16x8xf32>
    %293 = vector.shape_cast %292 : vector<16x8xf32> to vector<2x8x8xf32>
    %c1_233 = arith.constant 1 : index
    %c1_234 = arith.constant 1 : index
    %c0_235 = arith.constant 0 : index
    %c0_236 = arith.constant 0 : index
    %294 = vector.load %arg5[%c1_233, %c1_234, %c0_235, %c0_236] : memref<2x4x32x8xf32, #tpu.memory_space<vmem>>, vector<1x1x32x8xf32>
    %295 = vector.shape_cast %294 : vector<1x1x32x8xf32> to vector<32x8xf32>
    %cst_237 = arith.constant dense<0.000000e+00> : vector<16x8xf32>
    %296 = tpu.matmul %244, %295, %cst_237 {dimension_numbers = #tpu.dot_dimension_numbers<[1], [0], [0], [1], [0, 0, 1, 1], [], []>} : vector<16x32xf32>, vector<32x8xf32>, vector<16x8xf32> -> vector<16x8xf32>
    %c1_238 = arith.constant 1 : index
    %c1_239 = arith.constant 1 : index
    %c0_240 = arith.constant 0 : index
    %c0_241 = arith.constant 0 : index
    %297 = vector.load %arg6[%c1_238, %c1_239, %c0_240, %c0_241] : memref<2x4x1x8xf32, #tpu.memory_space<vmem>>, vector<1x1x1x8xf32>
    %298 = vector.shape_cast %297 : vector<1x1x1x8xf32> to vector<1x8xf32>
    %299 = vector.broadcast %298 : vector<1x8xf32> to vector<16x8xf32>
    %300 = arith.addf %296, %299 : vector<16x8xf32>
    %301 = vector.shape_cast %300 : vector<16x8xf32> to vector<2x8x8xf32>
    %c1_242 = arith.constant 1 : index
    %c1_243 = arith.constant 1 : index
    %c0_244 = arith.constant 0 : index
    %c0_245 = arith.constant 0 : index
    %302 = vector.load %arg7[%c1_242, %c1_243, %c0_244, %c0_245] : memref<2x4x32x8xf32, #tpu.memory_space<vmem>>, vector<1x1x32x8xf32>
    %303 = vector.shape_cast %302 : vector<1x1x32x8xf32> to vector<32x8xf32>
    %cst_246 = arith.constant dense<0.000000e+00> : vector<16x8xf32>
    %304 = tpu.matmul %244, %303, %cst_246 {dimension_numbers = #tpu.dot_dimension_numbers<[1], [0], [0], [1], [0, 0, 1, 1], [], []>} : vector<16x32xf32>, vector<32x8xf32>, vector<16x8xf32> -> vector<16x8xf32>
    %c1_247 = arith.constant 1 : index
    %c1_248 = arith.constant 1 : index
    %c0_249 = arith.constant 0 : index
    %c0_250 = arith.constant 0 : index
    %305 = vector.load %arg8[%c1_247, %c1_248, %c0_249, %c0_250] : memref<2x4x1x8xf32, #tpu.memory_space<vmem>>, vector<1x1x1x8xf32>
    %306 = vector.shape_cast %305 : vector<1x1x1x8xf32> to vector<1x8xf32>
    %307 = vector.broadcast %306 : vector<1x8xf32> to vector<16x8xf32>
    %308 = arith.addf %304, %307 : vector<16x8xf32>
    %309 = vector.shape_cast %308 : vector<16x8xf32> to vector<2x8x8xf32>
    "tpu.trace_start"() <{level = 10 : i32, message = "bqd,bkd->bqk"}> : () -> ()
    %cst_251 = arith.constant dense<0.000000e+00> : vector<2x8x8xf32>
    %310 = tpu.matmul %293, %301, %cst_251 {dimension_numbers = #tpu.dot_dimension_numbers<[2], [2], [1], [1], [0, 0, 0, 1, 1, 1], [0], [0]>} : vector<2x8x8xf32>, vector<2x8x8xf32>, vector<2x8x8xf32> -> vector<2x8x8xf32>
    "tpu.trace_stop"() : () -> ()
    %cst_252 = arith.constant dense<0xFF800000> : vector<2x8xf32>
    %311 = vector.multi_reduction <maximumf>, %310, %cst_252 [2] : vector<2x8x8xf32> to vector<2x8xf32>
    %312 = vector.shape_cast %311 : vector<2x8xf32> to vector<2x8x1xf32>
    %313 = vector.broadcast %312 : vector<2x8x1xf32> to vector<2x8x8xf32>
    %314 = arith.subf %310, %313 : vector<2x8x8xf32>
    %315 = math.exp %314 : vector<2x8x8xf32>
    %cst_253 = arith.constant dense<0.000000e+00> : vector<2x8xf32>
    %316 = vector.multi_reduction <add>, %315, %cst_253 [2] : vector<2x8x8xf32> to vector<2x8xf32>
    %317 = vector.shape_cast %316 : vector<2x8xf32> to vector<2x8x1xf32>
    %318 = vector.broadcast %317 : vector<2x8x1xf32> to vector<2x8x8xf32>
    %319 = arith.divf %315, %318 : vector<2x8x8xf32>
    "tpu.trace_start"() <{level = 10 : i32, message = "bqk,bkd->bqd"}> : () -> ()
    %cst_254 = arith.constant dense<0.000000e+00> : vector<2x8x8xf32>
    %320 = tpu.matmul %319, %309, %cst_254 {dimension_numbers = #tpu.dot_dimension_numbers<[2], [1], [1], [2], [0, 0, 0, 1, 1, 2], [0], [0]>} : vector<2x8x8xf32>, vector<2x8x8xf32>, vector<2x8x8xf32> -> vector<2x8x8xf32>
    "tpu.trace_stop"() : () -> ()
    %321 = vector.shape_cast %320 : vector<2x8x8xf32> to vector<16x8xf32>
    %c1_255 = arith.constant 1 : index
    %c1_256 = arith.constant 1 : index
    %c0_257 = arith.constant 0 : index
    %c0_258 = arith.constant 0 : index
    %322 = vector.load %arg9[%c1_255, %c1_256, %c0_257, %c0_258] : memref<2x4x8x32xf32, #tpu.memory_space<vmem>>, vector<1x1x8x32xf32>
    %323 = vector.shape_cast %322 : vector<1x1x8x32xf32> to vector<8x32xf32>
    %cst_259 = arith.constant dense<0.000000e+00> : vector<16x32xf32>
    %324 = tpu.matmul %321, %323, %cst_259 {dimension_numbers = #tpu.dot_dimension_numbers<[1], [0], [0], [1], [0, 0, 1, 1], [], []>} : vector<16x8xf32>, vector<8x32xf32>, vector<16x32xf32> -> vector<16x32xf32>
    %325 = arith.addf %285, %324 : vector<16x32xf32>
    %c1_260 = arith.constant 1 : index
    %c2_261 = arith.constant 2 : index
    %c0_262 = arith.constant 0 : index
    %c0_263 = arith.constant 0 : index
    %326 = vector.load %arg3[%c1_260, %c2_261, %c0_262, %c0_263] : memref<2x4x32x8xf32, #tpu.memory_space<vmem>>, vector<1x1x32x8xf32>
    %327 = vector.shape_cast %326 : vector<1x1x32x8xf32> to vector<32x8xf32>
    %cst_264 = arith.constant dense<0.000000e+00> : vector<16x8xf32>
    %328 = tpu.matmul %244, %327, %cst_264 {dimension_numbers = #tpu.dot_dimension_numbers<[1], [0], [0], [1], [0, 0, 1, 1], [], []>} : vector<16x32xf32>, vector<32x8xf32>, vector<16x8xf32> -> vector<16x8xf32>
    %c1_265 = arith.constant 1 : index
    %c2_266 = arith.constant 2 : index
    %c0_267 = arith.constant 0 : index
    %c0_268 = arith.constant 0 : index
    %329 = vector.load %arg4[%c1_265, %c2_266, %c0_267, %c0_268] : memref<2x4x1x8xf32, #tpu.memory_space<vmem>>, vector<1x1x1x8xf32>
    %330 = vector.shape_cast %329 : vector<1x1x1x8xf32> to vector<1x8xf32>
    %331 = vector.broadcast %330 : vector<1x8xf32> to vector<16x8xf32>
    %332 = arith.addf %328, %331 : vector<16x8xf32>
    %333 = vector.shape_cast %332 : vector<16x8xf32> to vector<2x8x8xf32>
    %c1_269 = arith.constant 1 : index
    %c2_270 = arith.constant 2 : index
    %c0_271 = arith.constant 0 : index
    %c0_272 = arith.constant 0 : index
    %334 = vector.load %arg5[%c1_269, %c2_270, %c0_271, %c0_272] : memref<2x4x32x8xf32, #tpu.memory_space<vmem>>, vector<1x1x32x8xf32>
    %335 = vector.shape_cast %334 : vector<1x1x32x8xf32> to vector<32x8xf32>
    %cst_273 = arith.constant dense<0.000000e+00> : vector<16x8xf32>
    %336 = tpu.matmul %244, %335, %cst_273 {dimension_numbers = #tpu.dot_dimension_numbers<[1], [0], [0], [1], [0, 0, 1, 1], [], []>} : vector<16x32xf32>, vector<32x8xf32>, vector<16x8xf32> -> vector<16x8xf32>
    %c1_274 = arith.constant 1 : index
    %c2_275 = arith.constant 2 : index
    %c0_276 = arith.constant 0 : index
    %c0_277 = arith.constant 0 : index
    %337 = vector.load %arg6[%c1_274, %c2_275, %c0_276, %c0_277] : memref<2x4x1x8xf32, #tpu.memory_space<vmem>>, vector<1x1x1x8xf32>
    %338 = vector.shape_cast %337 : vector<1x1x1x8xf32> to vector<1x8xf32>
    %339 = vector.broadcast %338 : vector<1x8xf32> to vector<16x8xf32>
    %340 = arith.addf %336, %339 : vector<16x8xf32>
    %341 = vector.shape_cast %340 : vector<16x8xf32> to vector<2x8x8xf32>
    %c1_278 = arith.constant 1 : index
    %c2_279 = arith.constant 2 : index
    %c0_280 = arith.constant 0 : index
    %c0_281 = arith.constant 0 : index
    %342 = vector.load %arg7[%c1_278, %c2_279, %c0_280, %c0_281] : memref<2x4x32x8xf32, #tpu.memory_space<vmem>>, vector<1x1x32x8xf32>
    %343 = vector.shape_cast %342 : vector<1x1x32x8xf32> to vector<32x8xf32>
    %cst_282 = arith.constant dense<0.000000e+00> : vector<16x8xf32>
    %344 = tpu.matmul %244, %343, %cst_282 {dimension_numbers = #tpu.dot_dimension_numbers<[1], [0], [0], [1], [0, 0, 1, 1], [], []>} : vector<16x32xf32>, vector<32x8xf32>, vector<16x8xf32> -> vector<16x8xf32>
    %c1_283 = arith.constant 1 : index
    %c2_284 = arith.constant 2 : index
    %c0_285 = arith.constant 0 : index
    %c0_286 = arith.constant 0 : index
    %345 = vector.load %arg8[%c1_283, %c2_284, %c0_285, %c0_286] : memref<2x4x1x8xf32, #tpu.memory_space<vmem>>, vector<1x1x1x8xf32>
    %346 = vector.shape_cast %345 : vector<1x1x1x8xf32> to vector<1x8xf32>
    %347 = vector.broadcast %346 : vector<1x8xf32> to vector<16x8xf32>
    %348 = arith.addf %344, %347 : vector<16x8xf32>
    %349 = vector.shape_cast %348 : vector<16x8xf32> to vector<2x8x8xf32>
    "tpu.trace_start"() <{level = 10 : i32, message = "bqd,bkd->bqk"}> : () -> ()
    %cst_287 = arith.constant dense<0.000000e+00> : vector<2x8x8xf32>
    %350 = tpu.matmul %333, %341, %cst_287 {dimension_numbers = #tpu.dot_dimension_numbers<[2], [2], [1], [1], [0, 0, 0, 1, 1, 1], [0], [0]>} : vector<2x8x8xf32>, vector<2x8x8xf32>, vector<2x8x8xf32> -> vector<2x8x8xf32>
    "tpu.trace_stop"() : () -> ()
    %cst_288 = arith.constant dense<0xFF800000> : vector<2x8xf32>
    %351 = vector.multi_reduction <maximumf>, %350, %cst_288 [2] : vector<2x8x8xf32> to vector<2x8xf32>
    %352 = vector.shape_cast %351 : vector<2x8xf32> to vector<2x8x1xf32>
    %353 = vector.broadcast %352 : vector<2x8x1xf32> to vector<2x8x8xf32>
    %354 = arith.subf %350, %353 : vector<2x8x8xf32>
    %355 = math.exp %354 : vector<2x8x8xf32>
    %cst_289 = arith.constant dense<0.000000e+00> : vector<2x8xf32>
    %356 = vector.multi_reduction <add>, %355, %cst_289 [2] : vector<2x8x8xf32> to vector<2x8xf32>
    %357 = vector.shape_cast %356 : vector<2x8xf32> to vector<2x8x1xf32>
    %358 = vector.broadcast %357 : vector<2x8x1xf32> to vector<2x8x8xf32>
    %359 = arith.divf %355, %358 : vector<2x8x8xf32>
    "tpu.trace_start"() <{level = 10 : i32, message = "bqk,bkd->bqd"}> : () -> ()
    %cst_290 = arith.constant dense<0.000000e+00> : vector<2x8x8xf32>
    %360 = tpu.matmul %359, %349, %cst_290 {dimension_numbers = #tpu.dot_dimension_numbers<[2], [1], [1], [2], [0, 0, 0, 1, 1, 2], [0], [0]>} : vector<2x8x8xf32>, vector<2x8x8xf32>, vector<2x8x8xf32> -> vector<2x8x8xf32>
    "tpu.trace_stop"() : () -> ()
    %361 = vector.shape_cast %360 : vector<2x8x8xf32> to vector<16x8xf32>
    %c1_291 = arith.constant 1 : index
    %c2_292 = arith.constant 2 : index
    %c0_293 = arith.constant 0 : index
    %c0_294 = arith.constant 0 : index
    %362 = vector.load %arg9[%c1_291, %c2_292, %c0_293, %c0_294] : memref<2x4x8x32xf32, #tpu.memory_space<vmem>>, vector<1x1x8x32xf32>
    %363 = vector.shape_cast %362 : vector<1x1x8x32xf32> to vector<8x32xf32>
    %cst_295 = arith.constant dense<0.000000e+00> : vector<16x32xf32>
    %364 = tpu.matmul %361, %363, %cst_295 {dimension_numbers = #tpu.dot_dimension_numbers<[1], [0], [0], [1], [0, 0, 1, 1], [], []>} : vector<16x8xf32>, vector<8x32xf32>, vector<16x32xf32> -> vector<16x32xf32>
    %365 = arith.addf %325, %364 : vector<16x32xf32>
    %c1_296 = arith.constant 1 : index
    %c3_297 = arith.constant 3 : index
    %c0_298 = arith.constant 0 : index
    %c0_299 = arith.constant 0 : index
    %366 = vector.load %arg3[%c1_296, %c3_297, %c0_298, %c0_299] : memref<2x4x32x8xf32, #tpu.memory_space<vmem>>, vector<1x1x32x8xf32>
    %367 = vector.shape_cast %366 : vector<1x1x32x8xf32> to vector<32x8xf32>
    %cst_300 = arith.constant dense<0.000000e+00> : vector<16x8xf32>
    %368 = tpu.matmul %244, %367, %cst_300 {dimension_numbers = #tpu.dot_dimension_numbers<[1], [0], [0], [1], [0, 0, 1, 1], [], []>} : vector<16x32xf32>, vector<32x8xf32>, vector<16x8xf32> -> vector<16x8xf32>
    %c1_301 = arith.constant 1 : index
    %c3_302 = arith.constant 3 : index
    %c0_303 = arith.constant 0 : index
    %c0_304 = arith.constant 0 : index
    %369 = vector.load %arg4[%c1_301, %c3_302, %c0_303, %c0_304] : memref<2x4x1x8xf32, #tpu.memory_space<vmem>>, vector<1x1x1x8xf32>
    %370 = vector.shape_cast %369 : vector<1x1x1x8xf32> to vector<1x8xf32>
    %371 = vector.broadcast %370 : vector<1x8xf32> to vector<16x8xf32>
    %372 = arith.addf %368, %371 : vector<16x8xf32>
    %373 = vector.shape_cast %372 : vector<16x8xf32> to vector<2x8x8xf32>
    %c1_305 = arith.constant 1 : index
    %c3_306 = arith.constant 3 : index
    %c0_307 = arith.constant 0 : index
    %c0_308 = arith.constant 0 : index
    %374 = vector.load %arg5[%c1_305, %c3_306, %c0_307, %c0_308] : memref<2x4x32x8xf32, #tpu.memory_space<vmem>>, vector<1x1x32x8xf32>
    %375 = vector.shape_cast %374 : vector<1x1x32x8xf32> to vector<32x8xf32>
    %cst_309 = arith.constant dense<0.000000e+00> : vector<16x8xf32>
    %376 = tpu.matmul %244, %375, %cst_309 {dimension_numbers = #tpu.dot_dimension_numbers<[1], [0], [0], [1], [0, 0, 1, 1], [], []>} : vector<16x32xf32>, vector<32x8xf32>, vector<16x8xf32> -> vector<16x8xf32>
    %c1_310 = arith.constant 1 : index
    %c3_311 = arith.constant 3 : index
    %c0_312 = arith.constant 0 : index
    %c0_313 = arith.constant 0 : index
    %377 = vector.load %arg6[%c1_310, %c3_311, %c0_312, %c0_313] : memref<2x4x1x8xf32, #tpu.memory_space<vmem>>, vector<1x1x1x8xf32>
    %378 = vector.shape_cast %377 : vector<1x1x1x8xf32> to vector<1x8xf32>
    %379 = vector.broadcast %378 : vector<1x8xf32> to vector<16x8xf32>
    %380 = arith.addf %376, %379 : vector<16x8xf32>
    %381 = vector.shape_cast %380 : vector<16x8xf32> to vector<2x8x8xf32>
    %c1_314 = arith.constant 1 : index
    %c3_315 = arith.constant 3 : index
    %c0_316 = arith.constant 0 : index
    %c0_317 = arith.constant 0 : index
    %382 = vector.load %arg7[%c1_314, %c3_315, %c0_316, %c0_317] : memref<2x4x32x8xf32, #tpu.memory_space<vmem>>, vector<1x1x32x8xf32>
    %383 = vector.shape_cast %382 : vector<1x1x32x8xf32> to vector<32x8xf32>
    %cst_318 = arith.constant dense<0.000000e+00> : vector<16x8xf32>
    %384 = tpu.matmul %244, %383, %cst_318 {dimension_numbers = #tpu.dot_dimension_numbers<[1], [0], [0], [1], [0, 0, 1, 1], [], []>} : vector<16x32xf32>, vector<32x8xf32>, vector<16x8xf32> -> vector<16x8xf32>
    %c1_319 = arith.constant 1 : index
    %c3_320 = arith.constant 3 : index
    %c0_321 = arith.constant 0 : index
    %c0_322 = arith.constant 0 : index
    %385 = vector.load %arg8[%c1_319, %c3_320, %c0_321, %c0_322] : memref<2x4x1x8xf32, #tpu.memory_space<vmem>>, vector<1x1x1x8xf32>
    %386 = vector.shape_cast %385 : vector<1x1x1x8xf32> to vector<1x8xf32>
    %387 = vector.broadcast %386 : vector<1x8xf32> to vector<16x8xf32>
    %388 = arith.addf %384, %387 : vector<16x8xf32>
    %389 = vector.shape_cast %388 : vector<16x8xf32> to vector<2x8x8xf32>
    "tpu.trace_start"() <{level = 10 : i32, message = "bqd,bkd->bqk"}> : () -> ()
    %cst_323 = arith.constant dense<0.000000e+00> : vector<2x8x8xf32>
    %390 = tpu.matmul %373, %381, %cst_323 {dimension_numbers = #tpu.dot_dimension_numbers<[2], [2], [1], [1], [0, 0, 0, 1, 1, 1], [0], [0]>} : vector<2x8x8xf32>, vector<2x8x8xf32>, vector<2x8x8xf32> -> vector<2x8x8xf32>
    "tpu.trace_stop"() : () -> ()
    %cst_324 = arith.constant dense<0xFF800000> : vector<2x8xf32>
    %391 = vector.multi_reduction <maximumf>, %390, %cst_324 [2] : vector<2x8x8xf32> to vector<2x8xf32>
    %392 = vector.shape_cast %391 : vector<2x8xf32> to vector<2x8x1xf32>
    %393 = vector.broadcast %392 : vector<2x8x1xf32> to vector<2x8x8xf32>
    %394 = arith.subf %390, %393 : vector<2x8x8xf32>
    %395 = math.exp %394 : vector<2x8x8xf32>
    %cst_325 = arith.constant dense<0.000000e+00> : vector<2x8xf32>
    %396 = vector.multi_reduction <add>, %395, %cst_325 [2] : vector<2x8x8xf32> to vector<2x8xf32>
    %397 = vector.shape_cast %396 : vector<2x8xf32> to vector<2x8x1xf32>
    %398 = vector.broadcast %397 : vector<2x8x1xf32> to vector<2x8x8xf32>
    %399 = arith.divf %395, %398 : vector<2x8x8xf32>
    "tpu.trace_start"() <{level = 10 : i32, message = "bqk,bkd->bqd"}> : () -> ()
    %cst_326 = arith.constant dense<0.000000e+00> : vector<2x8x8xf32>
    %400 = tpu.matmul %399, %389, %cst_326 {dimension_numbers = #tpu.dot_dimension_numbers<[2], [1], [1], [2], [0, 0, 0, 1, 1, 2], [0], [0]>} : vector<2x8x8xf32>, vector<2x8x8xf32>, vector<2x8x8xf32> -> vector<2x8x8xf32>
    "tpu.trace_stop"() : () -> ()
    %401 = vector.shape_cast %400 : vector<2x8x8xf32> to vector<16x8xf32>
    %c1_327 = arith.constant 1 : index
    %c3_328 = arith.constant 3 : index
    %c0_329 = arith.constant 0 : index
    %c0_330 = arith.constant 0 : index
    %402 = vector.load %arg9[%c1_327, %c3_328, %c0_329, %c0_330] : memref<2x4x8x32xf32, #tpu.memory_space<vmem>>, vector<1x1x8x32xf32>
    %403 = vector.shape_cast %402 : vector<1x1x8x32xf32> to vector<8x32xf32>
    %cst_331 = arith.constant dense<0.000000e+00> : vector<16x32xf32>
    %404 = tpu.matmul %401, %403, %cst_331 {dimension_numbers = #tpu.dot_dimension_numbers<[1], [0], [0], [1], [0, 0, 1, 1], [], []>} : vector<16x8xf32>, vector<8x32xf32>, vector<16x32xf32> -> vector<16x32xf32>
    %405 = arith.addf %365, %404 : vector<16x32xf32>
    %c1_332 = arith.constant 1 : index
    %c0_333 = arith.constant 0 : index
    %c0_334 = arith.constant 0 : index
    %406 = vector.load %arg10[%c1_332, %c0_333, %c0_334] : memref<2x1x32xf32, #tpu.memory_space<vmem>>, vector<1x1x32xf32>
    %407 = vector.shape_cast %406 : vector<1x1x32xf32> to vector<1x32xf32>
    %408 = vector.broadcast %407 : vector<1x32xf32> to vector<16x32xf32>
    %409 = arith.addf %405, %408 : vector<16x32xf32>
    %410 = arith.addf %244, %409 : vector<16x32xf32>
    %c1_335 = arith.constant 1 : index
    %c0_336 = arith.constant 0 : index
    %c0_337 = arith.constant 0 : index
    %411 = vector.load %arg11[%c1_335, %c0_336, %c0_337] : memref<2x1x32xf32, #tpu.memory_space<vmem>>, vector<1x1x32xf32>
    %412 = vector.shape_cast %411 : vector<1x1x32xf32> to vector<1x32xf32>
    %c1_338 = arith.constant 1 : index
    %c0_339 = arith.constant 0 : index
    %c0_340 = arith.constant 0 : index
    %413 = vector.load %arg12[%c1_338, %c0_339, %c0_340] : memref<2x1x32xf32, #tpu.memory_space<vmem>>, vector<1x1x32xf32>
    %414 = vector.shape_cast %413 : vector<1x1x32xf32> to vector<1x32xf32>
    %cst_341 = arith.constant dense<0.000000e+00> : vector<16xf32>
    %415 = vector.multi_reduction <add>, %410, %cst_341 [1] : vector<16x32xf32> to vector<16xf32>
    %416 = vector.shape_cast %415 : vector<16xf32> to vector<16x1xf32>
    %cst_342 = arith.constant 3.200000e+01 : f32
    %417 = vector.broadcast %cst_342 : f32 to vector<16x1xf32>
    %418 = arith.divf %416, %417 : vector<16x1xf32>
    %419 = vector.broadcast %418 : vector<16x1xf32> to vector<16x32xf32>
    %420 = arith.subf %410, %419 : vector<16x32xf32>
    %421 = arith.mulf %420, %420 : vector<16x32xf32>
    %cst_343 = arith.constant dense<0.000000e+00> : vector<16xf32>
    %422 = vector.multi_reduction <add>, %421, %cst_343 [1] : vector<16x32xf32> to vector<16xf32>
    %423 = vector.shape_cast %422 : vector<16xf32> to vector<16x1xf32>
    %cst_344 = arith.constant 3.200000e+01 : f32
    %424 = vector.broadcast %cst_344 : f32 to vector<16x1xf32>
    %425 = arith.divf %423, %424 : vector<16x1xf32>
    %426 = vector.broadcast %418 : vector<16x1xf32> to vector<16x32xf32>
    %427 = arith.subf %410, %426 : vector<16x32xf32>
    %cst_345 = arith.constant 9.99999974E-6 : f32
    %428 = vector.broadcast %cst_345 : f32 to vector<16x1xf32>
    %429 = arith.addf %425, %428 : vector<16x1xf32>
    %430 = math.rsqrt %429 : vector<16x1xf32>
    %431 = vector.broadcast %430 : vector<16x1xf32> to vector<16x32xf32>
    %432 = arith.mulf %427, %431 : vector<16x32xf32>
    %433 = vector.broadcast %412 : vector<1x32xf32> to vector<16x32xf32>
    %434 = arith.mulf %432, %433 : vector<16x32xf32>
    %435 = vector.broadcast %414 : vector<1x32xf32> to vector<16x32xf32>
    %436 = arith.addf %434, %435 : vector<16x32xf32>
    %c1_346 = arith.constant 1 : index
    %c0_347 = arith.constant 0 : index
    %c0_348 = arith.constant 0 : index
    %437 = vector.load %arg13[%c1_346, %c0_347, %c0_348] : memref<2x32x64xf32, #tpu.memory_space<vmem>>, vector<1x32x64xf32>
    %438 = vector.shape_cast %437 : vector<1x32x64xf32> to vector<32x64xf32>
    %cst_349 = arith.constant dense<0.000000e+00> : vector<16x64xf32>
    %439 = tpu.matmul %436, %438, %cst_349 {dimension_numbers = #tpu.dot_dimension_numbers<[1], [0], [0], [1], [0, 0, 1, 1], [], []>} : vector<16x32xf32>, vector<32x64xf32>, vector<16x64xf32> -> vector<16x64xf32>
    %c1_350 = arith.constant 1 : index
    %c0_351 = arith.constant 0 : index
    %c0_352 = arith.constant 0 : index
    %440 = vector.load %arg14[%c1_350, %c0_351, %c0_352] : memref<2x1x64xf32, #tpu.memory_space<vmem>>, vector<1x1x64xf32>
    %441 = vector.shape_cast %440 : vector<1x1x64xf32> to vector<1x64xf32>
    %442 = vector.broadcast %441 : vector<1x64xf32> to vector<16x64xf32>
    %443 = arith.addf %439, %442 : vector<16x64xf32>
    %cst_353 = arith.constant 0.000000e+00 : f32
    %444 = vector.broadcast %cst_353 : f32 to vector<16x64xf32>
    %445 = arith.maximumf %443, %444 : vector<16x64xf32>
    %c1_354 = arith.constant 1 : index
    %c0_355 = arith.constant 0 : index
    %c0_356 = arith.constant 0 : index
    %446 = vector.load %arg15[%c1_354, %c0_355, %c0_356] : memref<2x64x32xf32, #tpu.memory_space<vmem>>, vector<1x64x32xf32>
    %447 = vector.shape_cast %446 : vector<1x64x32xf32> to vector<64x32xf32>
    %cst_357 = arith.constant dense<0.000000e+00> : vector<16x32xf32>
    %448 = tpu.matmul %445, %447, %cst_357 {dimension_numbers = #tpu.dot_dimension_numbers<[1], [0], [0], [1], [0, 0, 1, 1], [], []>} : vector<16x64xf32>, vector<64x32xf32>, vector<16x32xf32> -> vector<16x32xf32>
    %c1_358 = arith.constant 1 : index
    %c0_359 = arith.constant 0 : index
    %c0_360 = arith.constant 0 : index
    %449 = vector.load %arg16[%c1_358, %c0_359, %c0_360] : memref<2x1x32xf32, #tpu.memory_space<vmem>>, vector<1x1x32xf32>
    %450 = vector.shape_cast %449 : vector<1x1x32xf32> to vector<1x32xf32>
    %451 = vector.broadcast %450 : vector<1x32xf32> to vector<16x32xf32>
    %452 = arith.addf %448, %451 : vector<16x32xf32>
    %453 = arith.addf %436, %452 : vector<16x32xf32>
    %c1_361 = arith.constant 1 : index
    %c0_362 = arith.constant 0 : index
    %c0_363 = arith.constant 0 : index
    %454 = vector.load %arg17[%c1_361, %c0_362, %c0_363] : memref<2x1x32xf32, #tpu.memory_space<vmem>>, vector<1x1x32xf32>
    %455 = vector.shape_cast %454 : vector<1x1x32xf32> to vector<1x32xf32>
    %c1_364 = arith.constant 1 : index
    %c0_365 = arith.constant 0 : index
    %c0_366 = arith.constant 0 : index
    %456 = vector.load %arg18[%c1_364, %c0_365, %c0_366] : memref<2x1x32xf32, #tpu.memory_space<vmem>>, vector<1x1x32xf32>
    %457 = vector.shape_cast %456 : vector<1x1x32xf32> to vector<1x32xf32>
    %cst_367 = arith.constant dense<0.000000e+00> : vector<16xf32>
    %458 = vector.multi_reduction <add>, %453, %cst_367 [1] : vector<16x32xf32> to vector<16xf32>
    %459 = vector.shape_cast %458 : vector<16xf32> to vector<16x1xf32>
    %cst_368 = arith.constant 3.200000e+01 : f32
    %460 = vector.broadcast %cst_368 : f32 to vector<16x1xf32>
    %461 = arith.divf %459, %460 : vector<16x1xf32>
    %462 = vector.broadcast %461 : vector<16x1xf32> to vector<16x32xf32>
    %463 = arith.subf %453, %462 : vector<16x32xf32>
    %464 = arith.mulf %463, %463 : vector<16x32xf32>
    %cst_369 = arith.constant dense<0.000000e+00> : vector<16xf32>
    %465 = vector.multi_reduction <add>, %464, %cst_369 [1] : vector<16x32xf32> to vector<16xf32>
    %466 = vector.shape_cast %465 : vector<16xf32> to vector<16x1xf32>
    %cst_370 = arith.constant 3.200000e+01 : f32
    %467 = vector.broadcast %cst_370 : f32 to vector<16x1xf32>
    %468 = arith.divf %466, %467 : vector<16x1xf32>
    %469 = vector.broadcast %461 : vector<16x1xf32> to vector<16x32xf32>
    %470 = arith.subf %453, %469 : vector<16x32xf32>
    %cst_371 = arith.constant 9.99999974E-6 : f32
    %471 = vector.broadcast %cst_371 : f32 to vector<16x1xf32>
    %472 = arith.addf %468, %471 : vector<16x1xf32>
    %473 = math.rsqrt %472 : vector<16x1xf32>
    %474 = vector.broadcast %473 : vector<16x1xf32> to vector<16x32xf32>
    %475 = arith.mulf %470, %474 : vector<16x32xf32>
    %476 = vector.broadcast %455 : vector<1x32xf32> to vector<16x32xf32>
    %477 = arith.mulf %475, %476 : vector<16x32xf32>
    %478 = vector.broadcast %457 : vector<1x32xf32> to vector<16x32xf32>
    %479 = arith.addf %477, %478 : vector<16x32xf32>
    %480 = tpu.iota {dimensions = array<i32: 1>} : vector<2x16xi32>
    %481 = tpu.iota {dimensions = array<i32: 0>} : vector<2x16xi32>
    %c8_i32 = arith.constant 8 : i32
    %482 = vector.broadcast %c8_i32 : i32 to vector<2x16xi32>
    %483 = arith.muli %481, %482 : vector<2x16xi32>
    %c0_i32 = arith.constant 0 : i32
    %484 = vector.broadcast %c0_i32 : i32 to vector<2x16xi32>
    %485 = arith.addi %483, %484 : vector<2x16xi32>
    %486 = arith.cmpi eq, %480, %485 : vector<2x16xi32>
    %487 = arith.extui %486 : vector<2x16xi1> to vector<2x16xi32>
    %488 = arith.sitofp %487 : vector<2x16xi32> to vector<2x16xf32>
    %cst_372 = arith.constant dense<0.000000e+00> : vector<2x32xf32>
    %489 = tpu.matmul %488, %479, %cst_372 {dimension_numbers = #tpu.dot_dimension_numbers<[1], [0], [0], [1], [0, 0, 1, 1], [], []>} : vector<2x16xf32>, vector<16x32xf32>, vector<2x32xf32> -> vector<2x32xf32>
    %c0_373 = arith.constant 0 : index
    %c0_374 = arith.constant 0 : index
    %490 = vector.load %arg19[%c0_373, %c0_374] : memref<32x128xf32, #tpu.memory_space<vmem>>, vector<32x128xf32>
    %cst_375 = arith.constant dense<0.000000e+00> : vector<2x128xf32>
    %491 = tpu.matmul %489, %490, %cst_375 {dimension_numbers = #tpu.dot_dimension_numbers<[1], [0], [0], [1], [0, 0, 1, 1], [], []>} : vector<2x32xf32>, vector<32x128xf32>, vector<2x128xf32> -> vector<2x128xf32>
    %c0_376 = arith.constant 0 : index
    %c0_377 = arith.constant 0 : index
    %492 = vector.load %arg20[%c0_376, %c0_377] : memref<1x128xf32, #tpu.memory_space<vmem>>, vector<1x128xf32>
    %493 = vector.broadcast %492 : vector<1x128xf32> to vector<2x128xf32>
    %494 = arith.addf %491, %493 : vector<2x128xf32>
    %c0_378 = arith.constant 0 : index
    %c0_379 = arith.constant 0 : index
    %495 = vector.load %arg21[%c0_378, %c0_379] : memref<2x128xf32, #tpu.memory_space<vmem>>, vector<2x128xf32>
    tpu.vector_store %arg21[%c0_378, %c0_379], %494 {strides = array<i32>} : memref<2x128xf32, #tpu.memory_space<vmem>>, vector<2x128xf32>,
    return
  }
}

</mosaic_0001>

<bundles_post_ra>
// kernel: encoder_sequence_classifier.1
= control target key start
LH: loop header
LB: loop body
LE: loop exit
PB: predicated region body
PF: predicated region fallthrough
CT: control target
= control target key end

     0   :  { %s8919_s0 = inlined_call_operand.vmem [shape: s32[16,1], index: 0, kind: input, shape index: {}]   ;;  %s8920_s1 = inlined_call_operand.vmem [shape: f32[16,32], index: 1, kind: input, shape index: {}]   ;;  %s8921_s2 = inlined_call_operand.vmem [shape: f32[128,32], index: 2, kind: input, shape index: {}]   ;;  %s8922_s3 = inlined_call_operand.vmem [shape: f32[2,4,32,8], index: 3, kind: input, shape index: {}]   ;;  %s8923_s4 = inlined_call_operand.vmem [shape: f32[2,4,1,8], index: 4, kind: input, shape index: {}]   ;;  %s8924_s5 = inlined_call_operand.vmem [shape: f32[2,4,32,8], index: 5, kind: input, shape index: {}]   ;;  %s8925_s6 = inlined_call_operand.vmem [shape: f32[2,4,1,8], index: 6, kind: input, shape index: {}]   ;;  %s8926_s7 = inlined_call_operand.vmem [shape: f32[2,4,32,8], index: 7, kind: input, shape index: {}]   ;;  %s8927_s8 = inlined_call_operand.vmem [shape: f32[2,4,1,8], index: 8, kind: input, shape index: {}]   ;;  %s8928_s9 = inlined_call_operand.vmem [shape: f32[2,4,8,32], index: 9, kind: input, shape index: {}]   ;;  %s8929_s10 = inlined_call_operand.vmem [shape: f32[2,1,32], index: 10, kind: input, shape index: {}]   ;;  %s8930_s11 = inlined_call_operand.vmem [shape: f32[2,1,32], index: 11, kind: input, shape index: {}]   ;;  %s8931_s12 = inlined_call_operand.vmem [shape: f32[2,1,32], index: 12, kind: input, shape index: {}]   ;;  %s8932_s13 = inlined_call_operand.vmem [shape: f32[2,32,64], index: 13, kind: input, shape index: {}]   ;;  %s8933_s14 = inlined_call_operand.vmem [shape: f32[2,1,64], index: 14, kind: input, shape index: {}]   ;;  %s8934_s15 = inlined_call_operand.vmem [shape: f32[2,64,32], index: 15, kind: input, shape index: {}]   ;;  %s8935_s16 = inlined_call_operand.vmem [shape: f32[2,1,32], index: 16, kind: input, shape index: {}]   ;;  %s8936_s17 = inlined_call_operand.vmem [shape: f32[2,1,32], index: 17, kind: input, shape index: {}]   ;;  %s8937_s18 = inlined_call_operand.vmem [shape: f32[2,1,32], index: 18, kind: input, shape index: {}]   ;;  %s8938_s19 = inlined_call_operand.vmem [shape: f32[32,128], index: 19, kind: input, shape index: {}]   ;;  %s8939_s20 = inlined_call_operand.vmem [shape: f32[1,128], index: 20, kind: input, shape index: {}]   ;;  %s8940_s21 = inlined_call_operand.hbm [shape: f32[2,128], index: 21, kind: output, shape index: {}]  }
   0x1   :  { %8948 = sst [smem:[#allocation5_spill]] %s8919_s0 }
   0x2   :  { %8949 = sst [smem:[#allocation6_spill]] %s8920_s1 }
   0x3   :  { %8950 = sst [smem:[#allocation7_spill]] %s8921_s2 }
   0x4   :  { %8951 = sst [smem:[#allocation8_spill]] %s8922_s3 }
   0x5   :  { %8952 = sst [smem:[#allocation9_spill]] %s8923_s4 }
   0x6   :  { %8953 = sst [smem:[#allocation10_spill]] %s8924_s5 }
   0x7   :  { %8954 = sst [smem:[#allocation11_spill]] %s8935_s16 }
   0x8   :  { %s8955_s26 = sld [smem:[#allocation5_spill]]  ;;  %s8956_s16 = sld [smem:[#allocation7_spill]]  ;;  %v7869_v2 = vmov 0  }
   0x9   :  { %7764 = vset.pattern.permute.xlu0 %v7869_v2 }
   0xe   :  { %v69_v0 = vld [vmem:[%s8955_s26] sm:$0xff]  ;;  %v86_v3 = vld [vmem:[%s8956_s16 + $0x8] sm:$0xff]  ;;  %v87_v4 = vld [vmem:[%s8956_s16 + $0x10] sm:$0xff] }
   0xf   :  { %v85_v1 = vld [vmem:[%s8956_s16] sm:$0xff]  ;;  %v88_v5 = vld [vmem:[%s8956_s16 + $0x18] sm:$0xff]  ;;  %74 = vperm.xlu0 %7764, %v69_v0   ;;  %v70_v8 = vld [vmem:[%s8955_s26 + $0x8] sm:$0xff] }
  0x10   :  { %v7465_v6 = vpack.c.bf16 %v86_v3, %v85_v1  ;;  %v7469_v7 = vpack.c.bf16 %v88_v5, %v87_v4  ;;  %v89_v9 = vld [vmem:[%s8956_s16 + $0x20] sm:$0xff]  ;;  %v90_v10 = vld [vmem:[%s8956_s16 + $0x28] sm:$0xff]  ;;  %v91_v12 = vld [vmem:[%s8956_s16 + $0x30] sm:$0xff] }
  0x11   :  { %v7473_v11 = vpack.c.bf16 %v90_v10, %v89_v9 }
  0x12   :  { %7466 = vmatprep.subr.bf16.mxu0 %v7465_v6 }
  0x13   :  { %7468 = vmatpush3.bf16.msra.mxu0 %v7465_v6  ;;  %77 = vperm.xlu0 %7764, %v70_v8  }
  0x14   :  { %7470 = vmatprep.subr.bf16.mxu0 %v7469_v7 }
  0x15   :  { %26 = vsyncpa [#allocation3], 0  ;;  %v92_v13 = vld [vmem:[%s8956_s16 + $0x38] sm:$0xff]  ;;  %s8957_s4 = sld [smem:[#allocation8_spill]]  ;;  %v93_v18 = vld [vmem:[%s8956_s16 + $0x40] sm:$0xff]  ;;  %v71_v30 = vlaneseq  ;;  %v7870_v33 = vmov 1.0  }
  0x16   :  { %v7477_v17 = vpack.c.bf16 %v92_v13, %v91_v12  ;;  %v94_v19 = vld [vmem:[%s8956_s16 + $0x48] sm:$0xff]  ;;  %v95_v21 = vld [vmem:[%s8956_s16 + $0x50] sm:$0xff]  ;;  %v96_v22 = vld [vmem:[%s8956_s16 + $0x58] sm:$0xff]  ;;  %s8958_s3 = sld [smem:[#allocation10_spill]]  ;;  %s8959_s30 = sld [smem:[#allocation6_spill]]  ;;  %vm189_vm2 = vcmask 261120  }
  0x17   :  { %7472 = vmatpush3.bf16.msra.mxu0 %v7469_v7  ;;  %v7481_v20 = vpack.c.bf16 %v94_v19, %v93_v18  ;;  %v7485_v23 = vpack.c.bf16 %v96_v22, %v95_v21  ;;  %v97_v24 = vld [vmem:[%s8956_s16 + $0x60] sm:$0xff]  ;;  %v98_v25 = vld [vmem:[%s8956_s16 + $0x68] sm:$0xff]  ;;  %v99_v27 = vld [vmem:[%s8956_s16 + $0x70] sm:$0xff]  ;;  %v8046_v31 = vand.u32 127, %v71_v30  ;;  %v7871_v56 = vmov 0.0   ;;  %s8960_s1 = sld [smem:[#allocation9_spill]] }
  0x18   :  { %7474 = vmatprep.subr.bf16.mxu0 %v7473_v11  ;;  %v7489_v26 = vpack.c.bf16 %v98_v25, %v97_v24  ;;  %v100_v28 = vld [vmem:[%s8956_s16 + $0x78] sm:$0xff]  ;;  %v357_v50 = vld [vmem:[%s8926_s7] sm:$0xff]  ;;  %v358_v51 = vld [vmem:[%s8926_s7 + $0x8] sm:$0xff]  ;;  %vm7872_vm3 = vmmov 0   ;;  %vm443_vm4 = vcmask 64512   ;;  %vm3016_vm5 = vcmask 523264  }
  0x19   :  { %v7493_v29 = vpack.c.bf16 %v100_v28, %v99_v27  ;;  %v7513_v52 = vpack.c.bf16 %v358_v51, %v357_v50  ;;  %v359_v53 = vld [vmem:[%s8926_s7 + $0x10] sm:$0xff]  ;;  %v360_v54 = vld [vmem:[%s8926_s7 + $0x18] sm:$0xff]  ;;  %v6308_v59 = vld [vmem:[%s8925_s6] ss:$0 sm:$0xff]  ;;  %s8961_s28 = sld [smem:[#allocation11_spill]]  ;;  %vm6128_vm7 = vcmask 130048  }
  0x1a   :  { %v7517_v55 = vpack.c.bf16 %v360_v54, %v359_v53  ;;  %v6311_v2 = vld [vmem:[%s8927_s8] ss:$0 sm:$0xff]  ;;  %v6339_v50 = vld [vmem:[%s8926_s7 + $0x38] sm:$0xff] }
  0x1b   :  { %v178_v14 = vld [vmem:[%s8957_s4] sm:$0xff]  ;;  %v179_v15 = vld [vmem:[%s8957_s4 + $0x8] sm:$0xff]  ;;  %7476 = vmatpush3.bf16.msra.mxu0 %v7473_v11  ;;  %v180_v35 = vld [vmem:[%s8957_s4 + $0x10] sm:$0xff] }
  0x1c   :  { %v7497_v16 = vpack.c.bf16 %v179_v15, %v178_v14  ;;  %7478 = vmatprep.subr.bf16.mxu0 %v7477_v17  ;;  %v181_v36 = vld [vmem:[%s8957_s4 + $0x18] sm:$0xff]  ;;  %v271_v38 = vld [vmem:[%s8958_s3] sm:$0xff]  ;;  %v272_v39 = vld [vmem:[%s8958_s3 + $0x8] sm:$0xff] }
  0x1d   :  { %v7501_v37 = vpack.c.bf16 %v181_v36, %v180_v35  ;;  %v7505_v40 = vpack.c.bf16 %v272_v39, %v271_v38  ;;  %v101_v41 = vld [vmem:[%s8959_s30] sm:$0xff]  ;;  %v102_v42 = vld [vmem:[%s8959_s30 + $0x8] sm:$0xff]  ;;  %v273_v44 = vld [vmem:[%s8958_s3 + $0x10] sm:$0xff] }
  0x1e   :  { %7498 = vmatprep.subr.bf16.mxu1 %v7497_v16  ;;  %v274_v45 = vld [vmem:[%s8958_s3 + $0x18] sm:$0xff]  ;;  %v6305_v62 = vld [vmem:[%s8960_s1] ss:$0 sm:$0xff]  ;;  %v6329_v25 = vld [vmem:[%s8958_s3 + $0x28] sm:$0xff] }
  0x1f   :  { %7500 = vmatpush3.bf16.msra.mxu1 %v7497_v16  ;;  %7480 = vmatpush3.bf16.msra.mxu0 %v7477_v17  ;;  %v7509_v49 = vpack.c.bf16 %v274_v45, %v273_v44  ;;  %v6328_v24 = vld [vmem:[%s8958_s3 + $0x20] sm:$0xff]  ;;  %v6321_v28 = vld [vmem:[%s8957_s4 + $0x28] sm:$0xff]  ;;  %v6331_v35 = vld [vmem:[%s8958_s3 + $0x38] sm:$0xff] }
  0x20   :  { %7482 = vmatprep.subr.bf16.mxu0 %v7481_v20  ;;  %7502 = vmatprep.subr.bf16.mxu1 %v7501_v37  ;;  %v6320_v27 = vld [vmem:[%s8957_s4 + $0x20] sm:$0xff]  ;;  %v6322_v39 = vld [vmem:[%s8957_s4 + $0x30] sm:$0xff]  ;;  %v6337_v45 = vld [vmem:[%s8926_s7 + $0x28] sm:$0xff] }
  0x21   :  { %v6336_v44 = vld [vmem:[%s8926_s7 + $0x20] sm:$0xff] }
  0x23   :  { %7484 = vmatpush3.bf16.msra.mxu0 %v7481_v20  ;;  %7504 = vmatpush3.bf16.msra.mxu1 %v7501_v37 }
  0x24   :  { %7486 = vmatprep.subr.bf16.mxu0 %v7485_v23  ;;  %7506 = vmatprep.subr.bf16.mxu1 %v7505_v40 }
  0x27   :  { %7488 = vmatpush3.bf16.msra.mxu0 %v7485_v23 }
  0x28   :  { %7490 = vmatprep.subr.bf16.mxu0 %v7489_v26 }
  0x2b   :  { %7492 = vmatpush3.bf16.msra.mxu0 %v7489_v26  ;;  %v7529_v26 = vpack.c.bf16 %v6329_v25, %v6328_v24  ;;  %v6355_v24 = vld [vmem:[%s8957_s4 + $0x40] sm:$0xff]  ;;  %v6356_v25 = vld [vmem:[%s8957_s4 + $0x48] sm:$0xff] }
  0x2c   :  { %7494 = vmatprep.subr.bf16.mxu0 %v7493_v29 }
  0x2f   :  { %7496 = vmatpush3.bf16.msra.mxu0 %v7493_v29  ;;  %v7521_v29 = vpack.c.bf16 %v6321_v28, %v6320_v27 }
  0x30   :  { %6966 = vmatprep.subr.mxu0 %v7871_v56 }
  0x8e   :  { %v75_v32 = vpop.permute.xlu0 %74 }
  0x8f   :  { %vm79_vm0 = vcmp.eq.s32.totalorder %v8046_v31, %v75_v32 }
  0x90   :  { %6920 = vmatprep.mubr.msk.f32.mxu0 %vm79_vm0, %v7870_v33 }
  0x92   :  { %v78_v34 = vpop.permute.xlu0 %77 }
  0x93   :  { %vm80_vm1 = vcmp.eq.s32.totalorder %v8046_v31, %v78_v34  ;;  %v6330_v34 = vld [vmem:[%s8958_s3 + $0x30] sm:$0xff] }
  0x94   :  { %6921 = vmatmul.mubr.msk.f32.vlgmr.msra.gmra.mrb[0].mxu0 %vm80_vm1, %v7870_v33  ;;  %v7533_v38 = vpack.c.bf16 %v6331_v35, %v6330_v34  ;;  %v6358_v34 = vld [vmem:[%s8957_s4 + $0x58] sm:$0xff] }
  0x95   :  { %6968 = vmatprep.mubr.msk.f32.mxu0 %vm7872_vm3, %v7871_v56 }
 0x167   :  { %v6922_v43 = vpop.f32.mrb[0].mxu0 }
 0x168   :  { %v169_v46 = vpop.f32.mrb[1].mxu0  ;;  %v8076_v48 = vadd.f32 %v6922_v43, %v102_v42 }
 0x169   :  { %v8074_v47 = vadd.f32 %v169_v46, %v101_v41  ;;  %v7537_v46 = vpack.c.bf16 %v6337_v45, %v6336_v44  ;;  %v6350_v44 = vld [vmem:[%s8928_s9 + $0x8] sm:$0xff]  ;;  %v764_v45 = vld [vmem:[%s8928_s9] sm:$0xff] }
 0x16b   :  { %6931 = vmatprep.mubr.msk.f32.mxu1 %vm189_vm2, %v8074_v47 }
 0x16c   :  { %6932 = vmatmul.mubr.msk.f32.vlgmr.msra.gmra.mrb[0].mxu1 %vm189_vm2, %v8076_v48 }
 0x16d   :  { %7508 = vmatpush3.bf16.msra.mxu1 %v7505_v40  ;;  %6942 = vmatprep.mubr.msk.f32.mxu1 %vm189_vm2, %v8074_v47  ;;  %v6323_v40 = vld [vmem:[%s8957_s4 + $0x38] sm:$0xff] }
 0x16e   :  { %7510 = vmatprep.subr.bf16.mxu1 %v7509_v49  ;;  %v7525_v43 = vpack.c.bf16 %v6323_v40, %v6322_v39  ;;  %v6372_v39 = vld [vmem:[%s8926_s7 + $0x48] sm:$0xff] }
 0x171   :  { %7512 = vmatpush3.bf16.msra.mxu1 %v7509_v49  ;;  %v6338_v49 = vld [vmem:[%s8926_s7 + $0x30] sm:$0xff] }
 0x172   :  { %7514 = vmatprep.subr.bf16.mxu1 %v7513_v52  ;;  %v7541_v51 = vpack.c.bf16 %v6339_v50, %v6338_v49  ;;  %v6363_v49 = vld [vmem:[%s8958_s3 + $0x40] sm:$0xff]  ;;  %v6364_v50 = vld [vmem:[%s8958_s3 + $0x48] sm:$0xff] }
 0x174   :  { %6943 = vmatmul.mubr.msk.f32.vlgmr.msra.gmra.mrb[2].mxu1 %vm189_vm2, %v8076_v48 }
 0x175   :  { %7516 = vmatpush3.bf16.msra.mxu1 %v7513_v52  ;;  %6953 = vmatprep.mubr.msk.f32.mxu1 %vm189_vm2, %v8074_v47 }
 0x176   :  { %7518 = vmatprep.subr.bf16.mxu1 %v7517_v55 }
 0x179   :  { %7520 = vmatpush3.bf16.msra.mxu1 %v7517_v55 }
 0x17a   :  { %6956 = vmatprep.subr.mxu1 %v7871_v56 }
 0x17c   :  { %6954 = vmatmul.mubr.msk.f32.vlgmr.msra.gmra.mrb[4].mxu1 %vm189_vm2, %v8076_v48 }
 0x17d   :  { %6958 = vmatprep.mubr.msk.f32.mxu1 %vm7872_vm3, %v7871_v56 }
 0x23f   :  { %v6933_v57 = vpop.f32.mrb[0].mxu1 }
 0x240   :  { %v262_v58 = vpop.f32.mrb[1].mxu1  ;;  %v268_v4 = vadd.f32 %v6933_v57, %v6305_v62  ;;  %v6333_v57 = vld [vmem:[%s8925_s6 + $0x1] ss:$0 sm:$0xff] }
 0x241   :  { %v263_v0 = vadd.f32 %v6305_v62, %v262_v58 }
 0x247   :  { %v6944_v60 = vpop.f32.mrb[2].mxu1 }
 0x248   :  { %v348_v61 = vpop.f32.mrb[3].mxu1  ;;  %v354_v1 = vadd.f32 %v6944_v60, %v6308_v59 }
 0x249   :  { %v349_v63 = vadd.f32 %v6308_v59, %v348_v61  ;;  %v6325_v61 = vld [vmem:[%s8960_s1 + $0x1] ss:$0 sm:$0xff] }
 0x24b   :  { %6957 = vmatpush3.xpose.msk.msra.mxu1 %vm443_vm4, %v349_v63 }
 0x24c   :  { %6961 = vmatprep.subr.mxu1 %v7871_v56 }
 0x24e   :  { %6959 = vmatmul.mubr.msk.f32.vlgmr.msra.gmra.mrb[6].mxu1 %vm443_vm4, %v263_v0 }
 0x24f   :  { %v6955_v3 = vpop.f32.mrb[4].mxu1  ;;  %6962 = vmatpush3.xpose.msk.msra.mxu1 %vm443_vm4, %v354_v1  ;;  %6963 = vmatprep.mubr.msk.f32.mxu1 %vm7872_vm3, %v7871_v56 }
 0x250   :  { %v440_v5 = vadd.f32 %v6955_v3, %v6311_v2  ;;  %v434_v6 = vpop.f32.mrb[5].mxu1  ;;  %6971 = vmatprep.subr.mxu1 %v7871_v56  ;;  %v6341_v3 = vld [vmem:[%s8927_s8 + $0x1] ss:$0 sm:$0xff] }
 0x251   :  { %v435_v7 = vadd.f32 %v6311_v2, %v434_v6 }
 0x252   :  { %6964 = vmatmul.mubr.msk.f32.vlgmr.msra.gmra.mrb[8].mxu1 %vm443_vm4, %v268_v4 }
 0x253   :  { %6967 = vmatpush3.msra.mxu0 %v435_v7  ;;  %6972 = vmatpush3.msra.mxu1 %v440_v5 }
 0x254   :  { %6973 = vmatprep.mubr.msk.f32.mxu1 %vm7872_vm3, %v7871_v56  ;;  %7530 = vmatprep.subr.bf16.mxu1 %v7529_v26 }
 0x255   :  { %7522 = vmatprep.subr.bf16.mxu0 %v7521_v29 }
 0x321   :  { %v516_v8 = vpop.f32.mrb[6].mxu1 }
 0x322   :  { %v6960_v9 = vpop.f32.mrb[7].mxu1  ;;  %v596_v13 = vsel %vm443_vm4, %v516_v8, -inf }
 0x325   :  { %v592_v10 = vpop.f32.mrb[8].mxu1 }
 0x326   :  { %v6965_v11 = vpop.f32.mrb[9].mxu1  ;;  %v599_v12 = vsel %vm443_vm4, %v592_v10, -inf }
 0x327   :  { %600 = vmax.xlane.f32.xlu1 %v599_v12 }
 0x32b   :  { %597 = vmax.xlane.f32.xlu1 %v596_v13 }
 0x3b4   :  { %v601_v14 = vpop.xlane.xlu1 %600 }
 0x3b5   :  { %v603_v15 = vsub.f32 %v592_v10, %v601_v14 }
 0x3b7   :  { %v606_v16 = vmul.f32 1.442695, %v603_v15 }
 0x3b8   :  { %v598_v17 = vpop.xlane.xlu1 %597 }
 0x3b9   :  { %7765 = vpow2.f32 %v606_v16  ;;  %v602_v18 = vsub.f32 %v516_v8, %v598_v17 }
 0x3bb   :  { %v604_v19 = vmul.f32 1.442695, %v602_v18 }
 0x3bd   :  { %7767 = vpow2.f32 %v604_v19 }
 0x3c3   :  { %v7766_v20 = vpop.eup %7765 }
 0x3c4   :  { %v611_v21 = vsel %vm443_vm4, %v7766_v20, 0.0 }
 0x3c5   :  { %612 = vadd.xlane.f32.xlu0 %v611_v21 }
 0x3c7   :  { %v7768_v22 = vpop.eup %7767 }
 0x3c8   :  { %v608_v23 = vsel %vm443_vm4, %v7768_v22, 0.0 }
 0x3c9   :  { %609 = vadd.xlane.f32.xlu1 %v608_v23 }
 0x452   :  { %v613_v32 = vpop.xlane.xlu0 %612 }
 0x453   :  { %7769 = vrcp.f32 %v613_v32 }
 0x456   :  { %v610_v33 = vpop.xlane.xlu1 %609 }
 0x457   :  { %7771 = vrcp.f32 %v610_v33  ;;  %v6357_v33 = vld [vmem:[%s8957_s4 + $0x50] sm:$0xff] }
 0x45d   :  { %v7770_v36 = vpop.eup %7769 }
 0x45e   :  { %v617_v37 = vmul.f32 %v7770_v36, %v7766_v20 }
 0x460   :  { %6974 = vmatmul.mubr.msk.f32.vlgmr.msra.gmra.mrb[10].mxu1 %vm443_vm4, %v617_v37  ;;  %v7549_v37 = vpack.c.bf16 %v6358_v34, %v6357_v33 }
 0x461   :  { %v7772_v41 = vpop.eup %7771  ;;  %7532 = vmatpush3.bf16.msra.mxu1 %v7529_v26  ;;  %6995 = vmatprep.mubr.msk.f32.mxu1 %vm189_vm2, %v8074_v47  ;;  %v7545_v26 = vpack.c.bf16 %v6356_v25, %v6355_v24 }
 0x462   :  { %v615_v42 = vmul.f32 %v7772_v41, %v7768_v22  ;;  %7534 = vmatprep.subr.bf16.mxu1 %v7533_v38  ;;  %v6373_v41 = vld [vmem:[%s8926_s7 + $0x50] sm:$0xff] }
 0x464   :  { %6969 = vmatmul.mubr.msk.f32.vlgmr.msra.gmra.mrb[2].mxu0 %vm443_vm4, %v615_v42  ;;  %v6374_v42 = vld [vmem:[%s8926_s7 + $0x58] sm:$0xff] }
 0x465   :  { %7524 = vmatpush3.bf16.msra.mxu0 %v7521_v29  ;;  %7536 = vmatpush3.bf16.msra.mxu1 %v7533_v38  ;;  %v6371_v38 = vld [vmem:[%s8926_s7 + $0x40] sm:$0xff] }
 0x466   :  { %6984 = vmatprep.mubr.msk.f32.mxu0 %vm189_vm2, %v8074_v47  ;;  %7526 = vmatprep.subr.bf16.mxu0 %v7525_v43  ;;  %v7561_v40 = vpack.c.bf16 %v6372_v39, %v6371_v38 }
 0x467   :  { %7009 = vmatprep.subr.mxu1 %v7871_v56 }
 0x468   :  { %6996 = vmatmul.mubr.msk.f32.vlgmr.msra.gmra.mrb[12].mxu1 %vm189_vm2, %v8076_v48 }
 0x469   :  { %7528 = vmatpush3.bf16.msra.mxu0 %v7525_v43  ;;  %7011 = vmatprep.mubr.msk.f32.mxu1 %vm7872_vm3, %v7871_v56  ;;  %v7565_v43 = vpack.c.bf16 %v6374_v42, %v6373_v41  ;;  %v6405_v41 = vld [vmem:[%s8926_s7 + $0x68] sm:$0xff] }
 0x46a   :  { %7538 = vmatprep.subr.bf16.mxu0 %v7537_v46 }
 0x46c   :  { %6985 = vmatmul.mubr.msk.f32.vlgmr.msra.gmra.mrb[4].mxu0 %vm189_vm2, %v8076_v48 }
 0x46d   :  { %7540 = vmatpush3.bf16.msra.mxu0 %v7537_v46  ;;  %7006 = vmatprep.mubr.msk.f32.mxu0 %vm189_vm2, %v8074_v47 }
 0x46e   :  { %7542 = vmatprep.subr.bf16.mxu0 %v7541_v51 }
 0x471   :  { %7544 = vmatpush3.bf16.msra.mxu0 %v7541_v51 }
 0x472   :  { %7019 = vmatprep.subr.mxu0 %v7871_v56 }
 0x474   :  { %7007 = vmatmul.mubr.msk.f32.vlgmr.msra.gmra.mrb[6].mxu0 %vm189_vm2, %v8076_v48 }
 0x475   :  { %7021 = vmatprep.mubr.msk.f32.mxu0 %vm7872_vm3, %v7871_v56 }
 0x533   :  { %v8187_v52 = vpop.f32.mrb[10].mxu1 }
 0x534   :  { %v6975_v53 = vpop.f32.mrb[11].mxu1 }
 0x535   :  { %v7553_v53 = vpack.c.bf16 %v6364_v50, %v6363_v49  ;;  %v6396_v49 = vld [vmem:[%s8958_s3 + $0x60] sm:$0xff]  ;;  %v6397_v50 = vld [vmem:[%s8958_s3 + $0x68] sm:$0xff] }
 0x537   :  { %v8189_v54 = vpop.f32.mrb[2].mxu0 }
 0x538   :  { %v6970_v55 = vpop.f32.mrb[3].mxu0 }
 0x53b   :  { %v6997_v58 = vpop.f32.mrb[12].mxu1 }
 0x53c   :  { %v932_v59 = vpop.f32.mrb[13].mxu1  ;;  %v938_v1 = vadd.f32 %v6997_v58, %v6333_v57  ;;  %v6365_v58 = vld [vmem:[%s8958_s3 + $0x50] sm:$0xff] }
 0x53d   :  { %v933_v60 = vadd.f32 %v6333_v57, %v932_v59  ;;  %v6366_v59 = vld [vmem:[%s8958_s3 + $0x58] sm:$0xff] }
 0x53f   :  { %v6986_v62 = vpop.f32.mrb[4].mxu0  ;;  %7010 = vmatpush3.xpose.msk.msra.mxu1 %vm443_vm4, %v933_v60  ;;  %v7557_v60 = vpack.c.bf16 %v6366_v59, %v6365_v58 }
 0x540   :  { %v844_v63 = vpop.f32.mrb[5].mxu0  ;;  %7014 = vmatprep.subr.mxu1 %v7871_v56  ;;  %v850_v2 = vadd.f32 %v6986_v62, %v6325_v61 }
 0x541   :  { %v845_v0 = vadd.f32 %v6325_v61, %v844_v63 }
 0x543   :  { %7012 = vmatmul.mubr.msk.f32.vlgmr.msra.gmra.mrb[14].mxu1 %vm443_vm4, %v845_v0 }
 0x544   :  { %7015 = vmatpush3.xpose.msk.msra.mxu1 %vm443_vm4, %v938_v1  ;;  %7016 = vmatprep.mubr.msk.f32.mxu1 %vm7872_vm3, %v7871_v56  ;;  %v6360_v1 = vld [vmem:[%s8960_s1 + $0x2] ss:$0 sm:$0xff] }
 0x545   :  { %7024 = vmatprep.subr.mxu1 %v7871_v56 }
 0x547   :  { %v7008_v4 = vpop.f32.mrb[6].mxu0  ;;  %7017 = vmatmul.mubr.msk.f32.vlgmr.msra.gmra.mrb[16].mxu1 %vm443_vm4, %v850_v2 }
 0x548   :  { %v1026_v5 = vadd.f32 %v7008_v4, %v6341_v3  ;;  %v1020_v6 = vpop.f32.mrb[7].mxu0  ;;  %7026 = vmatprep.mubr.msk.f32.mxu1 %vm7872_vm3, %v7871_v56  ;;  %v6376_v4 = vld [vmem:[%s8927_s8 + $0x2] ss:$0 sm:$0xff] }
 0x549   :  { %v1021_v7 = vadd.f32 %v6341_v3, %v1020_v6 }
 0x54a   :  { %7025 = vmatpush3.msra.mxu1 %v1026_v5 }
 0x54b   :  { %7020 = vmatpush3.msra.mxu0 %v1021_v7  ;;  %7546 = vmatprep.subr.bf16.mxu1 %v7545_v26 }
 0x54c   :  { %7029 = vmatprep.subr.mxu0 %v6350_v44 }
 0x616   :  { %v1101_v8 = vpop.f32.mrb[14].mxu1 }
 0x617   :  { %v7013_v9 = vpop.f32.mrb[15].mxu1  ;;  %v1181_v10 = vsel %vm443_vm4, %v1101_v8, -inf }
 0x618   :  { %1182 = vmax.xlane.f32.xlu1 %v1181_v10 }
 0x61a   :  { %v1177_v11 = vpop.f32.mrb[16].mxu1 }
 0x61b   :  { %v7018_v12 = vpop.f32.mrb[17].mxu1  ;;  %v1184_v13 = vsel %vm443_vm4, %v1177_v11, -inf }
 0x61c   :  { %1185 = vmax.xlane.f32.xlu1 %v1184_v13 }
 0x6a5   :  { %v1183_v14 = vpop.xlane.xlu1 %1182 }
 0x6a6   :  { %v1187_v15 = vsub.f32 %v1101_v8, %v1183_v14 }
 0x6a8   :  { %v1189_v16 = vmul.f32 1.442695, %v1187_v15 }
 0x6a9   :  { %v1186_v17 = vpop.xlane.xlu1 %1185 }
 0x6aa   :  { %7773 = vpow2.f32 %v1189_v16  ;;  %v1188_v18 = vsub.f32 %v1177_v11, %v1186_v17 }
 0x6ac   :  { %v1191_v19 = vmul.f32 1.442695, %v1188_v18 }
 0x6ae   :  { %7775 = vpow2.f32 %v1191_v19 }
 0x6b4   :  { %v7774_v20 = vpop.eup %7773 }
 0x6b5   :  { %v1193_v21 = vsel %vm443_vm4, %v7774_v20, 0.0 }
 0x6b6   :  { %1194 = vadd.xlane.f32.xlu1 %v1193_v21 }
 0x6b8   :  { %v7776_v22 = vpop.eup %7775 }
 0x6b9   :  { %v1196_v23 = vsel %vm443_vm4, %v7776_v22, 0.0 }
 0x6ba   :  { %1197 = vadd.xlane.f32.xlu1 %v1196_v23 }
 0x743   :  { %v1195_v27 = vpop.xlane.xlu1 %1194 }
 0x744   :  { %7777 = vrcp.f32 %v1195_v27  ;;  %v6389_v27 = vld [vmem:[%s8957_s4 + $0x68] sm:$0xff] }
 0x747   :  { %v1198_v28 = vpop.xlane.xlu1 %1197 }
 0x748   :  { %7779 = vrcp.f32 %v1198_v28 }
 0x74e   :  { %v7778_v29 = vpop.eup %7777 }
 0x74f   :  { %v1200_v32 = vmul.f32 %v7778_v29, %v7774_v20 }
 0x751   :  { %7022 = vmatmul.mubr.msk.f32.vlgmr.msra.gmra.mrb[8].mxu0 %vm443_vm4, %v1200_v32 }
 0x752   :  { %v7780_v35 = vpop.eup %7779  ;;  %7030 = vmatpush3.msra.mxu0 %v6350_v44  ;;  %v6407_v44 = vld [vmem:[%s8926_s7 + $0x78] sm:$0xff] }
 0x753   :  { %v1202_v36 = vmul.f32 %v7780_v35, %v7776_v22  ;;  %7034 = vmatprep.subr.mxu0 %v764_v45  ;;  %v6390_v35 = vld [vmem:[%s8957_s4 + $0x70] sm:$0xff] }
 0x755   :  { %7027 = vmatmul.mubr.msk.f32.vlgmr.msra.gmra.mrb[18].mxu1 %vm443_vm4, %v1202_v36  ;;  %v6391_v36 = vld [vmem:[%s8957_s4 + $0x78] sm:$0xff] }
 0x756   :  { %7548 = vmatpush3.bf16.msra.mxu1 %v7545_v26  ;;  %7047 = vmatprep.mubr.msk.f32.mxu1 %vm189_vm2, %v8074_v47  ;;  %v6388_v26 = vld [vmem:[%s8957_s4 + $0x60] sm:$0xff]  ;;  %v7573_v39 = vpack.c.bf16 %v6391_v36, %v6390_v35  ;;  %v6418_v35 = vld [vmem:[%s8928_s9 + $0x18] sm:$0xff] }
 0x757   :  { %7550 = vmatprep.subr.bf16.mxu1 %v7549_v37  ;;  %v7569_v28 = vpack.c.bf16 %v6389_v27, %v6388_v26 }
 0x75a   :  { %7552 = vmatpush3.bf16.msra.mxu1 %v7549_v37 }
 0x75b   :  { %7562 = vmatprep.subr.bf16.mxu1 %v7561_v40 }
 0x75d   :  { %7048 = vmatmul.mubr.msk.f32.vlgmr.msra.gmra.mrb[20].mxu1 %vm189_vm2, %v8076_v48 }
 0x75e   :  { %7564 = vmatpush3.bf16.msra.mxu1 %v7561_v40  ;;  %7069 = vmatprep.mubr.msk.f32.mxu1 %vm189_vm2, %v8074_v47  ;;  %v6404_v40 = vld [vmem:[%s8926_s7 + $0x60] sm:$0xff] }
 0x75f   :  { %7566 = vmatprep.subr.bf16.mxu1 %v7565_v43  ;;  %v7585_v42 = vpack.c.bf16 %v6405_v41, %v6404_v40  ;;  %v6421_v40 = vld [vmem:[%s8929_s10] ss:$0 sm:$0xff] }
 0x762   :  { %7568 = vmatpush3.bf16.msra.mxu1 %v7565_v43  ;;  %v6406_v43 = vld [vmem:[%s8926_s7 + $0x70] sm:$0xff] }
 0x763   :  { %7077 = vmatprep.subr.mxu1 %v7871_v56 }
 0x765   :  { %7070 = vmatmul.mubr.msk.f32.vlgmr.msra.gmra.mrb[22].mxu1 %vm189_vm2, %v8076_v48 }
 0x766   :  { %7079 = vmatprep.mubr.msk.f32.mxu1 %vm7872_vm3, %v7871_v56 }
 0x824   :  { %v1272_v46 = vpop.f32.mrb[8].mxu0 }
 0x825   :  { %v7023_v51 = vpop.f32.mrb[9].mxu0  ;;  %7031 = vmatprep.mubr.msk.f32.mxu0 %vm443_vm4, %v1272_v46  ;;  %v6385_v46 = vld [vmem:[%s8928_s9 + $0x10] sm:$0xff] }
 0x826   :  { %v7577_v51 = vpack.c.bf16 %v6397_v50, %v6396_v49 }
 0x828   :  { %v1345_v55 = vpop.f32.mrb[18].mxu1 }
 0x829   :  { %v7028_v57 = vpop.f32.mrb[19].mxu1  ;;  %7032 = vmatmul.mubr.msk.f32.vlgmr.msra.gmra.mrb[10].mxu0 %vm443_vm4, %v1345_v55  ;;  %v6398_v55 = vld [vmem:[%s8958_s3 + $0x70] sm:$0xff] }
 0x82a   :  { %7035 = vmatpush3.msra.mxu0 %v764_v45  ;;  %7036 = vmatprep.mubr.msk.f32.mxu0 %vm443_vm4, %v8189_v54  ;;  %v7589_v45 = vpack.c.bf16 %v6407_v44, %v6406_v43  ;;  %v6399_v57 = vld [vmem:[%s8958_s3 + $0x78] sm:$0xff] }
 0x82b   :  { %7554 = vmatprep.subr.bf16.mxu0 %v7553_v53  ;;  %v7581_v59 = vpack.c.bf16 %v6399_v57, %v6398_v55 }
 0x830   :  { %v7049_v61 = vpop.f32.mrb[20].mxu1 }
 0x831   :  { %v1592_v62 = vpop.f32.mrb[21].mxu1  ;;  %7037 = vmatmul.mubr.msk.f32.vlgmr.msra.gmra.mrb[10].mxu0 %vm443_vm4, %v8187_v52  ;;  %v6368_v52 = vld [vmem:[%s8925_s6 + $0x2] ss:$0 sm:$0xff]  ;;  %v1598_v6 = vadd.f32 %v7049_v61, %v6360_v1 }
 0x832   :  { %7556 = vmatpush3.bf16.msra.mxu0 %v7553_v53  ;;  %7058 = vmatprep.mubr.msk.f32.mxu0 %vm189_vm2, %v8074_v47  ;;  %v1593_v7 = vadd.f32 %v6360_v1, %v1592_v62 }
 0x833   :  { %7558 = vmatprep.subr.bf16.mxu0 %v7557_v60 }
 0x836   :  { %7560 = vmatpush3.bf16.msra.mxu0 %v7557_v60 }
 0x837   :  { %7072 = vmatprep.subr.mxu0 %v7871_v56 }
 0x838   :  { %v7071_v54 = vpop.f32.mrb[22].mxu1 }
 0x839   :  { %7059 = vmatmul.mubr.msk.f32.vlgmr.msra.gmra.mrb[12].mxu0 %vm189_vm2, %v8076_v48  ;;  %v1768_v63 = vpop.f32.mrb[23].mxu1  ;;  %v1774_v8 = vadd.f32 %v7071_v54, %v6376_v4 }
 0x83a   :  { %7074 = vmatprep.mubr.msk.f32.mxu0 %vm7872_vm3, %v7871_v56  ;;  %v1769_v9 = vadd.f32 %v6376_v4, %v1768_v63  ;;  %v6409_v63 = vld [vmem:[%s8927_s8 + $0x3] ss:$0 sm:$0xff] }
 0x90c   :  { %v7060_v0 = vpop.f32.mrb[12].mxu0 }
 0x90d   :  { %v1686_v2 = vadd.f32 %v7060_v0, %v6368_v52  ;;  %v1680_v3 = vpop.f32.mrb[13].mxu0 }
 0x90e   :  { %v1681_v5 = vadd.f32 %v6368_v52, %v1680_v3  ;;  %v6401_v3 = vld [vmem:[%s8925_s6 + $0x3] ss:$0 sm:$0xff] }
 0x90f   :  { %7078 = vmatpush3.xpose.msk.msra.mxu1 %vm443_vm4, %v1686_v2 }
 0x910   :  { %7073 = vmatpush3.xpose.msk.msra.mxu0 %vm443_vm4, %v1681_v5  ;;  %7087 = vmatprep.subr.mxu1 %v7871_v56 }
 0x911   :  { %7082 = vmatprep.subr.mxu0 %v7871_v56 }
 0x912   :  { %7080 = vmatmul.mubr.msk.f32.vlgmr.msra.gmra.mrb[24].mxu1 %vm443_vm4, %v1598_v6  ;;  %v6393_v6 = vld [vmem:[%s8960_s1 + $0x3] ss:$0 sm:$0xff] }
 0x913   :  { %7075 = vmatmul.mubr.msk.f32.vlgmr.msra.gmra.mrb[14].mxu0 %vm443_vm4, %v1593_v7  ;;  %7088 = vmatpush3.msra.mxu1 %v1774_v8 }
 0x914   :  { %7083 = vmatpush3.msra.mxu0 %v1769_v9  ;;  %7084 = vmatprep.mubr.msk.f32.mxu0 %vm7872_vm3, %v7871_v56 }
 0x915   :  { %7089 = vmatprep.mubr.msk.f32.mxu1 %vm7872_vm3, %v7871_v56  ;;  %7570 = vmatprep.subr.bf16.mxu1 %v7569_v28 }
 0x916   :  { %7092 = vmatprep.subr.mxu0 %v6385_v46 }
 0x9e5   :  { %v1925_v10 = vpop.f32.mrb[24].mxu1 }
 0x9e6   :  { %v1849_v11 = vpop.f32.mrb[14].mxu0  ;;  %v7081_v12 = vpop.f32.mrb[25].mxu1  ;;  %v1932_v15 = vsel %vm443_vm4, %v1925_v10, -inf }
 0x9e7   :  { %v7076_v13 = vpop.f32.mrb[15].mxu0  ;;  %v1929_v14 = vsel %vm443_vm4, %v1849_v11, -inf }
 0x9e8   :  { %1930 = vmax.xlane.f32.xlu1 %v1929_v14 }
 0x9ec   :  { %1933 = vmax.xlane.f32.xlu1 %v1932_v15 }
 0xa75   :  { %v1931_v16 = vpop.xlane.xlu1 %1930 }
 0xa76   :  { %v1935_v17 = vsub.f32 %v1849_v11, %v1931_v16 }
 0xa78   :  { %v1937_v18 = vmul.f32 1.442695, %v1935_v17 }
 0xa79   :  { %v1934_v19 = vpop.xlane.xlu1 %1933 }
 0xa7a   :  { %7781 = vpow2.f32 %v1937_v18  ;;  %v1936_v20 = vsub.f32 %v1925_v10, %v1934_v19 }
 0xa7c   :  { %v1939_v21 = vmul.f32 1.442695, %v1936_v20 }
 0xa7e   :  { %7783 = vpow2.f32 %v1939_v21 }
 0xa84   :  { %v7782_v22 = vpop.eup %7781 }
 0xa85   :  { %v1941_v23 = vsel %vm443_vm4, %v7782_v22, 0.0 }
 0xa86   :  { %1942 = vadd.xlane.f32.xlu1 %v1941_v23 }
 0xa88   :  { %v7784_v24 = vpop.eup %7783 }
 0xa89   :  { %v1944_v25 = vsel %vm443_vm4, %v7784_v24, 0.0 }
 0xa8a   :  { %1945 = vadd.xlane.f32.xlu0 %v1944_v25 }
 0xb13   :  { %v1943_v29 = vpop.xlane.xlu1 %1942 }
 0xb14   :  { %7785 = vrcp.f32 %v1943_v29 }
 0xb17   :  { %v1946_v32 = vpop.xlane.xlu0 %1945 }
 0xb18   :  { %7787 = vrcp.f32 %v1946_v32 }
 0xb1e   :  { %v7786_v33 = vpop.eup %7785 }
 0xb1f   :  { %v1948_v34 = vmul.f32 %v7786_v33, %v7782_v22 }
 0xb21   :  { %7085 = vmatmul.mubr.msk.f32.vlgmr.msra.gmra.mrb[16].mxu0 %vm443_vm4, %v1948_v34 }
 0xb22   :  { %v7788_v37 = vpop.eup %7787  ;;  %7093 = vmatpush3.msra.mxu0 %v6385_v46 }
 0xb23   :  { %v1950_v38 = vmul.f32 %v7788_v37, %v7784_v24  ;;  %7578 = vmatprep.subr.bf16.mxu0 %v7577_v51 }
 0xb25   :  { %7090 = vmatmul.mubr.msk.f32.vlgmr.msra.gmra.mrb[26].mxu1 %vm443_vm4, %v1950_v38 }
 0xb26   :  { %7572 = vmatpush3.bf16.msra.mxu1 %v7569_v28  ;;  %7105 = vmatprep.mubr.msk.f32.mxu1 %vm189_vm2, %v8074_v47 }
 0xb27   :  { %7574 = vmatprep.subr.bf16.mxu1 %v7573_v39 }
 0xb2a   :  { %7576 = vmatpush3.bf16.msra.mxu1 %v7573_v39 }
 0xb2b   :  { %7586 = vmatprep.subr.bf16.mxu1 %v7585_v42 }
 0xb2d   :  { %7106 = vmatmul.mubr.msk.f32.vlgmr.msra.gmra.mrb[28].mxu1 %vm189_vm2, %v8076_v48 }
 0xb2e   :  { %7588 = vmatpush3.bf16.msra.mxu1 %v7585_v42  ;;  %7127 = vmatprep.mubr.msk.f32.mxu1 %vm189_vm2, %v8074_v47 }
 0xb2f   :  { %7590 = vmatprep.subr.bf16.mxu1 %v7589_v45 }
 0xb32   :  { %7592 = vmatpush3.bf16.msra.mxu1 %v7589_v45 }
 0xb33   :  { %7140 = vmatprep.subr.mxu1 %v7871_v56 }
 0xb35   :  { %7128 = vmatmul.mubr.msk.f32.vlgmr.msra.gmra.mrb[30].mxu1 %vm189_vm2, %v8076_v48 }
 0xb36   :  { %7142 = vmatprep.mubr.msk.f32.mxu1 %vm7872_vm3, %v7871_v56 }
 0xbf4   :  { %v2020_v53 = vpop.f32.mrb[16].mxu0 }
 0xbf5   :  { %v7086_v58 = vpop.f32.mrb[17].mxu0  ;;  %7094 = vmatprep.mubr.msk.f32.mxu0 %vm443_vm4, %v2020_v53 }
 0xbf8   :  { %v2093_v60 = vpop.f32.mrb[26].mxu1 }
 0xbf9   :  { %v7091_v61 = vpop.f32.mrb[27].mxu1  ;;  %7095 = vmatmul.mubr.msk.f32.vlgmr.msra.gmra.mrb[10].mxu0 %vm443_vm4, %v2093_v60 }
 0xbfa   :  { %7580 = vmatpush3.bf16.msra.mxu0 %v7577_v51  ;;  %7116 = vmatprep.mubr.msk.f32.mxu0 %vm189_vm2, %v8074_v47 }
 0xbfb   :  { %7582 = vmatprep.subr.bf16.mxu0 %v7581_v59 }
 0xbfe   :  { %7584 = vmatpush3.bf16.msra.mxu0 %v7581_v59 }
 0xbff   :  { %7130 = vmatprep.subr.mxu0 %v7871_v56 }
 0xc00   :  { %v7107_v62 = vpop.f32.mrb[28].mxu1 }
 0xc01   :  { %v2261_v54 = vpop.f32.mrb[29].mxu1  ;;  %7117 = vmatmul.mubr.msk.f32.vlgmr.msra.gmra.mrb[18].mxu0 %vm189_vm2, %v8076_v48  ;;  %v2267_v10 = vadd.f32 %v7107_v62, %v6393_v6 }
 0xc02   :  { %7132 = vmatprep.mubr.msk.f32.mxu0 %vm7872_vm3, %v7871_v56  ;;  %v2262_v8 = vadd.f32 %v6393_v6, %v2261_v54  ;;  %v2908_v54 = vld [vmem:[%s8932_s13 + $0x8] sm:$0xff]  ;;  %v3004_v6 = vld [vmem:[%s8934_s15 + $0x18] sm:$0xff] }
 0xc08   :  { %v7129_v52 = vpop.f32.mrb[30].mxu1 }
 0xc09   :  { %v2443_v0 = vadd.f32 %v7129_v52, %v6409_v63  ;;  %v2437_v1 = vpop.f32.mrb[31].mxu1  ;;  %v2909_v52 = vld [vmem:[%s8932_s13 + $0x10] sm:$0xff] }
 0xc0a   :  { %v2438_v2 = vadd.f32 %v6409_v63, %v2437_v1 }
 0xc0c   :  { %7141 = vmatpush3.msra.mxu1 %v2438_v2  ;;  %v3001_v2 = vld [vmem:[%s8934_s15] sm:$0xff] }
 0xcd4   :  { %v7118_v4 = vpop.f32.mrb[18].mxu0 }
 0xcd5   :  { %v2349_v5 = vpop.f32.mrb[19].mxu0  ;;  %v2355_v9 = vadd.f32 %v7118_v4, %v6401_v3  ;;  %v3003_v4 = vld [vmem:[%s8934_s15 + $0x10] sm:$0xff] }
 0xcd6   :  { %v2350_v7 = vadd.f32 %v6401_v3, %v2349_v5  ;;  %v3002_v3 = vld [vmem:[%s8934_s15 + $0x8] sm:$0xff] }
 0xcd7   :  { %v7601_v5 = vpack.c.bf16 %v3002_v3, %v3001_v2  ;;  %v6435_v2 = vld [vmem:[%s8957_s4 + $0x98] sm:$0xff] }
 0xcd8   :  { %7131 = vmatpush3.xpose.msk.msra.mxu0 %vm443_vm4, %v2350_v7  ;;  %v7605_v7 = vpack.c.bf16 %v3004_v6, %v3003_v4  ;;  %v6450_v4 = vld [vmem:[%s8926_s7 + $0x90] sm:$0xff] }
 0xcd9   :  { %7135 = vmatprep.subr.mxu0 %v7871_v56 }
 0xcdb   :  { %7133 = vmatmul.mubr.msk.f32.vlgmr.msra.gmra.mrb[20].mxu0 %vm443_vm4, %v2262_v8  ;;  %v3005_v8 = vld [vmem:[%s8934_s15 + $0x20] sm:$0xff] }
 0xcdc   :  { %7136 = vmatpush3.xpose.msk.msra.mxu0 %vm443_vm4, %v2355_v9  ;;  %7137 = vmatprep.mubr.msk.f32.mxu0 %vm7872_vm3, %v7871_v56  ;;  %v3006_v9 = vld [vmem:[%s8934_s15 + $0x28] sm:$0xff] }
 0xcdd   :  { %7145 = vmatprep.subr.mxu0 %v7871_v56 }
 0xcdf   :  { %7138 = vmatmul.mubr.msk.f32.vlgmr.msra.gmra.mrb[22].mxu0 %vm443_vm4, %v2267_v10  ;;  %v7609_v10 = vpack.c.bf16 %v3006_v9, %v3005_v8  ;;  %v6441_v8 = vld [vmem:[%s8958_s3 + $0x88] sm:$0xff] }
 0xce0   :  { %7146 = vmatpush3.msra.mxu0 %v2443_v0  ;;  %7147 = vmatprep.mubr.msk.f32.mxu0 %vm7872_vm3, %v7871_v56  ;;  %v2910_v0 = vld [vmem:[%s8932_s13 + $0x18] sm:$0xff] }
 0xce1   :  { %7150 = vmatprep.subr.mxu0 %v6418_v35  ;;  %v7597_v1 = vpack.c.bf16 %v2910_v0, %v2909_v52  ;;  %v6449_v52 = vld [vmem:[%s8926_s7 + $0x88] sm:$0xff] }
 0xdae   :  { %v2518_v11 = vpop.f32.mrb[20].mxu0 }
 0xdaf   :  { %v7134_v12 = vpop.f32.mrb[21].mxu0  ;;  %v2598_v13 = vsel %vm443_vm4, %v2518_v11, -inf }
 0xdb0   :  { %2599 = vmax.xlane.f32.xlu1 %v2598_v13 }
 0xdb2   :  { %v2594_v14 = vpop.f32.mrb[22].mxu0 }
 0xdb3   :  { %v7139_v15 = vpop.f32.mrb[23].mxu0  ;;  %v2601_v16 = vsel %vm443_vm4, %v2594_v14, -inf }
 0xdb4   :  { %2602 = vmax.xlane.f32.xlu0 %v2601_v16 }
 0xe3d   :  { %v2600_v17 = vpop.xlane.xlu1 %2599 }
 0xe3e   :  { %v2604_v18 = vsub.f32 %v2518_v11, %v2600_v17 }
 0xe40   :  { %v2606_v19 = vmul.f32 1.442695, %v2604_v18  ;;  %v6422_v18 = vld [vmem:[%s8930_s11] ss:$0 sm:$0xff] }
 0xe41   :  { %v2603_v20 = vpop.xlane.xlu0 %2602 }
 0xe42   :  { %7789 = vpow2.f32 %v2606_v19  ;;  %v2605_v21 = vsub.f32 %v2594_v14, %v2603_v20 }
 0xe44   :  { %v2608_v22 = vmul.f32 1.442695, %v2605_v21 }
 0xe46   :  { %7791 = vpow2.f32 %v2608_v22  ;;  %v6423_v22 = vld [vmem:[%s8931_s12] ss:$0 sm:$0xff] }
 0xe4c   :  { %v7790_v23 = vpop.eup %7789 }
 0xe4d   :  { %v2610_v24 = vsel %vm443_vm4, %v7790_v23, 0.0 }
 0xe4e   :  { %2611 = vadd.xlane.f32.xlu1 %v2610_v24 }
 0xe50   :  { %v7792_v25 = vpop.eup %7791 }
 0xe51   :  { %v2613_v26 = vsel %vm443_vm4, %v7792_v25, 0.0 }
 0xe52   :  { %2614 = vadd.xlane.f32.xlu0 %v2613_v26 }
 0xedb   :  { %v2612_v27 = vpop.xlane.xlu1 %2611 }
 0xedc   :  { %7793 = vrcp.f32 %v2612_v27  ;;  %v3007_v27 = vld [vmem:[%s8934_s15 + $0x30] sm:$0xff] }
 0xedf   :  { %v2615_v28 = vpop.xlane.xlu0 %2614 }
 0xee0   :  { %7795 = vrcp.f32 %v2615_v28  ;;  %v3008_v28 = vld [vmem:[%s8934_s15 + $0x38] sm:$0xff] }
 0xee6   :  { %v7794_v29 = vpop.eup %7793 }
 0xee7   :  { %v2617_v32 = vmul.f32 %v7794_v29, %v7790_v23  ;;  %v7613_v29 = vpack.c.bf16 %v3008_v28, %v3007_v27 }
 0xee9   :  { %7143 = vmatmul.mubr.msk.f32.vlgmr.msra.gmra.mrb[32].mxu1 %vm443_vm4, %v2617_v32  ;;  %v6424_v32 = vld [vmem:[%s8933_s14] ss:$0 sm:$0xff] }
 0xeea   :  { %v7796_v33 = vpop.eup %7795 }
 0xeeb   :  { %v2619_v34 = vmul.f32 %v7796_v33, %v7792_v25 }
 0xeed   :  { %7148 = vmatmul.mubr.msk.f32.vlgmr.msra.gmra.mrb[24].mxu0 %vm443_vm4, %v2619_v34 }
 0xeee   :  { %7151 = vmatpush3.msra.mxu0 %v6418_v35 }
 0xeef   :  { %7602 = vmatprep.subr.bf16.mxu0 %v7601_v5 }
 0xfbc   :  { %v2689_v36 = vpop.f32.mrb[32].mxu1 }
 0xfbd   :  { %v7144_v37 = vpop.f32.mrb[33].mxu1  ;;  %7152 = vmatprep.mubr.msk.f32.mxu0 %vm443_vm4, %v2689_v36 }
 0xfc0   :  { %v2762_v38 = vpop.f32.mrb[24].mxu0 }
 0xfc1   :  { %v7149_v39 = vpop.f32.mrb[25].mxu0  ;;  %7153 = vmatmul.mubr.msk.f32.vlgmr.msra.gmra.mrb[10].mxu0 %vm443_vm4, %v2762_v38 }
 0xfc2   :  { %7604 = vmatpush3.bf16.msra.mxu0 %v7601_v5  ;;  %v6427_v39 = vld [vmem:[%s8961_s28] ss:$0 sm:$0xff]  ;;  %v6451_v5 = vld [vmem:[%s8926_s7 + $0x98] sm:$0xff] }
 0xfc3   :  { %7606 = vmatprep.subr.bf16.mxu0 %v7605_v7  ;;  %v7637_v6 = vpack.c.bf16 %v6451_v5, %v6450_v4 }
 0xfc6   :  { %7608 = vmatpush3.bf16.msra.mxu0 %v7605_v7  ;;  %v6440_v7 = vld [vmem:[%s8958_s3 + $0x80] sm:$0xff] }
 0xfc7   :  { %7610 = vmatprep.subr.bf16.mxu0 %v7609_v10  ;;  %v7625_v9 = vpack.c.bf16 %v6441_v8, %v6440_v7  ;;  %v6465_v7 = vld [vmem:[%s8957_s4 + $0xb0] sm:$0xff]  ;;  %v6466_v8 = vld [vmem:[%s8957_s4 + $0xb8] sm:$0xff] }
 0xfca   :  { %7612 = vmatpush3.bf16.msra.mxu0 %v7609_v10 }
 0xfcb   :  { %7614 = vmatprep.subr.bf16.mxu0 %v7613_v29 }
 0xfce   :  { %7616 = vmatpush3.bf16.msra.mxu0 %v7613_v29  ;;  %v6453_v29 = vld [vmem:[%s8927_s8 + $0x4] ss:$0 sm:$0xff] }
0x1094   :  { %v7154_v41 = vpop.f32.mrb[10].mxu0 }
0x1095   :  { %v2859_v42 = vadd.f32 %v7154_v41, %v6421_v40  ;;  %v2840_v43 = vpop.f32.mrb[11].mxu0 }
0x1096   :  { %v2858_v44 = vadd.f32 %v6421_v40, %v2840_v43 }
0x1097   :  { %v2861_v45 = vadd.f32 %v2859_v42, %v8076_v48 }
0x1098   :  { %v2860_v46 = vadd.f32 %v2858_v44, %v8074_v47  ;;  %v2907_v47 = vld [vmem:[%s8932_s13] sm:$0xff] }
0x1099   :  { %v2867_v49 = vsel %vm189_vm2, %v2861_v45, 0.0  ;;  %v7593_v63 = vpack.c.bf16 %v2908_v54, %v2907_v47  ;;  %v6433_v47 = vld [vmem:[%s8957_s4 + $0x88] sm:$0xff] }
0x109a   :  { %2868 = vadd.xlane.f32.xlu0 %v2867_v49  ;;  %v2864_v50 = vsel %vm189_vm2, %v2860_v46, 0.0 }
0x109b   :  { %2865 = vadd.xlane.f32.xlu1 %v2864_v50  ;;  %7594 = vmatprep.subr.bf16.mxu1 %v7593_v63 }
0x109c   :  { %7596 = vmatpush3.bf16.msra.mxu1 %v7593_v63  ;;  %v6448_v63 = vld [vmem:[%s8926_s7 + $0x80] sm:$0xff] }
0x109d   :  { %7598 = vmatprep.subr.bf16.mxu1 %v7597_v1  ;;  %v7633_v0 = vpack.c.bf16 %v6449_v52, %v6448_v63  ;;  %v6463_v52 = vld [vmem:[%s8957_s4 + $0xa0] sm:$0xff] }
0x109f   :  { %7634 = vmatprep.subr.bf16.mxu0 %v7633_v0 }
0x10a0   :  { %7600 = vmatpush3.bf16.msra.mxu1 %v7597_v1  ;;  %v6434_v1 = vld [vmem:[%s8957_s4 + $0x90] sm:$0xff] }
0x10a1   :  { %v7621_v3 = vpack.c.bf16 %v6435_v2, %v6434_v1  ;;  %v6471_v2 = vld [vmem:[%s8958_s3 + $0xa0] sm:$0xff] }
0x1127   :  { %v2869_v51 = vpop.xlane.xlu0 %2868 }
0x1128   :  { %v2872_v53 = vmul.f32 0.03125, %v2869_v51  ;;  %v2866_v55 = vpop.xlane.xlu1 %2865 }
0x1129   :  { %v2871_v57 = vmul.f32 0.03125, %v2866_v55 }
0x112a   :  { %v2874_v58 = vsub.f32 %v2861_v45, %v2872_v53 }
0x112b   :  { %v2873_v59 = vsub.f32 %v2860_v46, %v2871_v57 }
0x112c   :  { %v2876_v60 = vmul.f32 %v2874_v58, %v2874_v58 }
0x112d   :  { %v2875_v61 = vmul.f32 %v2873_v59, %v2873_v59 }
0x112e   :  { %v2880_v62 = vsel %vm189_vm2, %v2876_v60, 0.0 }
0x112f   :  { %2881 = vadd.xlane.f32.xlu0 %v2880_v62  ;;  %v2877_v48 = vsel %vm189_vm2, %v2875_v61, 0.0 }
0x1130   :  { %2878 = vadd.xlane.f32.xlu1 %v2877_v48  ;;  %v6432_v48 = vld [vmem:[%s8957_s4 + $0x80] sm:$0xff] }
0x1131   :  { %v7617_v54 = vpack.c.bf16 %v6433_v47, %v6432_v48 }
0x1133   :  { %7618 = vmatprep.subr.bf16.mxu1 %v7617_v54 }
0x11bc   :  { %v2882_v11 = vpop.xlane.xlu0 %2881 }
0x11bd   :  { %v2884_v12 = vmul.f32 0.03125, %v2882_v11  ;;  %v2879_v13 = vpop.xlane.xlu1 %2878 }
0x11be   :  { %v2883_v14 = vmul.f32 0.03125, %v2879_v13 }
0x11bf   :  { %v2886_v15 = vadd.f32 1e-05, %v2884_v12 }
0x11c0   :  { %v2885_v16 = vadd.f32 1e-05, %v2883_v14 }
0x11c1   :  { %7797 = vrsqrt.f32 %v2886_v15 }
0x11c2   :  { %7799 = vrsqrt.f32 %v2885_v16 }
0x11cb   :  { %v7798_v17 = vpop.eup %7797 }
0x11cc   :  { %v7800_v19 = vpop.eup %7799  ;;  %v2890_v20 = vmul.f32 %v7798_v17, %v2874_v58  ;;  %v6430_v17 = vld [vmem:[%s8936_s17] ss:$0 sm:$0xff] }
0x11cd   :  { %v2889_v21 = vmul.f32 %v7800_v19, %v2873_v59 }
0x11ce   :  { %v2898_v23 = vmul.f32 %v6422_v18, %v2890_v20 }
0x11cf   :  { %v2897_v24 = vmul.f32 %v6422_v18, %v2889_v21  ;;  %v6431_v21 = vld [vmem:[%s8937_s18] ss:$0 sm:$0xff] }
0x11d0   :  { %v2906_v26 = vadd.f32 %v6423_v22, %v2898_v23 }
0x11d1   :  { %v2905_v25 = vadd.f32 %v6423_v22, %v2897_v24  ;;  %v6442_v24 = vld [vmem:[%s8958_s3 + $0x90] sm:$0xff] }
0x11d3   :  { %7163 = vmatprep.mubr.msk.f32.mxu1 %vm189_vm2, %v2905_v25 }
0x11d4   :  { %7164 = vmatmul.mubr.msk.f32.vlgmr.msra.gmra.mrb[34].mxu1 %vm189_vm2, %v2906_v26 }
0x11d5   :  { %7620 = vmatpush3.bf16.msra.mxu1 %v7617_v54 }
0x11d6   :  { %7622 = vmatprep.subr.bf16.mxu1 %v7621_v3 }
0x11d9   :  { %7624 = vmatpush3.bf16.msra.mxu1 %v7621_v3  ;;  %v6472_v3 = vld [vmem:[%s8958_s3 + $0xa8] sm:$0xff] }
0x11da   :  { %7626 = vmatprep.subr.bf16.mxu1 %v7625_v9  ;;  %v7649_v4 = vpack.c.bf16 %v6472_v3, %v6471_v2 }
0x12a7   :  { %v7165_v33 = vpop.f32.mrb[34].mxu1 }
0x12a8   :  { %v2996_v34 = vadd.f32 %v7165_v33, %v6424_v32  ;;  %v2990_v35 = vpop.f32.mrb[35].mxu1 }
0x12a9   :  { %v2991_v36 = vadd.f32 %v6424_v32, %v2990_v35 }
0x12aa   :  { %v3000_v38 = vmax.f32 %v2996_v34, 0.0 }
0x12ab   :  { %v2999_v37 = vmax.f32 %v2991_v36, 0.0 }
0x12ad   :  { %7182 = vmatprep.mubr.msk.f32.mxu0 %vm3016_vm5, %v2999_v37  ;;  %v6445_v37 = vld [vmem:[%s8925_s6 + $0x4] ss:$0 sm:$0xff] }
0x12ae   :  { %7183 = vmatmul.mubr.msk.f32.vlgmr.msra.gmra.mrb[26].mxu0 %vm3016_vm5, %v3000_v38 }
0x12af   :  { %7636 = vmatpush3.bf16.msra.mxu0 %v7633_v0  ;;  %v6464_v0 = vld [vmem:[%s8957_s4 + $0xa8] sm:$0xff] }
0x12b0   :  { %7638 = vmatprep.subr.bf16.mxu0 %v7637_v6  ;;  %v7641_v1 = vpack.c.bf16 %v6464_v0, %v6463_v52  ;;  %v6498_v52 = vld [vmem:[%s8957_s4 + $0xc0] sm:$0xff]  ;;  %v6499_v0 = vld [vmem:[%s8957_s4 + $0xc8] sm:$0xff] }
0x12b3   :  { %7640 = vmatpush3.bf16.msra.mxu0 %v7637_v6 }
0x12b4   :  { %7228 = vmatprep.subr.mxu0 %v7871_v56 }
0x1381   :  { %v7184_v40 = vpop.f32.mrb[26].mxu0 }
0x1382   :  { %v3095_v41 = vadd.f32 %v7184_v40, %v6427_v39  ;;  %v3089_v42 = vpop.f32.mrb[27].mxu0  ;;  %v6437_v40 = vld [vmem:[%s8960_s1 + $0x4] ss:$0 sm:$0xff] }
0x1383   :  { %v3090_v43 = vadd.f32 %v6427_v39, %v3089_v42 }
0x1384   :  { %v3099_v44 = vadd.f32 %v3095_v41, %v2906_v26 }
0x1385   :  { %v3098_v45 = vadd.f32 %v3090_v43, %v2905_v25  ;;  %v6443_v25 = vld [vmem:[%s8958_s3 + $0x98] sm:$0xff] }
0x1386   :  { %v3105_v46 = vsel %vm189_vm2, %v3099_v44, 0.0  ;;  %v7629_v28 = vpack.c.bf16 %v6443_v25, %v6442_v24 }
0x1387   :  { %3106 = vadd.xlane.f32.xlu0 %v3105_v46  ;;  %v3102_v49 = vsel %vm189_vm2, %v3098_v45, 0.0 }
0x1388   :  { %3103 = vadd.xlane.f32.xlu1 %v3102_v49 }
0x1414   :  { %v3107_v50 = vpop.xlane.xlu0 %3106 }
0x1415   :  { %v3109_v51 = vmul.f32 0.03125, %v3107_v50  ;;  %v3104_v53 = vpop.xlane.xlu1 %3103 }
0x1416   :  { %v3108_v55 = vmul.f32 0.03125, %v3104_v53 }
0x1417   :  { %v3111_v57 = vsub.f32 %v3099_v44, %v3109_v51 }
0x1418   :  { %v3110_v58 = vsub.f32 %v3098_v45, %v3108_v55 }
0x1419   :  { %v3113_v59 = vmul.f32 %v3111_v57, %v3111_v57 }
0x141a   :  { %v3112_v60 = vmul.f32 %v3110_v58, %v3110_v58 }
0x141b   :  { %v3117_v61 = vsel %vm189_vm2, %v3113_v59, 0.0 }
0x141c   :  { %3118 = vadd.xlane.f32.xlu0 %v3117_v61  ;;  %v3114_v62 = vsel %vm189_vm2, %v3112_v60, 0.0 }
0x141d   :  { %3115 = vadd.xlane.f32.xlu1 %v3114_v62 }
0x14a9   :  { %v3119_v10 = vpop.xlane.xlu0 %3118 }
0x14aa   :  { %v3121_v11 = vmul.f32 0.03125, %v3119_v10  ;;  %v3116_v12 = vpop.xlane.xlu1 %3115 }
0x14ab   :  { %v3120_v13 = vmul.f32 0.03125, %v3116_v12  ;;  %v6473_v12 = vld [vmem:[%s8958_s3 + $0xb0] sm:$0xff] }
0x14ac   :  { %v3123_v14 = vadd.f32 1e-05, %v3121_v11  ;;  %v7645_v11 = vpack.c.bf16 %v6466_v8, %v6465_v7  ;;  %v6501_v7 = vld [vmem:[%s8957_s4 + $0xd8] sm:$0xff] }
0x14ad   :  { %v3122_v15 = vadd.f32 1e-05, %v3120_v13  ;;  %v6474_v13 = vld [vmem:[%s8958_s3 + $0xb8] sm:$0xff] }
0x14ae   :  { %7801 = vrsqrt.f32 %v3123_v14  ;;  %v6479_v14 = vld [vmem:[%s8926_s7 + $0xa0] sm:$0xff] }
0x14af   :  { %7803 = vrsqrt.f32 %v3122_v15  ;;  %v6480_v15 = vld [vmem:[%s8926_s7 + $0xa8] sm:$0xff] }
0x14b8   :  { %v7802_v16 = vpop.eup %7801 }
0x14b9   :  { %v7804_v18 = vpop.eup %7803  ;;  %v3127_v19 = vmul.f32 %v7802_v16, %v3111_v57 }
0x14ba   :  { %v3126_v20 = vmul.f32 %v7804_v18, %v3110_v58  ;;  %v7653_v18 = vpack.c.bf16 %v6474_v13, %v6473_v12  ;;  %v6515_v12 = vld [vmem:[%s8926_s7 + $0xc8] sm:$0xff] }
0x14bb   :  { %v3135_v22 = vmul.f32 %v6430_v17, %v3127_v19  ;;  %v7657_v19 = vpack.c.bf16 %v6480_v15, %v6479_v14  ;;  %v6516_v14 = vld [vmem:[%s8926_s7 + $0xd0] sm:$0xff]  ;;  %v6517_v15 = vld [vmem:[%s8926_s7 + $0xd8] sm:$0xff] }
0x14bc   :  { %v3134_v23 = vmul.f32 %v6430_v17, %v3126_v20  ;;  %v6481_v20 = vld [vmem:[%s8926_s7 + $0xb0] sm:$0xff] }
0x14bd   :  { %v8506_v27 = vadd.f32 %v6431_v21, %v3135_v22 }
0x14be   :  { %v8504_v26 = vadd.f32 %v6431_v21, %v3134_v23  ;;  %v6482_v21 = vld [vmem:[%s8926_s7 + $0xb8] sm:$0xff] }
0x14bf   :  { %v7661_v22 = vpack.c.bf16 %v6482_v21, %v6481_v20  ;;  %v6506_v20 = vld [vmem:[%s8958_s3 + $0xc0] sm:$0xff]  ;;  %v6507_v21 = vld [vmem:[%s8958_s3 + $0xc8] sm:$0xff] }
0x14c0   :  { %7193 = vmatprep.mubr.msk.f32.mxu1 %vm189_vm2, %v8504_v26  ;;  %7215 = vmatprep.mubr.msk.f32.mxu0 %vm189_vm2, %v8504_v26 }
0x14c1   :  { %7194 = vmatmul.mubr.msk.f32.vlgmr.msra.gmra.mrb[36].mxu1 %vm189_vm2, %v8506_v27  ;;  %7216 = vmatmul.mubr.msk.f32.vlgmr.msra.gmra.mrb[28].mxu0 %vm189_vm2, %v8506_v27 }
0x14c2   :  { %7628 = vmatpush3.bf16.msra.mxu1 %v7625_v9  ;;  %7204 = vmatprep.mubr.msk.f32.mxu1 %vm189_vm2, %v8504_v26 }
0x14c3   :  { %7630 = vmatprep.subr.bf16.mxu1 %v7629_v28  ;;  %7230 = vmatprep.mubr.msk.f32.mxu0 %vm7872_vm3, %v7871_v56 }
0x14c6   :  { %7632 = vmatpush3.bf16.msra.mxu1 %v7629_v28 }
0x14c7   :  { %7218 = vmatprep.subr.mxu1 %v7871_v56 }
0x14c9   :  { %7205 = vmatmul.mubr.msk.f32.vlgmr.msra.gmra.mrb[38].mxu1 %vm189_vm2, %v8506_v27 }
0x14ca   :  { %7220 = vmatprep.mubr.msk.f32.mxu1 %vm7872_vm3, %v7871_v56 }
0x1594   :  { %v7195_v32 = vpop.f32.mrb[36].mxu1  ;;  %v7217_v33 = vpop.f32.mrb[28].mxu0 }
0x1595   :  { %v3229_v34 = vpop.f32.mrb[37].mxu1  ;;  %v3405_v35 = vpop.f32.mrb[29].mxu0  ;;  %v3235_v44 = vadd.f32 %v7195_v32, %v6437_v40  ;;  %v3411_v45 = vadd.f32 %v7217_v33, %v6453_v29  ;;  %v6476_v33 = vld [vmem:[%s8925_s6 + $0x5] ss:$0 sm:$0xff] }
0x1596   :  { %v3406_v36 = vadd.f32 %v6453_v29, %v3405_v35  ;;  %v3230_v42 = vadd.f32 %v6437_v40, %v3229_v34 }
0x1598   :  { %7229 = vmatpush3.msra.mxu0 %v3406_v36  ;;  %v6468_v36 = vld [vmem:[%s8960_s1 + $0x5] ss:$0 sm:$0xff] }
0x1599   :  { %7642 = vmatprep.subr.bf16.mxu0 %v7641_v1 }
0x159c   :  { %v7206_v38 = vpop.f32.mrb[38].mxu1 }
0x159d   :  { %v3317_v39 = vpop.f32.mrb[39].mxu1  ;;  %v3323_v43 = vadd.f32 %v7206_v38, %v6445_v37  ;;  %v6484_v38 = vld [vmem:[%s8927_s8 + $0x5] ss:$0 sm:$0xff] }
0x159e   :  { %v3318_v41 = vadd.f32 %v6445_v37, %v3317_v39 }
0x15a0   :  { %7219 = vmatpush3.xpose.msk.msra.mxu1 %vm443_vm4, %v3318_v41 }
0x15a1   :  { %7223 = vmatprep.subr.mxu1 %v7871_v56 }
0x15a3   :  { %7221 = vmatmul.mubr.msk.f32.vlgmr.msra.gmra.mrb[40].mxu1 %vm443_vm4, %v3230_v42 }
0x15a4   :  { %7224 = vmatpush3.xpose.msk.msra.mxu1 %vm443_vm4, %v3323_v43  ;;  %7225 = vmatprep.mubr.msk.f32.mxu1 %vm7872_vm3, %v7871_v56 }
0x15a5   :  { %7233 = vmatprep.subr.mxu1 %v7871_v56 }
0x15a7   :  { %7226 = vmatmul.mubr.msk.f32.vlgmr.msra.gmra.mrb[42].mxu1 %vm443_vm4, %v3235_v44 }
0x15a8   :  { %7234 = vmatpush3.msra.mxu1 %v3411_v45  ;;  %7235 = vmatprep.mubr.msk.f32.mxu1 %vm7872_vm3, %v7871_v56 }
0x15a9   :  { %7650 = vmatprep.subr.bf16.mxu1 %v7649_v4 }
0x1676   :  { %v3486_v46 = vpop.f32.mrb[40].mxu1 }
0x1677   :  { %v7222_v49 = vpop.f32.mrb[41].mxu1  ;;  %v3566_v50 = vsel %vm443_vm4, %v3486_v46, -inf }
0x1678   :  { %3567 = vmax.xlane.f32.xlu0 %v3566_v50 }
0x167a   :  { %v3562_v51 = vpop.f32.mrb[42].mxu1 }
0x167b   :  { %v7227_v53 = vpop.f32.mrb[43].mxu1  ;;  %v3569_v55 = vsel %vm443_vm4, %v3562_v51, -inf }
0x167c   :  { %3570 = vmax.xlane.f32.xlu1 %v3569_v55 }
0x1705   :  { %v3568_v57 = vpop.xlane.xlu0 %3567 }
0x1706   :  { %v3572_v58 = vsub.f32 %v3486_v46, %v3568_v57 }
0x1708   :  { %v3574_v59 = vmul.f32 1.442695, %v3572_v58 }
0x1709   :  { %v3571_v60 = vpop.xlane.xlu1 %3570 }
0x170a   :  { %7805 = vpow2.f32 %v3574_v59  ;;  %v3573_v61 = vsub.f32 %v3562_v51, %v3571_v60 }
0x170c   :  { %v3576_v62 = vmul.f32 1.442695, %v3573_v61 }
0x170e   :  { %7807 = vpow2.f32 %v3576_v62 }
0x1714   :  { %v7806_v48 = vpop.eup %7805 }
0x1715   :  { %v3578_v47 = vsel %vm443_vm4, %v7806_v48, 0.0 }
0x1716   :  { %3579 = vadd.xlane.f32.xlu0 %v3578_v47 }
0x1718   :  { %v7808_v54 = vpop.eup %7807 }
0x1719   :  { %v3581_v63 = vsel %vm443_vm4, %v7808_v54, 0.0 }
0x171a   :  { %3582 = vadd.xlane.f32.xlu1 %v3581_v63 }
0x17a3   :  { %v3580_v5 = vpop.xlane.xlu0 %3579 }
0x17a4   :  { %7809 = vrcp.f32 %v3580_v5 }
0x17a7   :  { %v3583_v6 = vpop.xlane.xlu1 %3582 }
0x17a8   :  { %7811 = vrcp.f32 %v3583_v6  ;;  %v6500_v6 = vld [vmem:[%s8957_s4 + $0xd0] sm:$0xff] }
0x17ae   :  { %v7810_v9 = vpop.eup %7809 }
0x17af   :  { %v3585_v10 = vmul.f32 %v7810_v9, %v7806_v48 }
0x17b1   :  { %7231 = vmatmul.mubr.msk.f32.vlgmr.msra.gmra.mrb[30].mxu0 %vm443_vm4, %v3585_v10  ;;  %v7669_v10 = vpack.c.bf16 %v6501_v7, %v6500_v6  ;;  %v6533_v7 = vld [vmem:[%s8957_s4 + $0xf0] sm:$0xff] }
0x17b2   :  { %v7812_v16 = vpop.eup %7811  ;;  %7644 = vmatpush3.bf16.msra.mxu0 %v7641_v1  ;;  %7246 = vmatprep.mubr.msk.f32.mxu0 %vm189_vm2, %v8504_v26  ;;  %v7665_v1 = vpack.c.bf16 %v6499_v0, %v6498_v52 }
0x17b3   :  { %v3587_v17 = vmul.f32 %v7812_v16, %v7808_v54  ;;  %7646 = vmatprep.subr.bf16.mxu0 %v7645_v11  ;;  %v7685_v16 = vpack.c.bf16 %v6517_v15, %v6516_v14  ;;  %v6547_v14 = vld [vmem:[%s8926_s7 + $0xe0] sm:$0xff]  ;;  %v6548_v15 = vld [vmem:[%s8926_s7 + $0xe8] sm:$0xff] }
0x17b5   :  { %7236 = vmatmul.mubr.msk.f32.vlgmr.msra.gmra.mrb[44].mxu1 %vm443_vm4, %v3587_v17  ;;  %v6493_v17 = vld [vmem:[%s8928_s9 + $0x28] sm:$0xff] }
0x17b6   :  { %7648 = vmatpush3.bf16.msra.mxu0 %v7645_v11  ;;  %7652 = vmatpush3.bf16.msra.mxu1 %v7649_v4  ;;  %v6514_v11 = vld [vmem:[%s8926_s7 + $0xc0] sm:$0xff] }
0x17b7   :  { %7257 = vmatprep.mubr.msk.f32.mxu1 %vm189_vm2, %v8504_v26  ;;  %7654 = vmatprep.subr.bf16.mxu1 %v7653_v18  ;;  %v7681_v13 = vpack.c.bf16 %v6515_v12, %v6514_v11 }
0x17b8   :  { %7658 = vmatprep.subr.bf16.mxu0 %v7657_v19 }
0x17b9   :  { %7247 = vmatmul.mubr.msk.f32.vlgmr.msra.gmra.mrb[32].mxu0 %vm189_vm2, %v8506_v27 }
0x17ba   :  { %7656 = vmatpush3.bf16.msra.mxu1 %v7653_v18  ;;  %7660 = vmatpush3.bf16.msra.mxu0 %v7657_v19  ;;  %v6462_v18 = vld [vmem:[%s8928_s9 + $0x20] sm:$0xff] }
0x17bb   :  { %7268 = vmatprep.mubr.msk.f32.mxu0 %vm189_vm2, %v8504_v26  ;;  %7662 = vmatprep.subr.bf16.mxu0 %v7661_v22 }
0x17bc   :  { %7271 = vmatprep.subr.mxu1 %v7871_v56 }
0x17bd   :  { %7258 = vmatmul.mubr.msk.f32.vlgmr.msra.gmra.mrb[46].mxu1 %vm189_vm2, %v8506_v27 }
0x17be   :  { %7664 = vmatpush3.bf16.msra.mxu0 %v7661_v22  ;;  %7273 = vmatprep.mubr.msk.f32.mxu1 %vm7872_vm3, %v7871_v56 }
0x17bf   :  { %7281 = vmatprep.subr.mxu0 %v7871_v56 }
0x17c1   :  { %7269 = vmatmul.mubr.msk.f32.vlgmr.msra.gmra.mrb[34].mxu0 %vm189_vm2, %v8506_v27 }
0x17c2   :  { %7283 = vmatprep.mubr.msk.f32.mxu0 %vm7872_vm3, %v7871_v56 }
0x1884   :  { %v8604_v23 = vpop.f32.mrb[30].mxu0 }
0x1885   :  { %v7232_v24 = vpop.f32.mrb[31].mxu0 }
0x1886   :  { %v7673_v24 = vpack.c.bf16 %v6507_v21, %v6506_v20  ;;  %v6539_v20 = vld [vmem:[%s8958_s3 + $0xe0] sm:$0xff]  ;;  %v6540_v21 = vld [vmem:[%s8958_s3 + $0xe8] sm:$0xff] }
0x1888   :  { %v8606_v25 = vpop.f32.mrb[44].mxu1 }
0x1889   :  { %v7237_v28 = vpop.f32.mrb[45].mxu1 }
0x188c   :  { %v7248_v29 = vpop.f32.mrb[32].mxu0 }
0x188d   :  { %v3815_v32 = vpop.f32.mrb[33].mxu0  ;;  %v3821_v44 = vadd.f32 %v7248_v29, %v6468_v36 }
0x188e   :  { %v3816_v40 = vadd.f32 %v6468_v36, %v3815_v32  ;;  %v6508_v32 = vld [vmem:[%s8958_s3 + $0xd0] sm:$0xff] }
0x1890   :  { %v7259_v34 = vpop.f32.mrb[46].mxu1 }
0x1891   :  { %v3903_v35 = vpop.f32.mrb[47].mxu1  ;;  %v3909_v42 = vadd.f32 %v7259_v34, %v6476_v33 }
0x1892   :  { %v3904_v37 = vadd.f32 %v6476_v33, %v3903_v35  ;;  %v6509_v33 = vld [vmem:[%s8958_s3 + $0xd8] sm:$0xff] }
0x1893   :  { %v7677_v34 = vpack.c.bf16 %v6509_v33, %v6508_v32 }
0x1894   :  { %v7270_v39 = vpop.f32.mrb[34].mxu0  ;;  %7272 = vmatpush3.xpose.msk.msra.mxu1 %vm443_vm4, %v3904_v37 }
0x1895   :  { %v3991_v41 = vpop.f32.mrb[35].mxu0  ;;  %7276 = vmatprep.subr.mxu1 %v7871_v56  ;;  %v3997_v45 = vadd.f32 %v7270_v39, %v6484_v38  ;;  %v6503_v39 = vld [vmem:[%s8960_s1 + $0x6] ss:$0 sm:$0xff] }
0x1896   :  { %v3992_v43 = vadd.f32 %v6484_v38, %v3991_v41 }
0x1897   :  { %7274 = vmatmul.mubr.msk.f32.vlgmr.msra.gmra.mrb[48].mxu1 %vm443_vm4, %v3816_v40 }
0x1898   :  { %7277 = vmatpush3.xpose.msk.msra.mxu1 %vm443_vm4, %v3909_v42  ;;  %7282 = vmatpush3.msra.mxu0 %v3992_v43  ;;  %v6519_v42 = vld [vmem:[%s8927_s8 + $0x6] ss:$0 sm:$0xff] }
0x1899   :  { %7278 = vmatprep.mubr.msk.f32.mxu1 %vm7872_vm3, %v7871_v56  ;;  %7286 = vmatprep.subr.mxu1 %v7871_v56 }
0x189a   :  { %7291 = vmatprep.subr.mxu0 %v6493_v17 }
0x189b   :  { %7279 = vmatmul.mubr.msk.f32.vlgmr.msra.gmra.mrb[50].mxu1 %vm443_vm4, %v3821_v44 }
0x189c   :  { %7287 = vmatpush3.msra.mxu1 %v3997_v45  ;;  %7288 = vmatprep.mubr.msk.f32.mxu1 %vm7872_vm3, %v7871_v56 }
0x189d   :  { %7666 = vmatprep.subr.bf16.mxu1 %v7665_v1 }
0x196a   :  { %v4072_v46 = vpop.f32.mrb[48].mxu1 }
0x196b   :  { %v7275_v49 = vpop.f32.mrb[49].mxu1  ;;  %v4152_v50 = vsel %vm443_vm4, %v4072_v46, -inf }
0x196c   :  { %4153 = vmax.xlane.f32.xlu1 %v4152_v50 }
0x196e   :  { %v4148_v51 = vpop.f32.mrb[50].mxu1 }
0x196f   :  { %v7280_v53 = vpop.f32.mrb[51].mxu1  ;;  %v4155_v55 = vsel %vm443_vm4, %v4148_v51, -inf }
0x1970   :  { %4156 = vmax.xlane.f32.xlu0 %v4155_v55 }
0x19f9   :  { %v4154_v57 = vpop.xlane.xlu1 %4153 }
0x19fa   :  { %v4158_v58 = vsub.f32 %v4072_v46, %v4154_v57 }
0x19fc   :  { %v4160_v59 = vmul.f32 1.442695, %v4158_v58 }
0x19fd   :  { %v4157_v60 = vpop.xlane.xlu0 %4156 }
0x19fe   :  { %7813 = vpow2.f32 %v4160_v59  ;;  %v4159_v61 = vsub.f32 %v4148_v51, %v4157_v60 }
0x1a00   :  { %v4162_v62 = vmul.f32 1.442695, %v4159_v61 }
0x1a02   :  { %7815 = vpow2.f32 %v4162_v62 }
0x1a08   :  { %v7814_v48 = vpop.eup %7813 }
0x1a09   :  { %v4164_v47 = vsel %vm443_vm4, %v7814_v48, 0.0 }
0x1a0a   :  { %4165 = vadd.xlane.f32.xlu1 %v4164_v47 }
0x1a0c   :  { %v7816_v54 = vpop.eup %7815 }
0x1a0d   :  { %v4167_v63 = vsel %vm443_vm4, %v7816_v54, 0.0 }
0x1a0e   :  { %4168 = vadd.xlane.f32.xlu0 %v4167_v63 }
0x1a97   :  { %v4166_v2 = vpop.xlane.xlu1 %4165 }
0x1a98   :  { %7817 = vrcp.f32 %v4166_v2  ;;  %v6532_v2 = vld [vmem:[%s8957_s4 + $0xe8] sm:$0xff] }
0x1a9b   :  { %v4169_v3 = vpop.xlane.xlu0 %4168 }
0x1a9c   :  { %7819 = vrcp.f32 %v4169_v3 }
0x1aa2   :  { %v7818_v4 = vpop.eup %7817 }
0x1aa3   :  { %v4171_v5 = vmul.f32 %v7818_v4, %v7814_v48  ;;  %v6528_v4 = vld [vmem:[%s8928_s9 + $0x30] sm:$0xff] }
0x1aa5   :  { %7284 = vmatmul.mubr.msk.f32.vlgmr.msra.gmra.mrb[36].mxu0 %vm443_vm4, %v4171_v5 }
0x1aa6   :  { %v7820_v8 = vpop.eup %7819  ;;  %7292 = vmatpush3.msra.mxu0 %v6493_v17  ;;  %v6549_v17 = vld [vmem:[%s8926_s7 + $0xf0] sm:$0xff] }
0x1aa7   :  { %v4173_v9 = vmul.f32 %v7820_v8, %v7816_v54  ;;  %7296 = vmatprep.subr.mxu0 %v6462_v18  ;;  %v6534_v8 = vld [vmem:[%s8957_s4 + $0xf8] sm:$0xff] }
0x1aa8   :  { %v7693_v12 = vpack.c.bf16 %v6534_v8, %v6533_v7  ;;  %v6561_v8 = vld [vmem:[%s8928_s9 + $0x38] sm:$0xff] }
0x1aa9   :  { %7289 = vmatmul.mubr.msk.f32.vlgmr.msra.gmra.mrb[52].mxu1 %vm443_vm4, %v4173_v9 }
0x1aaa   :  { %7668 = vmatpush3.bf16.msra.mxu1 %v7665_v1  ;;  %7309 = vmatprep.mubr.msk.f32.mxu1 %vm189_vm2, %v8504_v26  ;;  %v6531_v1 = vld [vmem:[%s8957_s4 + $0xe0] sm:$0xff] }
0x1aab   :  { %7670 = vmatprep.subr.bf16.mxu1 %v7669_v10  ;;  %v7689_v3 = vpack.c.bf16 %v6532_v2, %v6531_v1 }
0x1aae   :  { %7672 = vmatpush3.bf16.msra.mxu1 %v7669_v10 }
0x1aaf   :  { %7682 = vmatprep.subr.bf16.mxu1 %v7681_v13 }
0x1ab1   :  { %7310 = vmatmul.mubr.msk.f32.vlgmr.msra.gmra.mrb[54].mxu1 %vm189_vm2, %v8506_v27 }
0x1ab2   :  { %7684 = vmatpush3.bf16.msra.mxu1 %v7681_v13  ;;  %7331 = vmatprep.mubr.msk.f32.mxu1 %vm189_vm2, %v8504_v26 }
0x1ab3   :  { %7686 = vmatprep.subr.bf16.mxu1 %v7685_v16 }
0x1ab6   :  { %7688 = vmatpush3.bf16.msra.mxu1 %v7685_v16  ;;  %v7705_v16 = vpack.c.bf16 %v6548_v15, %v6547_v14 }
0x1ab7   :  { %7339 = vmatprep.subr.mxu1 %v7871_v56 }
0x1ab9   :  { %7332 = vmatmul.mubr.msk.f32.vlgmr.msra.gmra.mrb[56].mxu1 %vm189_vm2, %v8506_v27 }
0x1aba   :  { %7341 = vmatprep.mubr.msk.f32.mxu1 %vm7872_vm3, %v7871_v56 }
0x1b78   :  { %v4243_v19 = vpop.f32.mrb[36].mxu0 }
0x1b79   :  { %v7285_v22 = vpop.f32.mrb[37].mxu0  ;;  %7293 = vmatprep.mubr.msk.f32.mxu0 %vm443_vm4, %v4243_v19 }
0x1b7a   :  { %v7697_v22 = vpack.c.bf16 %v6540_v21, %v6539_v20 }
0x1b7c   :  { %v4316_v28 = vpop.f32.mrb[52].mxu1 }
0x1b7d   :  { %v7290_v29 = vpop.f32.mrb[53].mxu1  ;;  %7294 = vmatmul.mubr.msk.f32.vlgmr.msra.gmra.mrb[38].mxu0 %vm443_vm4, %v4316_v28  ;;  %v6542_v28 = vld [vmem:[%s8958_s3 + $0xf8] sm:$0xff] }
0x1b7e   :  { %7297 = vmatpush3.msra.mxu0 %v6462_v18  ;;  %7298 = vmatprep.mubr.msk.f32.mxu0 %vm443_vm4, %v8604_v23  ;;  %v6550_v18 = vld [vmem:[%s8926_s7 + $0xf8] sm:$0xff] }
0x1b7f   :  { %7674 = vmatprep.subr.bf16.mxu0 %v7673_v24  ;;  %v7709_v19 = vpack.c.bf16 %v6550_v18, %v6549_v17 }
0x1b84   :  { %v7311_v35 = vpop.f32.mrb[54].mxu1 }
0x1b85   :  { %v4563_v36 = vpop.f32.mrb[55].mxu1  ;;  %7299 = vmatmul.mubr.msk.f32.vlgmr.msra.gmra.mrb[38].mxu0 %vm443_vm4, %v8606_v25  ;;  %v6511_v25 = vld [vmem:[%s8925_s6 + $0x6] ss:$0 sm:$0xff]  ;;  %v4569_v44 = vadd.f32 %v7311_v35, %v6503_v39 }
0x1b86   :  { %7676 = vmatpush3.bf16.msra.mxu0 %v7673_v24  ;;  %7320 = vmatprep.mubr.msk.f32.mxu0 %vm189_vm2, %v8504_v26  ;;  %v4564_v45 = vadd.f32 %v6503_v39, %v4563_v36  ;;  %v6541_v24 = vld [vmem:[%s8958_s3 + $0xf0] sm:$0xff] }
0x1b87   :  { %7678 = vmatprep.subr.bf16.mxu0 %v7677_v34 }
0x1b8a   :  { %7680 = vmatpush3.bf16.msra.mxu0 %v7677_v34  ;;  %v7701_v34 = vpack.c.bf16 %v6542_v28, %v6541_v24 }
0x1b8b   :  { %7334 = vmatprep.subr.mxu0 %v7871_v56 }
0x1b8c   :  { %v7333_v23 = vpop.f32.mrb[56].mxu1 }
0x1b8d   :  { %7321 = vmatmul.mubr.msk.f32.vlgmr.msra.gmra.mrb[40].mxu0 %vm189_vm2, %v8506_v27  ;;  %v4739_v37 = vpop.f32.mrb[57].mxu1  ;;  %v4745_v46 = vadd.f32 %v7333_v23, %v6519_v42 }
0x1b8e   :  { %7336 = vmatprep.mubr.msk.f32.mxu0 %vm7872_vm3, %v7871_v56  ;;  %v4740_v49 = vadd.f32 %v6519_v42, %v4739_v37  ;;  %v6552_v37 = vld [vmem:[%s8927_s8 + $0x7] ss:$0 sm:$0xff]  ;;  %s7874_s8 = smov [#allocation2]  }
0x1c60   :  { %v7322_v38 = vpop.f32.mrb[40].mxu0 }
0x1c61   :  { %v4657_v40 = vadd.f32 %v7322_v38, %v6511_v25  ;;  %v4651_v41 = vpop.f32.mrb[41].mxu0 }
0x1c62   :  { %v4652_v43 = vadd.f32 %v6511_v25, %v4651_v41  ;;  %v6544_v41 = vld [vmem:[%s8925_s6 + $0x7] ss:$0 sm:$0xff] }
0x1c63   :  { %7340 = vmatpush3.xpose.msk.msra.mxu1 %vm443_vm4, %v4657_v40 }
0x1c64   :  { %7335 = vmatpush3.xpose.msk.msra.mxu0 %vm443_vm4, %v4652_v43  ;;  %7349 = vmatprep.subr.mxu1 %v7871_v56 }
0x1c65   :  { %7344 = vmatprep.subr.mxu0 %v7871_v56 }
0x1c66   :  { %7342 = vmatmul.mubr.msk.f32.vlgmr.msra.gmra.mrb[58].mxu1 %vm443_vm4, %v4569_v44  ;;  %v6536_v44 = vld [vmem:[%s8960_s1 + $0x7] ss:$0 sm:$0xff]  ;;  %s6293_s1 = sshll.u32 %s7874_s8, 4  ;;  %s6294_s1 = int_to_ptr.vmem [resolvable:$true] %s6293_s1 }
0x1c67   :  { %7337 = vmatmul.mubr.msk.f32.vlgmr.msra.gmra.mrb[42].mxu0 %vm443_vm4, %v4564_v45  ;;  %7350 = vmatpush3.msra.mxu1 %v4745_v46  ;;  %p7850_p1 = scmp.lt.s32.totalorder %s6294_s1, %s6294_s1 }
0x1c68   :  { %7345 = vmatpush3.msra.mxu0 %v4740_v49  ;;  %7351 = vmatprep.mubr.msk.f32.mxu1 %vm7872_vm3, %v7871_v56 }
0x1c69   :  { %7346 = vmatprep.mubr.msk.f32.mxu0 %vm7872_vm3, %v7871_v56  ;;  %7690 = vmatprep.subr.bf16.mxu1 %v7689_v3 }
0x1c6a   :  { %7354 = vmatprep.subr.mxu0 %v6528_v4 }
0x1d39   :  { %v4896_v50 = vpop.f32.mrb[58].mxu1 }
0x1d3a   :  { %v4820_v51 = vpop.f32.mrb[42].mxu0  ;;  %v7343_v53 = vpop.f32.mrb[59].mxu1  ;;  %v4903_v55 = vsel %vm443_vm4, %v4896_v50, -inf }
0x1d3b   :  { %4904 = vmax.xlane.f32.xlu0 %v4903_v55  ;;  %v7338_v57 = vpop.f32.mrb[43].mxu0  ;;  %v4900_v58 = vsel %vm443_vm4, %v4820_v51, -inf }
0x1d3c   :  { %4901 = vmax.xlane.f32.xlu1 %v4900_v58 }
0x1dc8   :  { %v4905_v59 = vpop.xlane.xlu0 %4904 }
0x1dc9   :  { %v4907_v60 = vsub.f32 %v4896_v50, %v4905_v59  ;;  %v4902_v61 = vpop.xlane.xlu1 %4901 }
0x1dca   :  { %v4906_v62 = vsub.f32 %v4820_v51, %v4902_v61 }
0x1dcb   :  { %v4910_v48 = vmul.f32 1.442695, %v4907_v60 }
0x1dcc   :  { %v4908_v47 = vmul.f32 1.442695, %v4906_v62 }
0x1dcd   :  { %7821 = vpow2.f32 %v4910_v48 }
0x1dce   :  { %7823 = vpow2.f32 %v4908_v47 }
0x1dd7   :  { %v7822_v54 = vpop.eup %7821 }
0x1dd8   :  { %v7824_v63 = vpop.eup %7823  ;;  %v4915_v52 = vsel %vm443_vm4, %v7822_v54, 0.0 }
0x1dd9   :  { %4916 = vadd.xlane.f32.xlu0 %v4915_v52  ;;  %v4912_v0 = vsel %vm443_vm4, %v7824_v63, 0.0 }
0x1dda   :  { %4913 = vadd.xlane.f32.xlu1 %v4912_v0 }
0x1e66   :  { %v4917_v5 = vpop.xlane.xlu0 %4916 }
0x1e67   :  { %7825 = vrcp.f32 %v4917_v5  ;;  %v4914_v6 = vpop.xlane.xlu1 %4913 }
0x1e68   :  { %7827 = vrcp.f32 %v4914_v6 }
0x1e71   :  { %v7826_v9 = vpop.eup %7825 }
0x1e72   :  { %v7828_v10 = vpop.eup %7827  ;;  %v4921_v11 = vmul.f32 %v7826_v9, %v7822_v54 }
0x1e73   :  { %v4919_v13 = vmul.f32 %v7828_v10, %v7824_v63 }
0x1e74   :  { %7352 = vmatmul.mubr.msk.f32.vlgmr.msra.gmra.mrb[60].mxu1 %vm443_vm4, %v4921_v11 }
0x1e75   :  { %7692 = vmatpush3.bf16.msra.mxu1 %v7689_v3  ;;  %7347 = vmatmul.mubr.msk.f32.vlgmr.msra.gmra.mrb[44].mxu0 %vm443_vm4, %v4919_v13  ;;  %v6565_v13 = vld [vmem:[%s8929_s10 + $0x1] ss:$0 sm:$0xff] }
0x1e76   :  { %7367 = vmatprep.mubr.msk.f32.mxu1 %vm189_vm2, %v8504_v26  ;;  %7694 = vmatprep.subr.bf16.mxu1 %v7693_v12 }
0x1e77   :  { %7355 = vmatpush3.msra.mxu0 %v6528_v4 }
0x1e78   :  { %7698 = vmatprep.subr.bf16.mxu0 %v7697_v22 }
0x1e79   :  { %7696 = vmatpush3.bf16.msra.mxu1 %v7693_v12 }
0x1e7a   :  { %7706 = vmatprep.subr.bf16.mxu1 %v7705_v16 }
0x1e7c   :  { %7368 = vmatmul.mubr.msk.f32.vlgmr.msra.gmra.mrb[62].mxu1 %vm189_vm2, %v8506_v27 }
0x1e7d   :  { %7708 = vmatpush3.bf16.msra.mxu1 %v7705_v16  ;;  %7389 = vmatprep.mubr.msk.f32.mxu1 %vm189_vm2, %v8504_v26 }
0x1e7e   :  { %7710 = vmatprep.subr.bf16.mxu1 %v7709_v19 }
0x1e81   :  { %7712 = vmatpush3.bf16.msra.mxu1 %v7709_v19 }
0x1e82   :  { %7402 = vmatprep.subr.mxu1 %v7871_v56 }
0x1e84   :  { %7390 = vmatmul.mubr.msk.f32.vlgmr.msra.gmra.mrb[64].mxu1 %vm189_vm2, %v8506_v27 }
0x1e85   :  { %7404 = vmatprep.mubr.msk.f32.mxu1 %vm7872_vm3, %v7871_v56 }
0x1f47   :  { %v5064_v29 = vpop.f32.mrb[60].mxu1 }
0x1f48   :  { %v4991_v32 = vpop.f32.mrb[44].mxu0  ;;  %v7353_v33 = vpop.f32.mrb[61].mxu1 }
0x1f49   :  { %v7348_v35 = vpop.f32.mrb[45].mxu0  ;;  %7356 = vmatprep.mubr.msk.f32.mxu0 %vm443_vm4, %v4991_v32 }
0x1f4a   :  { %7357 = vmatmul.mubr.msk.f32.vlgmr.msra.gmra.mrb[38].mxu0 %vm443_vm4, %v5064_v29 }
0x1f4b   :  { %7700 = vmatpush3.bf16.msra.mxu0 %v7697_v22  ;;  %7378 = vmatprep.mubr.msk.f32.mxu0 %vm189_vm2, %v8504_v26 }
0x1f4c   :  { %7702 = vmatprep.subr.bf16.mxu0 %v7701_v34 }
0x1f4f   :  { %v7369_v36 = vpop.f32.mrb[62].mxu1  ;;  %7704 = vmatpush3.bf16.msra.mxu0 %v7701_v34 }
0x1f50   :  { %v5232_v23 = vpop.f32.mrb[63].mxu1  ;;  %7392 = vmatprep.subr.mxu0 %v7871_v56  ;;  %v5238_v50 = vadd.f32 %v7369_v36, %v6536_v44 }
0x1f51   :  { %v5233_v46 = vadd.f32 %v6536_v44, %v5232_v23  ;;  %v6571_v23 = vld [vmem:[%s8932_s13 + $0x28] sm:$0xff]  ;;  %v6581_v44 = vld [vmem:[%s8934_s15 + $0x58] sm:$0xff] }
0x1f52   :  { %7379 = vmatmul.mubr.msk.f32.vlgmr.msra.gmra.mrb[46].mxu0 %vm189_vm2, %v8506_v27 }
0x1f53   :  { %7394 = vmatprep.mubr.msk.f32.mxu0 %vm7872_vm3, %v7871_v56 }
0x1f57   :  { %v7391_v25 = vpop.f32.mrb[64].mxu1 }
0x1f58   :  { %v5414_v38 = vadd.f32 %v7391_v25, %v6552_v37  ;;  %v5408_v39 = vpop.f32.mrb[65].mxu1  ;;  %v6572_v25 = vld [vmem:[%s8932_s13 + $0x30] sm:$0xff] }
0x1f59   :  { %v5409_v40 = vadd.f32 %v6552_v37, %v5408_v39 }
0x1f5b   :  { %7403 = vmatpush3.msra.mxu1 %v5409_v40  ;;  %v6578_v40 = vld [vmem:[%s8934_s15 + $0x40] sm:$0xff] }
0x2025   :  { %v7380_v42 = vpop.f32.mrb[46].mxu0 }
0x2026   :  { %v5320_v43 = vpop.f32.mrb[47].mxu0  ;;  %v5326_v49 = vadd.f32 %v7380_v42, %v6544_v41  ;;  %v6580_v42 = vld [vmem:[%s8934_s15 + $0x50] sm:$0xff] }
0x2027   :  { %v5321_v45 = vadd.f32 %v6544_v41, %v5320_v43  ;;  %v6579_v41 = vld [vmem:[%s8934_s15 + $0x48] sm:$0xff] }
0x2028   :  { %v7721_v43 = vpack.c.bf16 %v6579_v41, %v6578_v40  ;;  %v6123_v40 = vshrl.u32 %v71_v30, 7  ;;  %v6202_v30 = vld [vmem:[%s8938_s19] sm:$0xff] }
0x2029   :  { %7393 = vmatpush3.xpose.msk.msra.mxu0 %vm443_vm4, %v5321_v45  ;;  %v7725_v45 = vpack.c.bf16 %v6581_v44, %v6580_v42  ;;  %v6592_v42 = vld [vmem:[%s8936_s17 + $0x1] ss:$0 sm:$0xff] }
0x202a   :  { %7397 = vmatprep.subr.mxu0 %v7871_v56 }
0x202c   :  { %7395 = vmatmul.mubr.msk.f32.vlgmr.msra.gmra.mrb[48].mxu0 %vm443_vm4, %v5233_v46  ;;  %v6582_v46 = vld [vmem:[%s8934_s15 + $0x60] sm:$0xff] }
0x202d   :  { %7398 = vmatpush3.xpose.msk.msra.mxu0 %vm443_vm4, %v5326_v49  ;;  %7399 = vmatprep.mubr.msk.f32.mxu0 %vm7872_vm3, %v7871_v56  ;;  %v6583_v49 = vld [vmem:[%s8934_s15 + $0x68] sm:$0xff] }
0x202e   :  { %7407 = vmatprep.subr.mxu0 %v7871_v56 }
0x2030   :  { %7400 = vmatmul.mubr.msk.f32.vlgmr.msra.gmra.mrb[50].mxu0 %vm443_vm4, %v5238_v50  ;;  %v7729_v50 = vpack.c.bf16 %v6583_v49, %v6582_v46  ;;  %v6593_v46 = vld [vmem:[%s8937_s18 + $0x1] ss:$0 sm:$0xff] }
0x2031   :  { %7408 = vmatpush3.msra.mxu0 %v5414_v38  ;;  %7409 = vmatprep.mubr.msk.f32.mxu0 %vm7872_vm3, %v7871_v56  ;;  %v6573_v38 = vld [vmem:[%s8932_s13 + $0x38] sm:$0xff] }
0x2032   :  { %7412 = vmatprep.subr.mxu0 %v6561_v8  ;;  %v7717_v39 = vpack.c.bf16 %v6573_v38, %v6572_v25 }
0x20ff   :  { %v5489_v51 = vpop.f32.mrb[48].mxu0 }
0x2100   :  { %v7396_v53 = vpop.f32.mrb[49].mxu0  ;;  %v5569_v55 = vsel %vm443_vm4, %v5489_v51, -inf }
0x2101   :  { %5570 = vmax.xlane.f32.xlu1 %v5569_v55 }
0x2103   :  { %v5565_v57 = vpop.f32.mrb[50].mxu0 }
0x2104   :  { %v7401_v58 = vpop.f32.mrb[51].mxu0  ;;  %v5572_v59 = vsel %vm443_vm4, %v5565_v57, -inf }
0x2105   :  { %5573 = vmax.xlane.f32.xlu0 %v5572_v59 }
0x218e   :  { %v5571_v60 = vpop.xlane.xlu1 %5570 }
0x218f   :  { %v5575_v61 = vsub.f32 %v5489_v51, %v5571_v60 }
0x2191   :  { %v5577_v62 = vmul.f32 1.442695, %v5575_v61  ;;  %v6568_v61 = vld [vmem:[%s8930_s11 + $0x1] ss:$0 sm:$0xff] }
0x2192   :  { %v5574_v48 = vpop.xlane.xlu0 %5573 }
0x2193   :  { %7829 = vpow2.f32 %v5577_v62  ;;  %v5576_v47 = vsub.f32 %v5565_v57, %v5574_v48 }
0x2195   :  { %v5579_v54 = vmul.f32 1.442695, %v5576_v47 }
0x2197   :  { %7831 = vpow2.f32 %v5579_v54  ;;  %v6569_v54 = vld [vmem:[%s8931_s12 + $0x1] ss:$0 sm:$0xff] }
0x219d   :  { %v7830_v63 = vpop.eup %7829 }
0x219e   :  { %v5581_v52 = vsel %vm443_vm4, %v7830_v63, 0.0 }
0x219f   :  { %5582 = vadd.xlane.f32.xlu1 %v5581_v52 }
0x21a1   :  { %v7832_v0 = vpop.eup %7831 }
0x21a2   :  { %v5584_v1 = vsel %vm443_vm4, %v7832_v0, 0.0 }
0x21a3   :  { %5585 = vadd.xlane.f32.xlu0 %v5584_v1 }
0x222c   :  { %v5583_v2 = vpop.xlane.xlu1 %5582 }
0x222d   :  { %7833 = vrcp.f32 %v5583_v2  ;;  %v6584_v2 = vld [vmem:[%s8934_s15 + $0x70] sm:$0xff] }
0x2230   :  { %v5586_v3 = vpop.xlane.xlu0 %5585 }
0x2231   :  { %7835 = vrcp.f32 %v5586_v3  ;;  %v6585_v3 = vld [vmem:[%s8934_s15 + $0x78] sm:$0xff] }
0x2237   :  { %v7834_v4 = vpop.eup %7833 }
0x2238   :  { %v5588_v5 = vmul.f32 %v7834_v4, %v7830_v63  ;;  %v7733_v4 = vpack.c.bf16 %v6585_v3, %v6584_v2 }
0x223a   :  { %7405 = vmatmul.mubr.msk.f32.vlgmr.msra.gmra.mrb[66].mxu1 %vm443_vm4, %v5588_v5  ;;  %v6575_v5 = vld [vmem:[%s8933_s14 + $0x1] ss:$0 sm:$0xff] }
0x223b   :  { %v7836_v6 = vpop.eup %7835 }
0x223c   :  { %v5590_v7 = vmul.f32 %v7836_v6, %v7832_v0 }
0x223e   :  { %7410 = vmatmul.mubr.msk.f32.vlgmr.msra.gmra.mrb[52].mxu0 %vm443_vm4, %v5590_v7 }
0x223f   :  { %7413 = vmatpush3.msra.mxu0 %v6561_v8 }
0x2240   :  { %7722 = vmatprep.subr.bf16.mxu0 %v7721_v43 }
0x230d   :  { %v5660_v9 = vpop.f32.mrb[66].mxu1 }
0x230e   :  { %v7406_v10 = vpop.f32.mrb[67].mxu1  ;;  %7414 = vmatprep.mubr.msk.f32.mxu0 %vm443_vm4, %v5660_v9 }
0x2311   :  { %v5733_v11 = vpop.f32.mrb[52].mxu0 }
0x2312   :  { %v7411_v12 = vpop.f32.mrb[53].mxu0  ;;  %7415 = vmatmul.mubr.msk.f32.vlgmr.msra.gmra.mrb[38].mxu0 %vm443_vm4, %v5733_v11 }
0x2313   :  { %7724 = vmatpush3.bf16.msra.mxu0 %v7721_v43  ;;  %v6587_v12 = vld [vmem:[%s8961_s28 + $0x1] ss:$0 sm:$0xff] }
0x2314   :  { %7726 = vmatprep.subr.bf16.mxu0 %v7725_v45 }
0x2317   :  { %7728 = vmatpush3.bf16.msra.mxu0 %v7725_v45 }
0x2318   :  { %7730 = vmatprep.subr.bf16.mxu0 %v7729_v50 }
0x231b   :  { %7732 = vmatpush3.bf16.msra.mxu0 %v7729_v50  ;;  %v6124_v50 = vmul.u32 8, %v6123_v40 }
0x231c   :  { %7734 = vmatprep.subr.bf16.mxu0 %v7733_v4 }
0x231d   :  { %vm6125_vm6 = vcmp.eq.s32.totalorder %v8046_v31, %v6124_v50  ;;  %v6205_v31 = vld [vmem:[%s8938_s19 + $0x18] sm:$0xff] }
0x231f   :  { %7736 = vmatpush3.bf16.msra.mxu0 %v7733_v4 }
0x23e5   :  { %v7416_v14 = vpop.f32.mrb[38].mxu0 }
0x23e6   :  { %v5831_v15 = vadd.f32 %v7416_v14, %v6565_v13  ;;  %v5811_v16 = vpop.f32.mrb[39].mxu0 }
0x23e7   :  { %v5830_v17 = vadd.f32 %v6565_v13, %v5811_v16 }
0x23e8   :  { %v5833_v18 = vadd.f32 %v5831_v15, %v8506_v27 }
0x23e9   :  { %v5832_v19 = vadd.f32 %v5830_v17, %v8504_v26  ;;  %v6570_v26 = vld [vmem:[%s8932_s13 + $0x20] sm:$0xff] }
0x23ea   :  { %v5841_v20 = vsel %vm189_vm2, %v5833_v18, 0.0  ;;  %v7713_v37 = vpack.c.bf16 %v6571_v23, %v6570_v26 }
0x23eb   :  { %5842 = vadd.xlane.f32.xlu0 %v5841_v20  ;;  %v5838_v21 = vsel %vm189_vm2, %v5832_v19, 0.0 }
0x23ec   :  { %5839 = vadd.xlane.f32.xlu1 %v5838_v21  ;;  %7714 = vmatprep.subr.bf16.mxu1 %v7713_v37 }
0x23ed   :  { %7716 = vmatpush3.bf16.msra.mxu1 %v7713_v37 }
0x23ee   :  { %7718 = vmatprep.subr.bf16.mxu1 %v7717_v39 }
0x23f1   :  { %7720 = vmatpush3.bf16.msra.mxu1 %v7717_v39 }
0x2478   :  { %v5843_v22 = vpop.xlane.xlu0 %5842 }
0x2479   :  { %v5845_v24 = vmul.f32 0.03125, %v5843_v22  ;;  %v5840_v28 = vpop.xlane.xlu1 %5839 }
0x247a   :  { %v5844_v29 = vmul.f32 0.03125, %v5840_v28 }
0x247b   :  { %v5847_v32 = vsub.f32 %v5833_v18, %v5845_v24 }
0x247c   :  { %v5846_v33 = vsub.f32 %v5832_v19, %v5844_v29 }
0x247d   :  { %v5849_v34 = vmul.f32 %v5847_v32, %v5847_v32 }
0x247e   :  { %v5848_v35 = vmul.f32 %v5846_v33, %v5846_v33 }
0x247f   :  { %v5853_v36 = vsel %vm189_vm2, %v5849_v34, 0.0 }
0x2480   :  { %5854 = vadd.xlane.f32.xlu0 %v5853_v36  ;;  %v5850_v27 = vsel %vm189_vm2, %v5848_v35, 0.0 }
0x2481   :  { %5851 = vadd.xlane.f32.xlu1 %v5850_v27  ;;  %v7873_v27 = vmov 0.0|0.0  }
0x2482   :  { %7737 = vmatprep.subr.bf16.mxu1 %v7873_v27 }
0x250d   :  { %v5855_v51 = vpop.xlane.xlu0 %5854 }
0x250e   :  { %v5857_v53 = vmul.f32 0.03125, %v5855_v51  ;;  %v5852_v55 = vpop.xlane.xlu1 %5851 }
0x250f   :  { %v5856_v57 = vmul.f32 0.03125, %v5852_v55 }
0x2510   :  { %v5859_v58 = vadd.f32 1e-05, %v5857_v53 }
0x2511   :  { %v5858_v59 = vadd.f32 1e-05, %v5856_v57  ;;  %v6203_v57 = vld [vmem:[%s8938_s19 + $0x8] sm:$0xff] }
0x2512   :  { %7837 = vrsqrt.f32 %v5859_v58 }
0x2513   :  { %7839 = vrsqrt.f32 %v5858_v59  ;;  %v6594_v59 = vsel %vm6125_vm6, 1.0, %v7871_v56 }
0x251c   :  { %v7838_v60 = vpop.eup %7837 }
0x251d   :  { %v7840_v62 = vpop.eup %7839  ;;  %v5863_v48 = vmul.f32 %v7838_v60, %v5847_v32  ;;  %v7741_v60 = vpack.c.bf16 %v6203_v57, %v6202_v30 }
0x251e   :  { %v5862_v47 = vmul.f32 %v7840_v62, %v5846_v33 }
0x251f   :  { %v5871_v63 = vmul.f32 %v6568_v61, %v5863_v48 }
0x2520   :  { %v5870_v52 = vmul.f32 %v6568_v61, %v5862_v47  ;;  %v6204_v61 = vld [vmem:[%s8938_s19 + $0x10] sm:$0xff]  ;;  %s7845_s19 = scalar_lea.vmem %s6294_s1, 32 }
0x2521   :  { %v5879_v1 = vadd.f32 %v6569_v54, %v5871_v63  ;;  %v7744_v62 = vpack.c.bf16 %v6205_v31, %v6204_v61  ;;  %p7846_p0 = scmp.ne.s32.totalorder %s6294_s1, %s7845_s19  ;;  %p7851_p2 = scmp.lt.s32.totalorder %s7845_s19, %s7845_s19 }
0x2522   :  { %v5878_v0 = vadd.f32 %v6569_v54, %v5870_v52  ;;  %v6596_v54 = vld [vmem:[%s8939_s20] ss:$0 sm:$0xff] }
0x2523   :  { %p7852_p3 = por %p7851_p2, %p7850_p1 }
0x2524   :  { %7425 = vmatprep.mubr.msk.f32.mxu1 %vm189_vm2, %v5878_v0 }
0x2525   :  { %7426 = vmatmul.mubr.msk.f32.vlgmr.msra.gmra.mrb[68].mxu1 %vm189_vm2, %v5879_v1  ;;  %p7853_p4 = pnand %p7852_p3, %p7846_p0 }
0x2526   :  { %7451 = vmatprep.mubr.msk.f32.mxu1 %vm7872_vm3, %v7871_v56 }
0x25f8   :  { %v7427_v6 = vpop.f32.mrb[68].mxu1 }
0x25f9   :  { %v5971_v7 = vadd.f32 %v7427_v6, %v6575_v5  ;;  %v5965_v8 = vpop.f32.mrb[69].mxu1 }
0x25fa   :  { %v5966_v9 = vadd.f32 %v6575_v5, %v5965_v8 }
0x25fb   :  { %v5975_v11 = vmax.f32 %v5971_v7, 0.0 }
0x25fc   :  { %v5974_v10 = vmax.f32 %v5966_v9, 0.0 }
0x25fe   :  { %7444 = vmatprep.mubr.msk.f32.mxu0 %vm3016_vm5, %v5974_v10 }
0x25ff   :  { %7445 = vmatmul.mubr.msk.f32.vlgmr.msra.gmra.mrb[54].mxu0 %vm3016_vm5, %v5975_v11 }
0x26d2   :  { %v7446_v13 = vpop.f32.mrb[54].mxu0 }
0x26d3   :  { %v6071_v14 = vadd.f32 %v7446_v13, %v6587_v12  ;;  %v6065_v15 = vpop.f32.mrb[55].mxu0 }
0x26d4   :  { %v6066_v16 = vadd.f32 %v6587_v12, %v6065_v15 }
0x26d5   :  { %v6075_v17 = vadd.f32 %v6071_v14, %v5879_v1 }
0x26d6   :  { %v6074_v18 = vadd.f32 %v6066_v16, %v5878_v0 }
0x26d7   :  { %v6083_v19 = vsel %vm189_vm2, %v6075_v17, 0.0 }
0x26d8   :  { %6084 = vadd.xlane.f32.xlu0 %v6083_v19  ;;  %v6080_v20 = vsel %vm189_vm2, %v6074_v18, 0.0 }
0x26d9   :  { %6081 = vadd.xlane.f32.xlu1 %v6080_v20 }
0x2765   :  { %v6085_v21 = vpop.xlane.xlu0 %6084 }
0x2766   :  { %v6087_v22 = vmul.f32 0.03125, %v6085_v21  ;;  %v6082_v24 = vpop.xlane.xlu1 %6081 }
0x2767   :  { %v6086_v28 = vmul.f32 0.03125, %v6082_v24 }
0x2768   :  { %v6089_v29 = vsub.f32 %v6075_v17, %v6087_v22 }
0x2769   :  { %v6088_v32 = vsub.f32 %v6074_v18, %v6086_v28 }
0x276a   :  { %v6091_v33 = vmul.f32 %v6089_v29, %v6089_v29 }
0x276b   :  { %v6090_v34 = vmul.f32 %v6088_v32, %v6088_v32 }
0x276c   :  { %v6095_v35 = vsel %vm189_vm2, %v6091_v33, 0.0 }
0x276d   :  { %6096 = vadd.xlane.f32.xlu0 %v6095_v35  ;;  %v6092_v36 = vsel %vm189_vm2, %v6090_v34, 0.0 }
0x276e   :  { %6093 = vadd.xlane.f32.xlu1 %v6092_v36 }
0x27fa   :  { %v6097_v26 = vpop.xlane.xlu0 %6096 }
0x27fb   :  { %v6099_v23 = vmul.f32 0.03125, %v6097_v26  ;;  %v6094_v37 = vpop.xlane.xlu1 %6093 }
0x27fc   :  { %v6098_v25 = vmul.f32 0.03125, %v6094_v37 }
0x27fd   :  { %v6101_v38 = vadd.f32 1e-05, %v6099_v23 }
0x27fe   :  { %v6100_v39 = vadd.f32 1e-05, %v6098_v25 }
0x27ff   :  { %7841 = vrsqrt.f32 %v6101_v38 }
0x2800   :  { %7843 = vrsqrt.f32 %v6100_v39 }
0x2809   :  { %v7842_v41 = vpop.eup %7841 }
0x280a   :  { %v7844_v43 = vpop.eup %7843  ;;  %v6105_v44 = vmul.f32 %v7842_v41, %v6089_v29 }
0x280b   :  { %v6104_v45 = vmul.f32 %v7844_v43, %v6088_v32 }
0x280c   :  { %v6113_v49 = vmul.f32 %v6592_v42, %v6105_v44 }
0x280d   :  { %v6112_v51 = vmul.f32 %v6592_v42, %v6104_v45 }
0x280e   :  { %v6121_v53 = vadd.f32 %v6593_v46, %v6113_v49 }
0x280f   :  { %v6120_v55 = vadd.f32 %v6593_v46, %v6112_v51 }
0x2811   :  { %v7738_v58 = vpack.c.bf16 %v6121_v53, %v6120_v55 }
0x2813   :  { %7739 = vmatpush3.bf16.msra.mxu1 %v7738_v58 }
0x2814   :  { %7740 = vmatprep.subr.bf16.mxu1 %v7873_v27 }
0x2816   :  { %7452 = vmatmul.mubr.msk.f32.vlgmr.msra.gmra.mrb[70].mxu1 %vm6128_vm7, %v6594_v59 }
0x2817   :  { %7742 = vmatpush3.bf16.msra.mxu1 %v7741_v60  ;;  %7462 = vmatprep.mubr.msk.f32.mxu1 %vm7872_vm3, %v7871_v56 }
0x2818   :  { %7743 = vmatprep.subr.bf16.mxu1 %v7873_v27 }
0x281b   :  { %7745 = vmatpush3.bf16.msra.mxu1 %v7744_v62 }
0x28e9   :  { %v6198_v48 = vpop.f32.mrb[70].mxu1 }
0x28ea   :  { %v7453_v47 = vpop.f32.mrb[71].mxu1  ;;  %7463 = vmatmul.mubr.msk.f32.vlgmr.msra.gmra.mrb[72].mxu1 %vm189_vm2, %v6198_v48 }
0x29bd   :  { %v6282_v63 = vpop.f32.mrb[72].mxu1 }
0x29be   :  { %v6283_v52 = vadd.f32 %v6596_v54, %v6282_v63  ;;  %v7464_v0 = vpop.f32.mrb[73].mxu1 }
0x29c0   :  { %6286 = vst [vmem:[#allocation2] sm:$0x3] %v6283_v52 }
0x29c1   :  { %7856 = shalt.err (!%p7853_p4)
}
0x29c2   :  { %s7857_s10 = scalar_lea.hbm %s8940_s21, 32 }
0x29c3   :  { %p7858_p5 = scmp.ne.s32.totalorder %s8940_s21, %s7857_s10  ;;  %p7861_p6 = scmp.lt.u32.totalorder %s7857_s10, %s8940_s21 }
0x29c5   :  { %p7863_p7 = pnand %p7861_p6, %p7858_p5 }
0x29c7   :  { %7866 = shalt.err (!%p7863_p7)
}
0x29c8   :  { %6296 = dma.vmem_to_hbm [thread:$0]  %s6294_s1, 32, %s8940_s21, [#allocation3]  }
0x29c9   :  { %7867 = dma.done.wait [#allocation3], 32  }
0x29ca   :  { %7868 = vsyncadd [#allocation3], 4294967264 }
0x29cb   :  { %6300 = vsyncpa [#allocation3], 1 }

</bundles_post_ra>
